<compile_context>
chip_gen: v6e
topology: v6e:2x2x1
jax: 0.10.0
libtpu: 0.0.40
codegen_flags: <defaults>
</compile_context>

<pallas_src>
import functools

import jax
import jax.numpy as jnp
from jax.experimental import pallas as pl
from jax.experimental.pallas import tpu as pltpu

SPP_LEVELS = ((4, 4), (2, 2), (1, 1))  # "Pool([[4,4],[2,2],[1,1]])"


def _pointsift_kernel(radius, xyz_t_ref, xyz_ref, w_ref, b_ref, out_ref):
    G, _, N = xyz_t_ref.shape
    C = w_ref.shape[1]
    judge = jnp.float32(radius * radius)
    BIG = jnp.float32(1e10)

    xyz_t = xyz_t_ref[...]                              # [G, 3, N]  (coords on sublanes)
    xyz = xyz_ref[...]                                  # [G, N, 3]

    # Lane-dense pairwise coordinate-difference planes: d*[g,n,m] = coord[g,m] - coord[g,n]
    xc = xyz_t[:, 0, :]
    yc = xyz_t[:, 1, :]
    zc = xyz_t[:, 2, :]                                 # [G, N]
    dx = xc[:, None, :] - xc[:, :, None]                # [G, N, N]
    dy = yc[:, None, :] - yc[:, :, None]
    dz = zc[:, None, :] - zc[:, :, None]

    dist = dx * dx + dy * dy + dz * dz                  # [G, N, N]
    # octant code, same as torch: sum((xyz - centroid + 1).int() * [4, 2, 1])
    # (.astype(int32) truncates toward zero exactly like torch .int())
    sub = ((dx + 1.0).astype(jnp.int32) * 4
           + (dy + 1.0).astype(jnp.int32) * 2
           + (dz + 1.0).astype(jnp.int32))              # [G, N, N] int32

    m_iota = jax.lax.broadcasted_iota(jnp.int32, (G, N, N), 2)
    n_iota = jax.lax.broadcasted_iota(jnp.int32, (G, N, N), 1)
    is_self = m_iota == n_iota
    valid = (dist > 1e-10) & (dist < judge)
    # Hoisted invariant masking:
    #   base    : self -> judge, valid neighbour -> dist, else BIG   (used when sub == i)
    #   self_fb : self -> judge, else BIG                            (used when sub != i)
    base = jnp.where(is_self, judge, jnp.where(valid, dist, BIG))    # [G, N, N]
    self_fb = jnp.where(is_self, judge, BIG)                         # [G, N, N]

    # proj = xyz @ W  with K=3 done on the VPU as three broadcasted outer products
    w = w_ref[...]                                      # [3, C]
    bias = b_ref[...]                                   # [1, C]
    proj = (xyz[:, :, 0:1] * w[0:1, :]
            + xyz[:, :, 1:2] * w[1:2, :]
            + xyz[:, :, 2:3] * w[2:3, :])               # [G, N, C]
    corr = bias - proj                                  # [G, N, C]  feat = gathered + corr

    def octant_gather(i):
        # argmin with first-index tie-breaking, self as fallback (matches torch.min)
        d_i = jnp.where(sub == i, base, self_fb)                      # [G, N, N]
        min_v = jnp.min(d_i, axis=-1, keepdims=True)                  # [G, N, 1]
        cand = jnp.where(d_i <= min_v, m_iota, N)
        first = jnp.min(cand, axis=-1, keepdims=True)                 # [G, N, 1]
        oh = (m_iota == first).astype(jnp.float32)                    # [G, N, N]
        # one-hot gather of the projected neighbour features (MXU, K=N, out=C)
        return jnp.einsum('gnm,gmc->gnc', oh, proj,
                          preferred_element_type=jnp.float32)          # [G, N, C]

    # TODO(synk): the `Pool` class is not defined in the reference source; implemented
    # as classic spatial-pyramid adaptive max pooling over the (8, C) dims with output
    # sizes (4,4),(2,2),(1,1), keeping the point axis -> 21 features / point.
    ww4 = C // 4
    feats_l4 = []                                       # 16 x [G, N], octant-bin major
    for a in range(4):
        # group max over the two octants of bin `a`; affine correction applied once (exact)
        gm = jnp.maximum(octant_gather(2 * a), octant_gather(2 * a + 1)) + corr  # [G,N,C]
        for b in range(4):
            feats_l4.append(jnp.max(gm[:, :, b * ww4:(b + 1) * ww4], axis=-1))

    # (2,2) and (1,1) levels are exact maxes over the (4,4) bins (max is associative)
    feats_l2 = []
    for a2 in range(2):
        for b2 in range(2):
            v = jnp.maximum(
                jnp.maximum(feats_l4[(2 * a2) * 4 + 2 * b2],
                            feats_l4[(2 * a2) * 4 + 2 * b2 + 1]),
                jnp.maximum(feats_l4[(2 * a2 + 1) * 4 + 2 * b2],
                            feats_l4[(2 * a2 + 1) * 4 + 2 * b2 + 1]))
            feats_l2.append(v)
    feat_l1 = jnp.maximum(jnp.maximum(feats_l2[0], feats_l2[1]),
                          jnp.maximum(feats_l2[2], feats_l2[3]))

    # single store: [G, n_feat, N] (points on lanes)
    out_ref[...] = jnp.stack(feats_l4 + feats_l2 + [feat_l1], axis=1)


def _pick_clouds_per_step(BT, N, C):
    """Largest divisor of BT that fits the VMEM budget and keeps >=2 grid steps."""
    # Rough per-cloud VMEM footprint: ~14 live [N,N] f32 planes + ~4 [N,C] f32 planes.
    per_cloud = 14 * N * N * 4 + 4 * N * C * 4
    budget = 20 * 1024 * 1024                       # leave headroom under the 32 MiB limit
    g_cap = max(1, budget // max(per_cloud, 1))
    if BT >= 2:
        g_cap = min(g_cap, BT // 2)                 # keep >=2 steps for the parallel axis
    g_cap = min(g_cap, BT)
    for cand in range(int(g_cap), 0, -1):
        if BT % cand == 0:
            return cand
    return 1


def pointsift_module_forward(x, params, radius, clouds_per_step=None):
    """x: [B, T, N, 3] float32 -> [B, T, N, 21] float32."""
    B, T, N, C3 = x.shape
    assert C3 == 3
    BT = B * T
    w1, b1, w2, b2, w3, b3 = params
    C = w1.shape[1]
    assert C % 4 == 0, "SPP bins assume output_channel divisible by 4"
    n_feat = sum(ph * pw for ph, pw in SPP_LEVELS)      # 21

    # Fold the three bias-only 1x1 convs into one affine map (exact up to f32 rounding order).
    W = (w1 @ w2 @ w3).astype(jnp.float32)              # [3, C]
    bias = ((b1 @ w2 + b2) @ w3 + b3).astype(jnp.float32)  # [1, C]

    xyz = x.reshape(BT, N, 3).astype(jnp.float32)       # [BT, N, 3]
    xyz_t = jnp.transpose(xyz, (0, 2, 1))               # [BT, 3, N] lane-dense view

    if clouds_per_step is None:
        G = _pick_clouds_per_step(BT, N, C)
    else:
        G = clouds_per_step
        assert BT % G == 0

    kernel = functools.partial(_pointsift_kernel, float(radius))
    out_t = pl.pallas_call(
        kernel,
        out_shape=jax.ShapeDtypeStruct((BT, n_feat, N), jnp.float32),
        grid=(BT // G,),
        in_specs=[
            pl.BlockSpec((G, 3, N), lambda s: (s, 0, 0)),   # transposed xyz (planes)
            pl.BlockSpec((G, N, 3), lambda s: (s, 0, 0)),   # xyz (projection)
            pl.BlockSpec((3, C), lambda s: (0, 0)),         # folded weight
            pl.BlockSpec((1, C), lambda s: (0, 0)),         # folded bias
        ],
        out_specs=pl.BlockSpec((G, n_feat, N), lambda s: (s, 0, 0)),
        compiler_params=pltpu.CompilerParams(
            dimension_semantics=("parallel",),
            vmem_limit_bytes=32 * 1024 * 1024),
    )(xyz_t, xyz, W, bias)

    # [BT, 21, N] -> [B, T, N, 21]
    return jnp.transpose(out_t, (0, 2, 1)).reshape(B, T, N, n_feat)


def init_params(key, c_out):
    ks = jax.random.split(key, 6)
    w1 = jax.random.normal(ks[0], (3, c_out), jnp.float32) * 0.1
    b1 = jax.random.normal(ks[1], (1, c_out), jnp.float32) * 0.01
    w2 = jax.random.normal(ks[2], (c_out, c_out), jnp.float32) * 0.1
    b2 = jax.random.normal(ks[3], (1, c_out), jnp.float32) * 0.01
    w3 = jax.random.normal(ks[4], (c_out, c_out), jnp.float32) * 0.1
    b3 = jax.random.normal(ks[5], (1, c_out), jnp.float32) * 0.01
    return (w1, b1, w2, b2, w3, b3)


if __name__ == "__main__":
    key = jax.random.PRNGKey(0)
    kx, kp = jax.random.split(key)

    B, T, N, C_out = 2, 4, 16, 32
    radius = 0.3

    x = jax.random.uniform(kx, (B, T, N, 3), dtype=jnp.float32)
    params = init_params(kp, C_out)

    out = pointsift_module_forward(x, params, radius)
    out = jax.block_until_ready(out)
    assert out.shape == (B, T, N, 21), out.shape
    assert bool(jnp.all(jnp.isfinite(out)))
    print("KERNEL_OK")
</pallas_src>

<mosaic_0001>
module attributes {stable_mosaic.version = 11 : i64} {
  func.func @_pointsift_kernel(%arg0: i32, %arg1: memref<4x3x16xf32, #tpu.memory_space<vmem>>, %arg2: memref<4x16x3xf32, #tpu.memory_space<vmem>>, %arg3: memref<3x32xf32, #tpu.memory_space<vmem>>, %arg4: memref<1x32xf32, #tpu.memory_space<vmem>>, %arg5: memref<4x21x16xf32, #tpu.memory_space<vmem>>) attributes {dimension_semantics = [#tpu.dimension_semantics<parallel>], iteration_bounds = array<i64: 2>, scalar_prefetch = 0 : i64, scratch_operands = 0 : i64, tpu.core_type = #tpu.core_type<tc>, window_params = [{transform_indices = @transform_0, window_bounds = array<i64: 4, 3, 16>}, {transform_indices = @transform_1, window_bounds = array<i64: 4, 16, 3>}, {pipeline_mode = #tpu.pipeline_mode<synchronous>, transform_indices = @transform_2, window_bounds = array<i64: 3, 32>}, {pipeline_mode = #tpu.pipeline_mode<synchronous>, transform_indices = @transform_3, window_bounds = array<i64: 1, 32>}, {transform_indices = @transform_4, window_bounds = array<i64: 4, 21, 16>}]} {
    %c0 = arith.constant 0 : index
    %c0_0 = arith.constant 0 : index
    %c0_1 = arith.constant 0 : index
    %0 = vector.load %arg1[%c0, %c0_0, %c0_1] : memref<4x3x16xf32, #tpu.memory_space<vmem>>, vector<4x3x16xf32>
    %c0_2 = arith.constant 0 : index
    %c0_3 = arith.constant 0 : index
    %c0_4 = arith.constant 0 : index
    %1 = vector.load %arg2[%c0_2, %c0_3, %c0_4] : memref<4x16x3xf32, #tpu.memory_space<vmem>>, vector<4x16x3xf32>
    %2 = vector.extract_strided_slice %0 {offsets = [0, 0, 0], sizes = [4, 1, 16], strides = [1, 1, 1]} : vector<4x3x16xf32> to vector<4x1x16xf32>
    %3 = vector.shape_cast %2 : vector<4x1x16xf32> to vector<4x16xf32>
    %4 = vector.extract_strided_slice %0 {offsets = [0, 1, 0], sizes = [4, 1, 16], strides = [1, 1, 1]} : vector<4x3x16xf32> to vector<4x1x16xf32>
    %5 = vector.shape_cast %4 : vector<4x1x16xf32> to vector<4x16xf32>
    %6 = vector.extract_strided_slice %0 {offsets = [0, 2, 0], sizes = [4, 1, 16], strides = [1, 1, 1]} : vector<4x3x16xf32> to vector<4x1x16xf32>
    %7 = vector.shape_cast %6 : vector<4x1x16xf32> to vector<4x16xf32>
    %8 = vector.shape_cast %3 : vector<4x16xf32> to vector<4x1x16xf32>
    %9 = vector.shape_cast %3 : vector<4x16xf32> to vector<4x16x1xf32>
    %10 = vector.broadcast %8 : vector<4x1x16xf32> to vector<4x16x16xf32>
    %11 = vector.broadcast %9 : vector<4x16x1xf32> to vector<4x16x16xf32>
    %12 = arith.subf %10, %11 : vector<4x16x16xf32>
    %13 = vector.shape_cast %5 : vector<4x16xf32> to vector<4x1x16xf32>
    %14 = vector.shape_cast %5 : vector<4x16xf32> to vector<4x16x1xf32>
    %15 = vector.broadcast %13 : vector<4x1x16xf32> to vector<4x16x16xf32>
    %16 = vector.broadcast %14 : vector<4x16x1xf32> to vector<4x16x16xf32>
    %17 = arith.subf %15, %16 : vector<4x16x16xf32>
    %18 = vector.shape_cast %7 : vector<4x16xf32> to vector<4x1x16xf32>
    %19 = vector.shape_cast %7 : vector<4x16xf32> to vector<4x16x1xf32>
    %20 = vector.broadcast %18 : vector<4x1x16xf32> to vector<4x16x16xf32>
    %21 = vector.broadcast %19 : vector<4x16x1xf32> to vector<4x16x16xf32>
    %22 = arith.subf %20, %21 : vector<4x16x16xf32>
    %23 = arith.mulf %12, %12 : vector<4x16x16xf32>
    %24 = arith.mulf %17, %17 : vector<4x16x16xf32>
    %25 = arith.addf %23, %24 : vector<4x16x16xf32>
    %26 = arith.mulf %22, %22 : vector<4x16x16xf32>
    %27 = arith.addf %25, %26 : vector<4x16x16xf32>
    %cst = arith.constant 1.000000e+00 : f32
    %28 = vector.broadcast %cst : f32 to vector<4x16x16xf32>
    %29 = arith.addf %12, %28 : vector<4x16x16xf32>
    %30 = arith.fptosi %29 : vector<4x16x16xf32> to vector<4x16x16xi32>
    %c4_i32 = arith.constant 4 : i32
    %31 = vector.broadcast %c4_i32 : i32 to vector<4x16x16xi32>
    %32 = arith.muli %30, %31 : vector<4x16x16xi32>
    %cst_5 = arith.constant 1.000000e+00 : f32
    %33 = vector.broadcast %cst_5 : f32 to vector<4x16x16xf32>
    %34 = arith.addf %17, %33 : vector<4x16x16xf32>
    %35 = arith.fptosi %34 : vector<4x16x16xf32> to vector<4x16x16xi32>
    %c2_i32 = arith.constant 2 : i32
    %36 = vector.broadcast %c2_i32 : i32 to vector<4x16x16xi32>
    %37 = arith.muli %35, %36 : vector<4x16x16xi32>
    %38 = arith.addi %32, %37 : vector<4x16x16xi32>
    %cst_6 = arith.constant 1.000000e+00 : f32
    %39 = vector.broadcast %cst_6 : f32 to vector<4x16x16xf32>
    %40 = arith.addf %22, %39 : vector<4x16x16xf32>
    %41 = arith.fptosi %40 : vector<4x16x16xf32> to vector<4x16x16xi32>
    %42 = arith.addi %38, %41 : vector<4x16x16xi32>
    %43 = tpu.iota {dimensions = array<i32: 2>} : vector<4x16x16xi32>
    %44 = tpu.iota {dimensions = array<i32: 1>} : vector<4x16x16xi32>
    %45 = arith.cmpi eq, %43, %44 : vector<4x16x16xi32>
    %cst_7 = arith.constant 1.000000e-10 : f32
    %46 = vector.broadcast %cst_7 : f32 to vector<4x16x16xf32>
    %47 = arith.cmpf ogt, %27, %46 : vector<4x16x16xf32>
    %cst_8 = arith.constant 9.000000e-02 : f32
    %48 = vector.broadcast %cst_8 : f32 to vector<4x16x16xf32>
    %49 = arith.cmpf olt, %27, %48 : vector<4x16x16xf32>
    %50 = arith.andi %47, %49 : vector<4x16x16xi1>
    %cst_9 = arith.constant 1.000000e+10 : f32
    %51 = vector.broadcast %cst_9 : f32 to vector<4x16x16xf32>
    %52 = arith.select %50, %27, %51 : vector<4x16x16xi1>, vector<4x16x16xf32>
    %cst_10 = arith.constant 9.000000e-02 : f32
    %53 = vector.broadcast %cst_10 : f32 to vector<4x16x16xf32>
    %54 = arith.select %45, %53, %52 : vector<4x16x16xi1>, vector<4x16x16xf32>
    %cst_11 = arith.constant 9.000000e-02 : f32
    %cst_12 = arith.constant 1.000000e+10 : f32
    %55 = vector.broadcast %cst_11 : f32 to vector<4x16x16xf32>
    %56 = vector.broadcast %cst_12 : f32 to vector<4x16x16xf32>
    %57 = arith.select %45, %55, %56 : vector<4x16x16xi1>, vector<4x16x16xf32>
    %c0_13 = arith.constant 0 : index
    %c0_14 = arith.constant 0 : index
    %58 = vector.load %arg3[%c0_13, %c0_14] : memref<3x32xf32, #tpu.memory_space<vmem>>, vector<3x32xf32>
    %c0_15 = arith.constant 0 : index
    %c0_16 = arith.constant 0 : index
    %59 = vector.load %arg4[%c0_15, %c0_16] : memref<1x32xf32, #tpu.memory_space<vmem>>, vector<1x32xf32>
    %60 = vector.extract_strided_slice %1 {offsets = [0, 0, 0], sizes = [4, 16, 1], strides = [1, 1, 1]} : vector<4x16x3xf32> to vector<4x16x1xf32>
    %61 = vector.extract_strided_slice %58 {offsets = [0, 0], sizes = [1, 32], strides = [1, 1]} : vector<3x32xf32> to vector<1x32xf32>
    %62 = vector.shape_cast %61 : vector<1x32xf32> to vector<1x1x32xf32>
    %63 = vector.broadcast %60 : vector<4x16x1xf32> to vector<4x16x32xf32>
    %64 = vector.broadcast %62 : vector<1x1x32xf32> to vector<4x16x32xf32>
    %65 = arith.mulf %63, %64 : vector<4x16x32xf32>
    %66 = vector.extract_strided_slice %1 {offsets = [0, 0, 1], sizes = [4, 16, 1], strides = [1, 1, 1]} : vector<4x16x3xf32> to vector<4x16x1xf32>
    %67 = vector.extract_strided_slice %58 {offsets = [1, 0], sizes = [1, 32], strides = [1, 1]} : vector<3x32xf32> to vector<1x32xf32>
    %68 = vector.shape_cast %67 : vector<1x32xf32> to vector<1x1x32xf32>
    %69 = vector.broadcast %66 : vector<4x16x1xf32> to vector<4x16x32xf32>
    %70 = vector.broadcast %68 : vector<1x1x32xf32> to vector<4x16x32xf32>
    %71 = arith.mulf %69, %70 : vector<4x16x32xf32>
    %72 = arith.addf %65, %71 : vector<4x16x32xf32>
    %73 = vector.extract_strided_slice %1 {offsets = [0, 0, 2], sizes = [4, 16, 1], strides = [1, 1, 1]} : vector<4x16x3xf32> to vector<4x16x1xf32>
    %74 = vector.extract_strided_slice %58 {offsets = [2, 0], sizes = [1, 32], strides = [1, 1]} : vector<3x32xf32> to vector<1x32xf32>
    %75 = vector.shape_cast %74 : vector<1x32xf32> to vector<1x1x32xf32>
    %76 = vector.broadcast %73 : vector<4x16x1xf32> to vector<4x16x32xf32>
    %77 = vector.broadcast %75 : vector<1x1x32xf32> to vector<4x16x32xf32>
    %78 = arith.mulf %76, %77 : vector<4x16x32xf32>
    %79 = arith.addf %72, %78 : vector<4x16x32xf32>
    %80 = vector.shape_cast %59 : vector<1x32xf32> to vector<1x1x32xf32>
    %81 = vector.broadcast %80 : vector<1x1x32xf32> to vector<4x16x32xf32>
    %82 = arith.subf %81, %79 : vector<4x16x32xf32>
    %c0_i32 = arith.constant 0 : i32
    %83 = vector.broadcast %c0_i32 : i32 to vector<4x16x16xi32>
    %84 = arith.cmpi eq, %42, %83 : vector<4x16x16xi32>
    %85 = arith.select %84, %54, %57 : vector<4x16x16xi1>, vector<4x16x16xf32>
    %cst_17 = arith.constant dense<0x7F800000> : vector<4x16xf32>
    %86 = vector.multi_reduction <minimumf>, %85, %cst_17 [2] : vector<4x16x16xf32> to vector<4x16xf32>
    %87 = vector.shape_cast %86 : vector<4x16xf32> to vector<4x16x1xf32>
    %88 = vector.broadcast %87 : vector<4x16x1xf32> to vector<4x16x16xf32>
    %89 = arith.cmpf ole, %85, %88 : vector<4x16x16xf32>
    %c16_i32 = arith.constant 16 : i32
    %90 = vector.broadcast %c16_i32 : i32 to vector<4x16x16xi32>
    %91 = arith.select %89, %43, %90 : vector<4x16x16xi1>, vector<4x16x16xi32>
    %cst_18 = arith.constant dense<2147483647> : vector<4x16xi32>
    %92 = vector.multi_reduction <minsi>, %91, %cst_18 [2] : vector<4x16x16xi32> to vector<4x16xi32>
    %93 = vector.shape_cast %92 : vector<4x16xi32> to vector<4x16x1xi32>
    %94 = vector.broadcast %93 : vector<4x16x1xi32> to vector<4x16x16xi32>
    %95 = arith.cmpi eq, %43, %94 : vector<4x16x16xi32>
    %96 = arith.extui %95 : vector<4x16x16xi1> to vector<4x16x16xi32>
    %97 = arith.sitofp %96 : vector<4x16x16xi32> to vector<4x16x16xf32>
    "tpu.trace_start"() <{level = 10 : i32, message = "gnm,gmc->gnc"}> : () -> ()
    %cst_19 = arith.constant dense<0.000000e+00> : vector<4x16x32xf32>
    %98 = tpu.matmul %97, %79, %cst_19 {dimension_numbers = #tpu.dot_dimension_numbers<[2], [1], [1], [2], [0, 0, 0, 1, 1, 2], [0], [0]>} : vector<4x16x16xf32>, vector<4x16x32xf32>, vector<4x16x32xf32> -> vector<4x16x32xf32>
    %c1_i32 = arith.constant 1 : i32
    "tpu.trace_stop"() : () -> ()
    %99 = vector.broadcast %c1_i32 : i32 to vector<4x16x16xi32>
    %100 = arith.cmpi eq, %42, %99 : vector<4x16x16xi32>
    %101 = arith.select %100, %54, %57 : vector<4x16x16xi1>, vector<4x16x16xf32>
    %cst_20 = arith.constant dense<0x7F800000> : vector<4x16xf32>
    %102 = vector.multi_reduction <minimumf>, %101, %cst_20 [2] : vector<4x16x16xf32> to vector<4x16xf32>
    %103 = vector.shape_cast %102 : vector<4x16xf32> to vector<4x16x1xf32>
    %104 = vector.broadcast %103 : vector<4x16x1xf32> to vector<4x16x16xf32>
    %105 = arith.cmpf ole, %101, %104 : vector<4x16x16xf32>
    %c16_i32_21 = arith.constant 16 : i32
    %106 = vector.broadcast %c16_i32_21 : i32 to vector<4x16x16xi32>
    %107 = arith.select %105, %43, %106 : vector<4x16x16xi1>, vector<4x16x16xi32>
    %cst_22 = arith.constant dense<2147483647> : vector<4x16xi32>
    %108 = vector.multi_reduction <minsi>, %107, %cst_22 [2] : vector<4x16x16xi32> to vector<4x16xi32>
    %109 = vector.shape_cast %108 : vector<4x16xi32> to vector<4x16x1xi32>
    %110 = vector.broadcast %109 : vector<4x16x1xi32> to vector<4x16x16xi32>
    %111 = arith.cmpi eq, %43, %110 : vector<4x16x16xi32>
    %112 = arith.extui %111 : vector<4x16x16xi1> to vector<4x16x16xi32>
    %113 = arith.sitofp %112 : vector<4x16x16xi32> to vector<4x16x16xf32>
    "tpu.trace_start"() <{level = 10 : i32, message = "gnm,gmc->gnc"}> : () -> ()
    %cst_23 = arith.constant dense<0.000000e+00> : vector<4x16x32xf32>
    %114 = tpu.matmul %113, %79, %cst_23 {dimension_numbers = #tpu.dot_dimension_numbers<[2], [1], [1], [2], [0, 0, 0, 1, 1, 2], [0], [0]>} : vector<4x16x16xf32>, vector<4x16x32xf32>, vector<4x16x32xf32> -> vector<4x16x32xf32>
    "tpu.trace_stop"() : () -> ()
    %115 = arith.maximumf %98, %114 : vector<4x16x32xf32>
    %116 = arith.addf %115, %82 : vector<4x16x32xf32>
    %117 = vector.extract_strided_slice %116 {offsets = [0, 0, 0], sizes = [4, 16, 8], strides = [1, 1, 1]} : vector<4x16x32xf32> to vector<4x16x8xf32>
    %cst_24 = arith.constant dense<0xFF800000> : vector<4x16xf32>
    %118 = vector.multi_reduction <maximumf>, %117, %cst_24 [2] : vector<4x16x8xf32> to vector<4x16xf32>
    %119 = vector.extract_strided_slice %116 {offsets = [0, 0, 8], sizes = [4, 16, 8], strides = [1, 1, 1]} : vector<4x16x32xf32> to vector<4x16x8xf32>
    %cst_25 = arith.constant dense<0xFF800000> : vector<4x16xf32>
    %120 = vector.multi_reduction <maximumf>, %119, %cst_25 [2] : vector<4x16x8xf32> to vector<4x16xf32>
    %121 = vector.extract_strided_slice %116 {offsets = [0, 0, 16], sizes = [4, 16, 8], strides = [1, 1, 1]} : vector<4x16x32xf32> to vector<4x16x8xf32>
    %cst_26 = arith.constant dense<0xFF800000> : vector<4x16xf32>
    %122 = vector.multi_reduction <maximumf>, %121, %cst_26 [2] : vector<4x16x8xf32> to vector<4x16xf32>
    %123 = vector.extract_strided_slice %116 {offsets = [0, 0, 24], sizes = [4, 16, 8], strides = [1, 1, 1]} : vector<4x16x32xf32> to vector<4x16x8xf32>
    %cst_27 = arith.constant dense<0xFF800000> : vector<4x16xf32>
    %124 = vector.multi_reduction <maximumf>, %123, %cst_27 [2] : vector<4x16x8xf32> to vector<4x16xf32>
    %c2_i32_28 = arith.constant 2 : i32
    %125 = vector.broadcast %c2_i32_28 : i32 to vector<4x16x16xi32>
    %126 = arith.cmpi eq, %42, %125 : vector<4x16x16xi32>
    %127 = arith.select %126, %54, %57 : vector<4x16x16xi1>, vector<4x16x16xf32>
    %cst_29 = arith.constant dense<0x7F800000> : vector<4x16xf32>
    %128 = vector.multi_reduction <minimumf>, %127, %cst_29 [2] : vector<4x16x16xf32> to vector<4x16xf32>
    %129 = vector.shape_cast %128 : vector<4x16xf32> to vector<4x16x1xf32>
    %130 = vector.broadcast %129 : vector<4x16x1xf32> to vector<4x16x16xf32>
    %131 = arith.cmpf ole, %127, %130 : vector<4x16x16xf32>
    %c16_i32_30 = arith.constant 16 : i32
    %132 = vector.broadcast %c16_i32_30 : i32 to vector<4x16x16xi32>
    %133 = arith.select %131, %43, %132 : vector<4x16x16xi1>, vector<4x16x16xi32>
    %cst_31 = arith.constant dense<2147483647> : vector<4x16xi32>
    %134 = vector.multi_reduction <minsi>, %133, %cst_31 [2] : vector<4x16x16xi32> to vector<4x16xi32>
    %135 = vector.shape_cast %134 : vector<4x16xi32> to vector<4x16x1xi32>
    %136 = vector.broadcast %135 : vector<4x16x1xi32> to vector<4x16x16xi32>
    %137 = arith.cmpi eq, %43, %136 : vector<4x16x16xi32>
    %138 = arith.extui %137 : vector<4x16x16xi1> to vector<4x16x16xi32>
    %139 = arith.sitofp %138 : vector<4x16x16xi32> to vector<4x16x16xf32>
    "tpu.trace_start"() <{level = 10 : i32, message = "gnm,gmc->gnc"}> : () -> ()
    %cst_32 = arith.constant dense<0.000000e+00> : vector<4x16x32xf32>
    %140 = tpu.matmul %139, %79, %cst_32 {dimension_numbers = #tpu.dot_dimension_numbers<[2], [1], [1], [2], [0, 0, 0, 1, 1, 2], [0], [0]>} : vector<4x16x16xf32>, vector<4x16x32xf32>, vector<4x16x32xf32> -> vector<4x16x32xf32>
    %c3_i32 = arith.constant 3 : i32
    "tpu.trace_stop"() : () -> ()
    %141 = vector.broadcast %c3_i32 : i32 to vector<4x16x16xi32>
    %142 = arith.cmpi eq, %42, %141 : vector<4x16x16xi32>
    %143 = arith.select %142, %54, %57 : vector<4x16x16xi1>, vector<4x16x16xf32>
    %cst_33 = arith.constant dense<0x7F800000> : vector<4x16xf32>
    %144 = vector.multi_reduction <minimumf>, %143, %cst_33 [2] : vector<4x16x16xf32> to vector<4x16xf32>
    %145 = vector.shape_cast %144 : vector<4x16xf32> to vector<4x16x1xf32>
    %146 = vector.broadcast %145 : vector<4x16x1xf32> to vector<4x16x16xf32>
    %147 = arith.cmpf ole, %143, %146 : vector<4x16x16xf32>
    %c16_i32_34 = arith.constant 16 : i32
    %148 = vector.broadcast %c16_i32_34 : i32 to vector<4x16x16xi32>
    %149 = arith.select %147, %43, %148 : vector<4x16x16xi1>, vector<4x16x16xi32>
    %cst_35 = arith.constant dense<2147483647> : vector<4x16xi32>
    %150 = vector.multi_reduction <minsi>, %149, %cst_35 [2] : vector<4x16x16xi32> to vector<4x16xi32>
    %151 = vector.shape_cast %150 : vector<4x16xi32> to vector<4x16x1xi32>
    %152 = vector.broadcast %151 : vector<4x16x1xi32> to vector<4x16x16xi32>
    %153 = arith.cmpi eq, %43, %152 : vector<4x16x16xi32>
    %154 = arith.extui %153 : vector<4x16x16xi1> to vector<4x16x16xi32>
    %155 = arith.sitofp %154 : vector<4x16x16xi32> to vector<4x16x16xf32>
    "tpu.trace_start"() <{level = 10 : i32, message = "gnm,gmc->gnc"}> : () -> ()
    %cst_36 = arith.constant dense<0.000000e+00> : vector<4x16x32xf32>
    %156 = tpu.matmul %155, %79, %cst_36 {dimension_numbers = #tpu.dot_dimension_numbers<[2], [1], [1], [2], [0, 0, 0, 1, 1, 2], [0], [0]>} : vector<4x16x16xf32>, vector<4x16x32xf32>, vector<4x16x32xf32> -> vector<4x16x32xf32>
    "tpu.trace_stop"() : () -> ()
    %157 = arith.maximumf %140, %156 : vector<4x16x32xf32>
    %158 = arith.addf %157, %82 : vector<4x16x32xf32>
    %159 = vector.extract_strided_slice %158 {offsets = [0, 0, 0], sizes = [4, 16, 8], strides = [1, 1, 1]} : vector<4x16x32xf32> to vector<4x16x8xf32>
    %cst_37 = arith.constant dense<0xFF800000> : vector<4x16xf32>
    %160 = vector.multi_reduction <maximumf>, %159, %cst_37 [2] : vector<4x16x8xf32> to vector<4x16xf32>
    %161 = vector.extract_strided_slice %158 {offsets = [0, 0, 8], sizes = [4, 16, 8], strides = [1, 1, 1]} : vector<4x16x32xf32> to vector<4x16x8xf32>
    %cst_38 = arith.constant dense<0xFF800000> : vector<4x16xf32>
    %162 = vector.multi_reduction <maximumf>, %161, %cst_38 [2] : vector<4x16x8xf32> to vector<4x16xf32>
    %163 = vector.extract_strided_slice %158 {offsets = [0, 0, 16], sizes = [4, 16, 8], strides = [1, 1, 1]} : vector<4x16x32xf32> to vector<4x16x8xf32>
    %cst_39 = arith.constant dense<0xFF800000> : vector<4x16xf32>
    %164 = vector.multi_reduction <maximumf>, %163, %cst_39 [2] : vector<4x16x8xf32> to vector<4x16xf32>
    %165 = vector.extract_strided_slice %158 {offsets = [0, 0, 24], sizes = [4, 16, 8], strides = [1, 1, 1]} : vector<4x16x32xf32> to vector<4x16x8xf32>
    %cst_40 = arith.constant dense<0xFF800000> : vector<4x16xf32>
    %166 = vector.multi_reduction <maximumf>, %165, %cst_40 [2] : vector<4x16x8xf32> to vector<4x16xf32>
    %c4_i32_41 = arith.constant 4 : i32
    %167 = vector.broadcast %c4_i32_41 : i32 to vector<4x16x16xi32>
    %168 = arith.cmpi eq, %42, %167 : vector<4x16x16xi32>
    %169 = arith.select %168, %54, %57 : vector<4x16x16xi1>, vector<4x16x16xf32>
    %cst_42 = arith.constant dense<0x7F800000> : vector<4x16xf32>
    %170 = vector.multi_reduction <minimumf>, %169, %cst_42 [2] : vector<4x16x16xf32> to vector<4x16xf32>
    %171 = vector.shape_cast %170 : vector<4x16xf32> to vector<4x16x1xf32>
    %172 = vector.broadcast %171 : vector<4x16x1xf32> to vector<4x16x16xf32>
    %173 = arith.cmpf ole, %169, %172 : vector<4x16x16xf32>
    %c16_i32_43 = arith.constant 16 : i32
    %174 = vector.broadcast %c16_i32_43 : i32 to vector<4x16x16xi32>
    %175 = arith.select %173, %43, %174 : vector<4x16x16xi1>, vector<4x16x16xi32>
    %cst_44 = arith.constant dense<2147483647> : vector<4x16xi32>
    %176 = vector.multi_reduction <minsi>, %175, %cst_44 [2] : vector<4x16x16xi32> to vector<4x16xi32>
    %177 = vector.shape_cast %176 : vector<4x16xi32> to vector<4x16x1xi32>
    %178 = vector.broadcast %177 : vector<4x16x1xi32> to vector<4x16x16xi32>
    %179 = arith.cmpi eq, %43, %178 : vector<4x16x16xi32>
    %180 = arith.extui %179 : vector<4x16x16xi1> to vector<4x16x16xi32>
    %181 = arith.sitofp %180 : vector<4x16x16xi32> to vector<4x16x16xf32>
    "tpu.trace_start"() <{level = 10 : i32, message = "gnm,gmc->gnc"}> : () -> ()
    %cst_45 = arith.constant dense<0.000000e+00> : vector<4x16x32xf32>
    %182 = tpu.matmul %181, %79, %cst_45 {dimension_numbers = #tpu.dot_dimension_numbers<[2], [1], [1], [2], [0, 0, 0, 1, 1, 2], [0], [0]>} : vector<4x16x16xf32>, vector<4x16x32xf32>, vector<4x16x32xf32> -> vector<4x16x32xf32>
    %c5_i32 = arith.constant 5 : i32
    "tpu.trace_stop"() : () -> ()
    %183 = vector.broadcast %c5_i32 : i32 to vector<4x16x16xi32>
    %184 = arith.cmpi eq, %42, %183 : vector<4x16x16xi32>
    %185 = arith.select %184, %54, %57 : vector<4x16x16xi1>, vector<4x16x16xf32>
    %cst_46 = arith.constant dense<0x7F800000> : vector<4x16xf32>
    %186 = vector.multi_reduction <minimumf>, %185, %cst_46 [2] : vector<4x16x16xf32> to vector<4x16xf32>
    %187 = vector.shape_cast %186 : vector<4x16xf32> to vector<4x16x1xf32>
    %188 = vector.broadcast %187 : vector<4x16x1xf32> to vector<4x16x16xf32>
    %189 = arith.cmpf ole, %185, %188 : vector<4x16x16xf32>
    %c16_i32_47 = arith.constant 16 : i32
    %190 = vector.broadcast %c16_i32_47 : i32 to vector<4x16x16xi32>
    %191 = arith.select %189, %43, %190 : vector<4x16x16xi1>, vector<4x16x16xi32>
    %cst_48 = arith.constant dense<2147483647> : vector<4x16xi32>
    %192 = vector.multi_reduction <minsi>, %191, %cst_48 [2] : vector<4x16x16xi32> to vector<4x16xi32>
    %193 = vector.shape_cast %192 : vector<4x16xi32> to vector<4x16x1xi32>
    %194 = vector.broadcast %193 : vector<4x16x1xi32> to vector<4x16x16xi32>
    %195 = arith.cmpi eq, %43, %194 : vector<4x16x16xi32>
    %196 = arith.extui %195 : vector<4x16x16xi1> to vector<4x16x16xi32>
    %197 = arith.sitofp %196 : vector<4x16x16xi32> to vector<4x16x16xf32>
    "tpu.trace_start"() <{level = 10 : i32, message = "gnm,gmc->gnc"}> : () -> ()
    %cst_49 = arith.constant dense<0.000000e+00> : vector<4x16x32xf32>
    %198 = tpu.matmul %197, %79, %cst_49 {dimension_numbers = #tpu.dot_dimension_numbers<[2], [1], [1], [2], [0, 0, 0, 1, 1, 2], [0], [0]>} : vector<4x16x16xf32>, vector<4x16x32xf32>, vector<4x16x32xf32> -> vector<4x16x32xf32>
    "tpu.trace_stop"() : () -> ()
    %199 = arith.maximumf %182, %198 : vector<4x16x32xf32>
    %200 = arith.addf %199, %82 : vector<4x16x32xf32>
    %201 = vector.extract_strided_slice %200 {offsets = [0, 0, 0], sizes = [4, 16, 8], strides = [1, 1, 1]} : vector<4x16x32xf32> to vector<4x16x8xf32>
    %cst_50 = arith.constant dense<0xFF800000> : vector<4x16xf32>
    %202 = vector.multi_reduction <maximumf>, %201, %cst_50 [2] : vector<4x16x8xf32> to vector<4x16xf32>
    %203 = vector.extract_strided_slice %200 {offsets = [0, 0, 8], sizes = [4, 16, 8], strides = [1, 1, 1]} : vector<4x16x32xf32> to vector<4x16x8xf32>
    %cst_51 = arith.constant dense<0xFF800000> : vector<4x16xf32>
    %204 = vector.multi_reduction <maximumf>, %203, %cst_51 [2] : vector<4x16x8xf32> to vector<4x16xf32>
    %205 = vector.extract_strided_slice %200 {offsets = [0, 0, 16], sizes = [4, 16, 8], strides = [1, 1, 1]} : vector<4x16x32xf32> to vector<4x16x8xf32>
    %cst_52 = arith.constant dense<0xFF800000> : vector<4x16xf32>
    %206 = vector.multi_reduction <maximumf>, %205, %cst_52 [2] : vector<4x16x8xf32> to vector<4x16xf32>
    %207 = vector.extract_strided_slice %200 {offsets = [0, 0, 24], sizes = [4, 16, 8], strides = [1, 1, 1]} : vector<4x16x32xf32> to vector<4x16x8xf32>
    %cst_53 = arith.constant dense<0xFF800000> : vector<4x16xf32>
    %208 = vector.multi_reduction <maximumf>, %207, %cst_53 [2] : vector<4x16x8xf32> to vector<4x16xf32>
    %c6_i32 = arith.constant 6 : i32
    %209 = vector.broadcast %c6_i32 : i32 to vector<4x16x16xi32>
    %210 = arith.cmpi eq, %42, %209 : vector<4x16x16xi32>
    %211 = arith.select %210, %54, %57 : vector<4x16x16xi1>, vector<4x16x16xf32>
    %cst_54 = arith.constant dense<0x7F800000> : vector<4x16xf32>
    %212 = vector.multi_reduction <minimumf>, %211, %cst_54 [2] : vector<4x16x16xf32> to vector<4x16xf32>
    %213 = vector.shape_cast %212 : vector<4x16xf32> to vector<4x16x1xf32>
    %214 = vector.broadcast %213 : vector<4x16x1xf32> to vector<4x16x16xf32>
    %215 = arith.cmpf ole, %211, %214 : vector<4x16x16xf32>
    %c16_i32_55 = arith.constant 16 : i32
    %216 = vector.broadcast %c16_i32_55 : i32 to vector<4x16x16xi32>
    %217 = arith.select %215, %43, %216 : vector<4x16x16xi1>, vector<4x16x16xi32>
    %cst_56 = arith.constant dense<2147483647> : vector<4x16xi32>
    %218 = vector.multi_reduction <minsi>, %217, %cst_56 [2] : vector<4x16x16xi32> to vector<4x16xi32>
    %219 = vector.shape_cast %218 : vector<4x16xi32> to vector<4x16x1xi32>
    %220 = vector.broadcast %219 : vector<4x16x1xi32> to vector<4x16x16xi32>
    %221 = arith.cmpi eq, %43, %220 : vector<4x16x16xi32>
    %222 = arith.extui %221 : vector<4x16x16xi1> to vector<4x16x16xi32>
    %223 = arith.sitofp %222 : vector<4x16x16xi32> to vector<4x16x16xf32>
    "tpu.trace_start"() <{level = 10 : i32, message = "gnm,gmc->gnc"}> : () -> ()
    %cst_57 = arith.constant dense<0.000000e+00> : vector<4x16x32xf32>
    %224 = tpu.matmul %223, %79, %cst_57 {dimension_numbers = #tpu.dot_dimension_numbers<[2], [1], [1], [2], [0, 0, 0, 1, 1, 2], [0], [0]>} : vector<4x16x16xf32>, vector<4x16x32xf32>, vector<4x16x32xf32> -> vector<4x16x32xf32>
    %c7_i32 = arith.constant 7 : i32
    "tpu.trace_stop"() : () -> ()
    %225 = vector.broadcast %c7_i32 : i32 to vector<4x16x16xi32>
    %226 = arith.cmpi eq, %42, %225 : vector<4x16x16xi32>
    %227 = arith.select %226, %54, %57 : vector<4x16x16xi1>, vector<4x16x16xf32>
    %cst_58 = arith.constant dense<0x7F800000> : vector<4x16xf32>
    %228 = vector.multi_reduction <minimumf>, %227, %cst_58 [2] : vector<4x16x16xf32> to vector<4x16xf32>
    %229 = vector.shape_cast %228 : vector<4x16xf32> to vector<4x16x1xf32>
    %230 = vector.broadcast %229 : vector<4x16x1xf32> to vector<4x16x16xf32>
    %231 = arith.cmpf ole, %227, %230 : vector<4x16x16xf32>
    %c16_i32_59 = arith.constant 16 : i32
    %232 = vector.broadcast %c16_i32_59 : i32 to vector<4x16x16xi32>
    %233 = arith.select %231, %43, %232 : vector<4x16x16xi1>, vector<4x16x16xi32>
    %cst_60 = arith.constant dense<2147483647> : vector<4x16xi32>
    %234 = vector.multi_reduction <minsi>, %233, %cst_60 [2] : vector<4x16x16xi32> to vector<4x16xi32>
    %235 = vector.shape_cast %234 : vector<4x16xi32> to vector<4x16x1xi32>
    %236 = vector.broadcast %235 : vector<4x16x1xi32> to vector<4x16x16xi32>
    %237 = arith.cmpi eq, %43, %236 : vector<4x16x16xi32>
    %238 = arith.extui %237 : vector<4x16x16xi1> to vector<4x16x16xi32>
    %239 = arith.sitofp %238 : vector<4x16x16xi32> to vector<4x16x16xf32>
    "tpu.trace_start"() <{level = 10 : i32, message = "gnm,gmc->gnc"}> : () -> ()
    %cst_61 = arith.constant dense<0.000000e+00> : vector<4x16x32xf32>
    %240 = tpu.matmul %239, %79, %cst_61 {dimension_numbers = #tpu.dot_dimension_numbers<[2], [1], [1], [2], [0, 0, 0, 1, 1, 2], [0], [0]>} : vector<4x16x16xf32>, vector<4x16x32xf32>, vector<4x16x32xf32> -> vector<4x16x32xf32>
    "tpu.trace_stop"() : () -> ()
    %241 = arith.maximumf %224, %240 : vector<4x16x32xf32>
    %242 = arith.addf %241, %82 : vector<4x16x32xf32>
    %243 = vector.extract_strided_slice %242 {offsets = [0, 0, 0], sizes = [4, 16, 8], strides = [1, 1, 1]} : vector<4x16x32xf32> to vector<4x16x8xf32>
    %cst_62 = arith.constant dense<0xFF800000> : vector<4x16xf32>
    %244 = vector.multi_reduction <maximumf>, %243, %cst_62 [2] : vector<4x16x8xf32> to vector<4x16xf32>
    %245 = vector.extract_strided_slice %242 {offsets = [0, 0, 8], sizes = [4, 16, 8], strides = [1, 1, 1]} : vector<4x16x32xf32> to vector<4x16x8xf32>
    %cst_63 = arith.constant dense<0xFF800000> : vector<4x16xf32>
    %246 = vector.multi_reduction <maximumf>, %245, %cst_63 [2] : vector<4x16x8xf32> to vector<4x16xf32>
    %247 = vector.extract_strided_slice %242 {offsets = [0, 0, 16], sizes = [4, 16, 8], strides = [1, 1, 1]} : vector<4x16x32xf32> to vector<4x16x8xf32>
    %cst_64 = arith.constant dense<0xFF800000> : vector<4x16xf32>
    %248 = vector.multi_reduction <maximumf>, %247, %cst_64 [2] : vector<4x16x8xf32> to vector<4x16xf32>
    %249 = vector.extract_strided_slice %242 {offsets = [0, 0, 24], sizes = [4, 16, 8], strides = [1, 1, 1]} : vector<4x16x32xf32> to vector<4x16x8xf32>
    %cst_65 = arith.constant dense<0xFF800000> : vector<4x16xf32>
    %250 = vector.multi_reduction <maximumf>, %249, %cst_65 [2] : vector<4x16x8xf32> to vector<4x16xf32>
    %251 = arith.maximumf %118, %120 : vector<4x16xf32>
    %252 = arith.maximumf %160, %162 : vector<4x16xf32>
    %253 = arith.maximumf %251, %252 : vector<4x16xf32>
    %254 = arith.maximumf %122, %124 : vector<4x16xf32>
    %255 = arith.maximumf %164, %166 : vector<4x16xf32>
    %256 = arith.maximumf %254, %255 : vector<4x16xf32>
    %257 = arith.maximumf %202, %204 : vector<4x16xf32>
    %258 = arith.maximumf %244, %246 : vector<4x16xf32>
    %259 = arith.maximumf %257, %258 : vector<4x16xf32>
    %260 = arith.maximumf %206, %208 : vector<4x16xf32>
    %261 = arith.maximumf %248, %250 : vector<4x16xf32>
    %262 = arith.maximumf %260, %261 : vector<4x16xf32>
    %263 = arith.maximumf %253, %256 : vector<4x16xf32>
    %264 = arith.maximumf %259, %262 : vector<4x16xf32>
    %265 = arith.maximumf %263, %264 : vector<4x16xf32>
    %266 = vector.shape_cast %118 : vector<4x16xf32> to vector<4x1x16xf32>
    %267 = vector.shape_cast %120 : vector<4x16xf32> to vector<4x1x16xf32>
    %268 = vector.shape_cast %122 : vector<4x16xf32> to vector<4x1x16xf32>
    %269 = vector.shape_cast %124 : vector<4x16xf32> to vector<4x1x16xf32>
    %270 = vector.shape_cast %160 : vector<4x16xf32> to vector<4x1x16xf32>
    %271 = vector.shape_cast %162 : vector<4x16xf32> to vector<4x1x16xf32>
    %272 = vector.shape_cast %164 : vector<4x16xf32> to vector<4x1x16xf32>
    %273 = vector.shape_cast %166 : vector<4x16xf32> to vector<4x1x16xf32>
    %274 = vector.shape_cast %202 : vector<4x16xf32> to vector<4x1x16xf32>
    %275 = vector.shape_cast %204 : vector<4x16xf32> to vector<4x1x16xf32>
    %276 = vector.shape_cast %206 : vector<4x16xf32> to vector<4x1x16xf32>
    %277 = vector.shape_cast %208 : vector<4x16xf32> to vector<4x1x16xf32>
    %278 = vector.shape_cast %244 : vector<4x16xf32> to vector<4x1x16xf32>
    %279 = vector.shape_cast %246 : vector<4x16xf32> to vector<4x1x16xf32>
    %280 = vector.shape_cast %248 : vector<4x16xf32> to vector<4x1x16xf32>
    %281 = vector.shape_cast %250 : vector<4x16xf32> to vector<4x1x16xf32>
    %282 = vector.shape_cast %253 : vector<4x16xf32> to vector<4x1x16xf32>
    %283 = vector.shape_cast %256 : vector<4x16xf32> to vector<4x1x16xf32>
    %284 = vector.shape_cast %259 : vector<4x16xf32> to vector<4x1x16xf32>
    %285 = vector.shape_cast %262 : vector<4x16xf32> to vector<4x1x16xf32>
    %286 = vector.shape_cast %265 : vector<4x16xf32> to vector<4x1x16xf32>
    %287 = tpu.concatenate %266, %267, %268, %269, %270, %271, %272, %273, %274, %275, %276, %277, %278, %279, %280, %281 in 1 : vector<4x1x16xf32>, vector<4x1x16xf32>, vector<4x1x16xf32>, vector<4x1x16xf32>, vector<4x1x16xf32>, vector<4x1x16xf32>, vector<4x1x16xf32>, vector<4x1x16xf32>, vector<4x1x16xf32>, vector<4x1x16xf32>, vector<4x1x16xf32>, vector<4x1x16xf32>, vector<4x1x16xf32>, vector<4x1x16xf32>, vector<4x1x16xf32>, vector<4x1x16xf32> -> vector<4x16x16xf32>
    %288 = tpu.concatenate %282, %283, %284, %285, %286 in 1 : vector<4x1x16xf32>, vector<4x1x16xf32>, vector<4x1x16xf32>, vector<4x1x16xf32>, vector<4x1x16xf32> -> vector<4x5x16xf32>
    %289 = tpu.concatenate %287, %288 in 1 : vector<4x16x16xf32>, vector<4x5x16xf32> -> vector<4x21x16xf32>
    %c0_66 = arith.constant 0 : index
    %c0_67 = arith.constant 0 : index
    %c0_68 = arith.constant 0 : index
    %290 = vector.load %arg5[%c0_66, %c0_67, %c0_68] : memref<4x21x16xf32, #tpu.memory_space<vmem>>, vector<4x21x16xf32>
    tpu.vector_store %arg5[%c0_66, %c0_67, %c0_68], %289 {strides = array<i32>} : memref<4x21x16xf32, #tpu.memory_space<vmem>>, vector<4x21x16xf32>,
    return
  }
  func.func @transform_0(%arg0: i32) -> (i32, i32, i32) {
    %c0_i32 = arith.constant 0 : i32
    %c0_i32_0 = arith.constant 0 : i32
    %c0_i32_1 = arith.constant 0 : i32
    return %arg0, %c0_i32, %c0_i32_0 : i32, i32, i32
  }
  func.func @transform_1(%arg0: i32) -> (i32, i32, i32) {
    %c0_i32 = arith.constant 0 : i32
    %c0_i32_0 = arith.constant 0 : i32
    %c0_i32_1 = arith.constant 0 : i32
    return %arg0, %c0_i32, %c0_i32_0 : i32, i32, i32
  }
  func.func @transform_2(%arg0: i32) -> (i32, i32) {
    %c0_i32 = arith.constant 0 : i32
    %c0_i32_0 = arith.constant 0 : i32
    %c0_i32_1 = arith.constant 0 : i32
    return %c0_i32, %c0_i32_0 : i32, i32
  }
  func.func @transform_3(%arg0: i32) -> (i32, i32) {
    %c0_i32 = arith.constant 0 : i32
    %c0_i32_0 = arith.constant 0 : i32
    %c0_i32_1 = arith.constant 0 : i32
    return %c0_i32, %c0_i32_0 : i32, i32
  }
  func.func @transform_4(%arg0: i32) -> (i32, i32, i32) {
    %c0_i32 = arith.constant 0 : i32
    %c0_i32_0 = arith.constant 0 : i32
    %c0_i32_1 = arith.constant 0 : i32
    return %arg0, %c0_i32, %c0_i32_0 : i32, i32, i32
  }
}

</mosaic_0001>

<bundles_post_ra>
// kernel: tpu_custom_call.1
= control target key start
LH: loop header
LB: loop body
LE: loop exit
PB: predicated region body
PF: predicated region fallthrough
CT: control target
= control target key end

     0   :  { %s7275_s15 = smov 0   ;;  %s10642_s0 = inlined_call_operand.vmem [shape: f32[8,3,16], index: 0, kind: input, shape index: {}]   ;;  %s10643_s1 = inlined_call_operand.vmem [shape: f32[8,16,3], index: 1, kind: input, shape index: {}]   ;;  %s10644_s2 = inlined_call_operand.vmem [shape: f32[3,32], index: 2, kind: input, shape index: {}]   ;;  %s10645_s3 = inlined_call_operand.vmem [shape: f32[1,32], index: 3, kind: input, shape index: {}]   ;;  %s10646_s4 = inlined_call_operand.vmem [shape: f32[8,21,16], index: 4, kind: output, shape index: {}]  }
   0x1 LB: > { %s6673_s16 = sadd.s32 4294967295, %s7243_s15   ;;  %p6677_p0 = scmp.ge.s32.totalorder %s7243_s15, 1  ;;  %s7243_s15 = sphi %s7275_s15, %s14_s15  }
   0x2   : > { %p175_p1 = scmp.lt.s32.totalorder %s7243_s15, 3 }
   0x4   : > { %p176_p2 = pnand %p6677_p0, %p175_p1 }
   0x6   : > { %179 = sbr.rel (%p176_p2) target bundleno = 1275 (0x4fb), region = 36 }
   0xb   : > { %s6678_s17 = sshll.u32 %s6673_s16, 2  ;;  %v240_v0 = vlaneseq  ;;  %v7245_v1 = vmov 0   ;;  %v7246_v30 = vmov 1   ;;  %v7247_v31 = vmov 2  }
   0xc   : > { %p209_p3 = scmp.lt.s32.totalorder %s6678_s17, 7  ;;  %7232 = vset.pattern.permute.xlu1 %v7245_v1  ;;  %7231 = vset.pattern.permute.xlu0 %v7245_v1  ;;  %v7248_v63 = vmov 1e+10   ;;  %vm753_vm14 = vcmask 130048  }
   0xd   : > { %v7284_v2 = vshrl.u32 %v240_v0, 7  ;;  %v7370_v40 = vand.u32 127, %v240_v0 }
   0xe   : > { %s11140_s17 = smov (!%p209_p3, %s6678_s17), 7 }
   0xf   : > { %10803 = vst [vmem:[#allocation2_spill] sm:$0xff] %v7284_v2  ;;  %v7289_v3 = vsub.s32 0, %v7284_v2  ;;  %s6679_s18 = sshll.u32 %s11140_s17, 2  ;;  %v7314_v12 = vsub.s32 1, %v7284_v2  ;;  %v7337_v17 = vsub.s32 2, %v7284_v2  ;;  %s6816_s22 = sshll.u32 %s11140_s17, 4  ;;  %vm7382_vm1 = vcmp.eq.s32.totalorder %v7370_v40, %v7284_v2 }
  0x10   : > { %s212_s21 = scalar_lea.vmem %s10642_s0, %s6679_s18  ;;  %s219_s25 = scalar_lea.vmem %s10643_s1, %s6816_s22  ;;  %v520_v43 = vadd.s32 8, %v7284_v2 }
  0x11   : > { %v229_v4 = vld [vmem:[%s212_s21 + $0x4] sm:$0x7]  ;;  %v228_v5 = vld [vmem:[%s212_s21] sm:$0x7]  ;;  %v230_v8 = vld [vmem:[%s212_s21 + $0x8] sm:$0x7] }
  0x12   : > { %v7296_v6 = vrot.slane %v229_v4, %v7289_v3  ;;  %v7299_v7 = vrot.slane %v228_v5, %v7289_v3  ;;  %v7306_v9 = vrot.slane %v230_v8, %v7289_v3  ;;  %v231_v10 = vld [vmem:[%s212_s21 + $0xc] sm:$0x7]  ;;  %v7319_v13 = vrot.slane %v228_v5, %v7314_v12  ;;  %v232_v23 = vld [vmem:[%s219_s25] sm:$0xff]  ;;  %v234_v24 = vld [vmem:[%s219_s25 + $0x10] sm:$0xff]  ;;  %s7169_s30 = smul.u32 24, %s11140_s17 }
  0x13   : > { %v7311_v11 = vrot.slane %v231_v10, %v7289_v3  ;;  %v7324_v14 = vrot.slane %v229_v4, %v7314_v12  ;;  %v7329_v15 = vrot.slane %v230_v8, %v7314_v12  ;;  %v7334_v16 = vrot.slane %v231_v10, %v7314_v12  ;;  %v233_v22 = vld [vmem:[%s219_s25 + $0x8] sm:$0xff]  ;;  %v235_v25 = vld [vmem:[%s219_s25 + $0x18] sm:$0xff]  ;;  %v236_v26 = vld [vmem:[%s219_s25 + $0x20] sm:$0xff] }
  0x14   : > { %256 = vbcast.lane.b32.xlu1 %v7296_v6, 256  ;;  %245 = vbcast.lane.b32.xlu0 %v7299_v7, 256  ;;  %v7342_v18 = vrot.slane %v228_v5, %v7337_v17  ;;  %v7347_v19 = vrot.slane %v229_v4, %v7337_v17  ;;  %v7352_v20 = vrot.slane %v230_v8, %v7337_v17  ;;  %v237_v27 = vld [vmem:[%s219_s25 + $0x28] sm:$0xff]  ;;  %v238_v28 = vld [vmem:[%s219_s25 + $0x30] sm:$0xff]  ;;  %v239_v29 = vld [vmem:[%s219_s25 + $0x38] sm:$0xff]  ;;  %s10029_s7 = scalar_lea.vmem %s10646_s4, %s7169_s30 }
  0x15   : > { %v7358_v21 = vrot.slane %v231_v10, %v7337_v17  ;;  %vm7376_vm0 = vcmp.eq.s32.totalorder %v7370_v40, %v520_v43 }
  0x16   : > { %v7390_v0 = vsel %vm7376_vm0, 0.09, %v7248_v63 }
  0x18   : > { %260 = vbcast.lane.b32.xlu1 %v7296_v6, 264  ;;  %249 = vbcast.lane.b32.xlu0 %v7299_v7, 264 }
  0x1c   : > { %271 = vbcast.lane.b32.xlu1 %v7306_v9, 264  ;;  %267 = vbcast.lane.b32.xlu0 %v7306_v9, 256 }
  0x20   : > { %282 = vbcast.lane.b32.xlu1 %v7311_v11, 264  ;;  %278 = vbcast.lane.b32.xlu0 %v7311_v11, 256 }
  0x24   : > { %301 = vbcast.lane.b32.xlu1 %v7319_v13, 264  ;;  %297 = vbcast.lane.b32.xlu0 %v7319_v13, 256 }
  0x28   : > { %312 = vbcast.lane.b32.xlu1 %v7324_v14, 264  ;;  %308 = vbcast.lane.b32.xlu0 %v7324_v14, 256 }
  0x2c   : > { %323 = vbcast.lane.b32.xlu1 %v7329_v15, 264  ;;  %319 = vbcast.lane.b32.xlu0 %v7329_v15, 256 }
  0x30   : > { %334 = vbcast.lane.b32.xlu1 %v7334_v16, 264  ;;  %330 = vbcast.lane.b32.xlu0 %v7334_v16, 256 }
  0x34   : > { %353 = vbcast.lane.b32.xlu1 %v7342_v18, 264  ;;  %349 = vbcast.lane.b32.xlu0 %v7342_v18, 256 }
  0x38   : > { %364 = vbcast.lane.b32.xlu1 %v7347_v19, 264  ;;  %360 = vbcast.lane.b32.xlu0 %v7347_v19, 256 }
  0x3c   : > { %375 = vbcast.lane.b32.xlu1 %v7352_v20, 264  ;;  %371 = vbcast.lane.b32.xlu0 %v7352_v20, 256 }
  0x40   : > { %386 = vbcast.lane.b32.xlu1 %v7358_v21, 264  ;;  %382 = vbcast.lane.b32.xlu0 %v7358_v21, 256 }
  0x44   : > { %574 = vperm.xlu1 %7232, %v233_v22   ;;  %569 = vperm.xlu0 %7231, %v232_v23  }
  0x48   : > { %579 = vperm.xlu1 %7232, %v234_v24   ;;  %584 = vperm.xlu0 %7231, %v235_v25  }
  0x4c   : > { %589 = vperm.xlu1 %7232, %v236_v26   ;;  %594 = vperm.xlu0 %7231, %v237_v27  }
  0x50   : > { %599 = vperm.xlu1 %7232, %v238_v28   ;;  %604 = vperm.xlu0 %7231, %v239_v29  }
  0x54   : > { %7233 = vset.pattern.permute.xlu1 %v7246_v30  ;;  %7234 = vset.pattern.permute.xlu0 %v7246_v30 }
  0x55   : > { %620 = vperm.xlu1 %7233, %v232_v23   ;;  %624 = vperm.xlu0 %7234, %v233_v22  }
  0x59   : > { %628 = vperm.xlu1 %7233, %v234_v24   ;;  %636 = vperm.xlu0 %7234, %v236_v26  }
  0x5d   : > { %632 = vperm.xlu1 %7233, %v235_v25   ;;  %644 = vperm.xlu0 %7234, %v238_v28  }
  0x61   : > { %640 = vperm.xlu1 %7233, %v237_v27   ;;  %7235 = vset.pattern.permute.xlu0 %v7247_v31 }
  0x62   : > { %672 = vperm.xlu0 %7235, %v232_v23  }
  0x65   : > { %648 = vperm.xlu1 %7233, %v239_v29  }
  0x66   : > { %684 = vperm.xlu0 %7235, %v235_v25  }
  0x69   : > { %7236 = vset.pattern.permute.xlu1 %v7247_v31 }
  0x6a   : > { %676 = vperm.xlu1 %7236, %v233_v22   ;;  %692 = vperm.xlu0 %7235, %v237_v27  }
  0x6e   : > { %680 = vperm.xlu1 %7236, %v234_v24   ;;  %700 = vperm.xlu0 %7235, %v239_v29  }
  0x72   : > { %688 = vperm.xlu1 %7236, %v236_v26  }
  0x76   : > { %696 = vperm.xlu1 %7236, %v238_v28  }
  0x86   : > { %v257_v32 = vpop.permute.xlu1 %256  ;;  %v246_v33 = vpop.permute.xlu0 %245 }
  0x87   : > { %v286_v34 = vsub.f32 %v7296_v6, %v257_v32  ;;  %v284_v35 = vsub.f32 %v7299_v7, %v246_v33 }
  0x89   : > { %v438_v41 = vadd.f32 1.0, %v286_v34  ;;  %v436_v42 = vadd.f32 1.0, %v284_v35  ;;  %v7392_v1 = vmul.f32 %v286_v34, %v286_v34 }
  0x8a   : > { %v261_v36 = vpop.permute.xlu1 %260  ;;  %v250_v37 = vpop.permute.xlu0 %249 }
  0x8b   : > { %v287_v38 = vsub.f32 %v7296_v6, %v261_v36  ;;  %v285_v39 = vsub.f32 %v7299_v7, %v250_v37  ;;  %v7174_v49 = vtrunc.f32 %v438_v41  ;;  %v7170_v50 = vtrunc.f32 %v436_v42 }
  0x8c   : > { %v7400_v6 = vsel %vm7382_vm1, 0.09, %v7248_v63  ;;  %v396_v7 = vmul.f32 %v284_v35, %v284_v35 }
  0x8d   : > { %v439_v44 = vadd.f32 1.0, %v287_v38  ;;  %v437_v45 = vadd.f32 1.0, %v285_v39  ;;  %v7394_v4 = vcvt.f32.s32 %v7174_v49  ;;  %v7396_v5 = vcvt.f32.s32 %v7170_v50 }
  0x8e   : > { %v272_v46 = vpop.permute.xlu1 %271  ;;  %v268_v47 = vpop.permute.xlu0 %267  ;;  %v399_v8 = vmul.f32 %v287_v38, %v287_v38  ;;  %v397_v22 = vmul.f32 %v285_v39, %v285_v39 }
  0x8f   : > { %v289_v48 = vsub.f32 %v7306_v9, %v272_v46  ;;  %v288_v51 = vsub.f32 %v7306_v9, %v268_v47  ;;  %v7176_v55 = vtrunc.f32 %v439_v44  ;;  %v7172_v56 = vtrunc.f32 %v437_v45 }
  0x90   : > { %v454_v31 = vmul.u32 4, %v7394_v4  ;;  %v452_v32 = vmul.u32 4, %v7396_v5 }
  0x91   : > { %v441_v53 = vadd.f32 1.0, %v289_v48  ;;  %v440_v57 = vadd.f32 1.0, %v288_v51  ;;  %v7404_v23 = vcvt.f32.s32 %v7172_v56  ;;  %v7412_v33 = vmul.f32 %v289_v48, %v289_v48 }
  0x92   : > { %v283_v58 = vpop.permute.xlu1 %282  ;;  %v279_v59 = vpop.permute.xlu0 %278  ;;  %v7414_v35 = vmul.f32 %v288_v51, %v288_v51 }
  0x93   : > { %v7180_v60 = vtrunc.f32 %v441_v53  ;;  %v291_v61 = vsub.f32 %v7311_v11, %v283_v58  ;;  %v290_v62 = vsub.f32 %v7311_v11, %v279_v59  ;;  %v7178_v9 = vtrunc.f32 %v440_v57 }
  0x94   : > { %v7402_v11 = vcvt.f32.s32 %v7176_v55  ;;  %v453_v41 = vmul.u32 4, %v7404_v23 }
  0x95   : > { %v443_v10 = vadd.f32 1.0, %v291_v61  ;;  %v442_v24 = vadd.f32 1.0, %v290_v62  ;;  %v7406_v27 = vcvt.f32.s32 %v7180_v60  ;;  %v7416_v36 = vcvt.f32.s32 %v7178_v9 }
  0x96   : > { %v302_v25 = vpop.permute.xlu1 %301  ;;  %v298_v26 = vpop.permute.xlu0 %297  ;;  %v455_v39 = vmul.u32 4, %v7402_v11  ;;  %v7422_v42 = vmul.f32 %v291_v61, %v291_v61  ;;  %v402_v57 = vmul.f32 %v290_v62, %v290_v62 }
  0x97   : > { %v7184_v28 = vtrunc.f32 %v443_v10  ;;  %v337_v29 = vsub.f32 %v7319_v13, %v302_v25  ;;  %v336_v30 = vsub.f32 %v7319_v13, %v298_v26  ;;  %v7182_v34 = vtrunc.f32 %v442_v24 }
  0x98   : > { %v457_v45 = vmul.u32 4, %v7406_v27  ;;  %v456_v55 = vmul.u32 4, %v7416_v36 }
  0x99   : > { %v7418_v37 = vcvt.f32.s32 %v7184_v28  ;;  %v461_v38 = vadd.f32 1.0, %v337_v29  ;;  %v460_v13 = vadd.f32 1.0, %v336_v30  ;;  %v405_v46 = vmul.f32 %v337_v29, %v337_v29 }
  0x9a   : > { %v313_v43 = vpop.permute.xlu1 %312  ;;  %v309_v44 = vpop.permute.xlu0 %308  ;;  %v404_v48 = vmul.f32 %v336_v30, %v336_v30  ;;  %v7425_v49 = vcvt.f32.s32 %v7182_v34 }
  0x9b   : > { %v7188_v47 = vtrunc.f32 %v461_v38  ;;  %v7186_v50 = vtrunc.f32 %v460_v13  ;;  %v339_v51 = vsub.f32 %v7324_v14, %v313_v43  ;;  %v338_v53 = vsub.f32 %v7324_v14, %v309_v44 }
  0x9c   : > { %v459_v56 = vmul.u32 4, %v7418_v37  ;;  %v413_v10 = vadd.f32 %v405_v46, %v397_v22  ;;  %v458_v14 = vmul.u32 4, %v7425_v49  ;;  %v412_v28 = vadd.f32 %v404_v48, %v396_v7 }
  0x9d   : > { %v7189_v58 = vcvt.f32.s32 %v7188_v47  ;;  %v7187_v59 = vcvt.f32.s32 %v7186_v50  ;;  %v407_v60 = vmul.f32 %v339_v51, %v339_v51  ;;  %v463_v61 = vadd.f32 1.0, %v339_v51 }
  0x9e   : > { %v406_v63 = vmul.f32 %v338_v53, %v338_v53  ;;  %v324_v5 = vpop.permute.xlu1 %323  ;;  %v320_v9 = vpop.permute.xlu0 %319  ;;  %v462_v23 = vadd.f32 1.0, %v338_v53 }
  0x9f   : > { %v341_v24 = vsub.f32 %v7329_v15, %v324_v5  ;;  %v340_v25 = vsub.f32 %v7329_v15, %v320_v9  ;;  %v477_v26 = vmul.u32 2, %v7189_v58  ;;  %v7192_v29 = vtrunc.f32 %v463_v61 }
  0xa0   : > { %v476_v30 = vmul.u32 2, %v7187_v59  ;;  %v7434_v62 = vadd.f32 %v407_v60, %v399_v8  ;;  %v7190_v34 = vtrunc.f32 %v462_v23  ;;  %v7437_v43 = vadd.f32 %v406_v63, %v7392_v1 }
  0xa1   : > { %v465_v38 = vadd.f32 1.0, %v341_v24  ;;  %v7193_v13 = vcvt.f32.s32 %v7192_v29  ;;  %v409_v22 = vmul.f32 %v341_v24, %v341_v24  ;;  %v464_v44 = vadd.f32 1.0, %v340_v25 }
  0xa2   : > { %v335_v46 = vpop.permute.xlu1 %334  ;;  %v331_v47 = vpop.permute.xlu0 %330  ;;  %v7191_v50 = vcvt.f32.s32 %v7190_v34  ;;  %v408_v51 = vmul.f32 %v340_v25, %v340_v25  ;;  %v485_v7 = vadd.s32 %v477_v26, %v453_v41  ;;  %v484_v1 = vadd.s32 %v476_v30, %v452_v32 }
  0xa3   : > { %v7196_v15 = vtrunc.f32 %v465_v38  ;;  %v343_v53 = vsub.f32 %v7334_v16, %v335_v46  ;;  %v479_v48 = vmul.u32 2, %v7193_v13  ;;  %v7194_v58 = vtrunc.f32 %v464_v44 }
  0xa4   : > { %v342_v8 = vsub.f32 %v7334_v16, %v331_v47  ;;  %v478_v59 = vmul.u32 2, %v7191_v50  ;;  %v7442_v34 = vadd.f32 %v409_v22, %v7412_v33  ;;  %v7445_v41 = vadd.f32 %v408_v51, %v7414_v35 }
  0xa5   : > { %v7197_v60 = vcvt.f32.s32 %v7196_v15  ;;  %v411_v61 = vmul.f32 %v343_v53, %v343_v53  ;;  %v467_v5 = vadd.f32 1.0, %v343_v53  ;;  %v7195_v63 = vcvt.f32.s32 %v7194_v58 }
  0xa6   : > { %v410_v9 = vmul.f32 %v342_v8, %v342_v8  ;;  %v466_v23 = vadd.f32 1.0, %v342_v8  ;;  %v354_v24 = vpop.permute.xlu1 %353  ;;  %v350_v29 = vpop.permute.xlu0 %349  ;;  %v7449_v16 = vadd.s32 %v479_v48, %v455_v39  ;;  %v7453_v32 = vadd.s32 %v478_v59, %v454_v31 }
  0xa7   : > { %v481_v25 = vmul.u32 2, %v7197_v60  ;;  %v7200_v26 = vtrunc.f32 %v467_v5  ;;  %v389_v38 = vsub.f32 %v7342_v18, %v354_v24  ;;  %v480_v13 = vmul.u32 2, %v7195_v63 }
  0xa8   : > { %v7198_v30 = vtrunc.f32 %v466_v23  ;;  %v7457_v33 = vadd.f32 %v411_v61, %v7422_v42  ;;  %v388_v35 = vsub.f32 %v7342_v18, %v350_v29  ;;  %v7460_v44 = vadd.f32 %v410_v9, %v402_v57 }
  0xa9   : > { %v7201_v22 = vcvt.f32.s32 %v7200_v26  ;;  %v421_v11 = vmul.f32 %v389_v38, %v389_v38  ;;  %v493_v39 = vadd.f32 1.0, %v389_v38  ;;  %v7464_v4 = vadd.s32 %v481_v25, %v457_v45 }
  0xaa   : > { %v7199_v46 = vcvt.f32.s32 %v7198_v30  ;;  %v365_v47 = vpop.permute.xlu1 %364  ;;  %v361_v50 = vpop.permute.xlu0 %360  ;;  %v420_v31 = vmul.f32 %v388_v35, %v388_v35  ;;  %v492_v15 = vadd.f32 1.0, %v388_v35  ;;  %v7470_v60 = vadd.s32 %v480_v13, %v456_v55 }
  0xab   : > { %v391_v51 = vsub.f32 %v7347_v19, %v365_v47  ;;  %v483_v42 = vmul.u32 2, %v7201_v22  ;;  %v429_v53 = vadd.f32 %v421_v11, %v413_v10  ;;  %v7204_v48 = vtrunc.f32 %v493_v39 }
  0xac   : > { %v390_v18 = vsub.f32 %v7347_v19, %v361_v50  ;;  %v482_v57 = vmul.u32 2, %v7199_v46  ;;  %v428_v58 = vadd.f32 %v420_v31, %v412_v28  ;;  %v7202_v8 = vtrunc.f32 %v492_v15 }
  0xad   : > { %v423_v59 = vmul.f32 %v391_v51, %v391_v51  ;;  %v7205_v27 = vcvt.f32.s32 %v7204_v48  ;;  %vm524_vm2 = vcmp.gt.f32.partialorder %v429_v53, 1e-10  ;;  %vm532_vm3 = vcmp.lt.f32.partialorder %v429_v53, 0.09 }
  0xae   : > { %v376_v45 = vpop.permute.xlu1 %375  ;;  %vm540_vm4 = vmand %vm524_vm2, %vm532_vm3  ;;  %v7203_v61 = vcvt.f32.s32 %v7202_v8  ;;  %vm523_vm5 = vcmp.gt.f32.partialorder %v428_v58, 1e-10  ;;  %vm531_vm6 = vcmp.lt.f32.partialorder %v428_v58, 0.09  ;;  %v7475_v19 = vadd.s32 %v483_v42, %v459_v56  ;;  %v372_v63 = vpop.permute.xlu0 %371 }
  0xaf   : > { %v431_v10 = vadd.f32 %v423_v59, %v7434_v62  ;;  %v548_v28 = vsel %vm540_vm4, %v429_v53, 1e+10  ;;  %vm7477_vm7 = vmand %vm523_vm5, %vm531_vm6  ;;  %v495_v36 = vadd.f32 1.0, %v391_v51  ;;  %v422_v55 = vmul.f32 %v390_v18, %v390_v18 }
  0xb0   : > { %v7483_v9 = vadd.s32 %v482_v57, %v458_v14  ;;  %v7485_v23 = vadd.s32 %v7205_v27, %v485_v7  ;;  %v7489_v62 = vsel %vm7376_vm0, 0.09, %v548_v28  ;;  %v7491_v37 = vadd.s32 %v7203_v61, %v484_v1 }
  0xb1   : > { %vm526_vm8 = vcmp.gt.f32.partialorder %v431_v10, 1e-10  ;;  %v7208_v56 = vtrunc.f32 %v495_v36  ;;  %vm534_vm9 = vcmp.lt.f32.partialorder %v431_v10, 0.09  ;;  %v430_v24 = vadd.f32 %v422_v55, %v7437_v43 }
  0xb2   : > { %v387_v29 = vpop.permute.xlu1 %386  ;;  %v547_v25 = vsel %vm7477_vm7, %v428_v58, 1e+10  ;;  %vm7496_vm10 = vmand %vm526_vm8, %vm534_vm9  ;;  %v494_v14 = vadd.f32 1.0, %v390_v18  ;;  %v393_v7 = vsub.f32 %v7352_v20, %v376_v45  ;;  %v392_v26 = vsub.f32 %v7352_v20, %v372_v63  ;;  %v383_v18 = vpop.permute.xlu0 %382 }
  0xb3   : > { %v550_v1 = vsel %vm7496_vm10, %v431_v10, 1e+10  ;;  %vm525_vm11 = vcmp.gt.f32.partialorder %v430_v24, 1e-10  ;;  %vm533_vm12 = vcmp.lt.f32.partialorder %v430_v24, 0.09  ;;  %v395_v43 = vsub.f32 %v7358_v21, %v387_v29 }
  0xb4   : > { %v7209_v30 = vcvt.f32.s32 %v7208_v56  ;;  %v7206_v38 = vtrunc.f32 %v494_v14  ;;  %vm7505_vm13 = vmand %vm525_vm11, %vm533_vm12  ;;  %v425_v22 = vmul.f32 %v393_v7, %v393_v7  ;;  %v497_v35 = vadd.f32 1.0, %v393_v7 }
  0xb5   : > { %v7511_v46 = vsel %vm7382_vm1, 0.09, %v547_v25  ;;  %v7515_v20 = vsel %vm7376_vm0, 0.09, %v550_v1  ;;  %v424_v11 = vmul.f32 %v392_v26, %v392_v26  ;;  %v496_v39 = vadd.f32 1.0, %v392_v26 }
  0xb6   : > { %v7207_v47 = vcvt.f32.s32 %v7206_v38  ;;  %v549_v50 = vsel %vm7505_vm13, %v430_v24, 1e+10  ;;  %v433_v31 = vadd.f32 %v425_v22, %v7442_v34  ;;  %v7212_v15 = vtrunc.f32 %v497_v35 }
  0xb7   : > { %v432_v51 = vadd.f32 %v424_v11, %v7445_v41  ;;  %v7210_v42 = vtrunc.f32 %v496_v39  ;;  %v427_v53 = vmul.f32 %v395_v43, %v395_v43  ;;  %v499_v48 = vadd.f32 1.0, %v395_v43 }
  0xb8   : > { %v7522_v57 = vadd.s32 %v7209_v30, %v7449_v16  ;;  %v7213_v58 = vcvt.f32.s32 %v7212_v15  ;;  %vm528_vm15 = vcmp.gt.f32.partialorder %v433_v31, 1e-10  ;;  %vm536_vm2 = vcmp.lt.f32.partialorder %v433_v31, 0.09 }
  0xb9   : > { %v7526_v8 = vsel %vm7382_vm1, 0.09, %v549_v50  ;;  %vm544_vm3 = vmand %vm528_vm15, %vm536_vm2  ;;  %vm527_vm4 = vcmp.gt.f32.partialorder %v432_v51, 1e-10  ;;  %vm535_vm5 = vcmp.lt.f32.partialorder %v432_v51, 0.09  ;;  %v435_v34 = vadd.f32 %v427_v53, %v7457_v33 }
  0xba   : > { %v552_v41 = vsel %vm544_vm3, %v433_v31, 1e+10  ;;  %v7211_v59 = vcvt.f32.s32 %v7210_v42  ;;  %vm7529_vm6 = vmand %vm527_vm4, %vm535_vm5  ;;  %v7216_v16 = vtrunc.f32 %v499_v48  ;;  %v394_v45 = vsub.f32 %v7358_v21, %v383_v18 }
  0xbb   : > { %v7535_v61 = vadd.s32 %v7207_v47, %v7453_v32  ;;  %v7538_v10 = vadd.s32 %v7213_v58, %v7464_v4  ;;  %v551_v28 = vsel %vm7529_vm6, %v432_v51, 1e+10  ;;  %vm530_vm7 = vcmp.gt.f32.partialorder %v435_v34, 1e-10  ;;  %v565_v51 = vld [vmem:[%s10644_s2] sm:$0x7] }
  0xbc   : > { %v7544_v33 = vsel %vm7376_vm0, 0.09, %v552_v41  ;;  %v7217_v5 = vcvt.f32.s32 %v7216_v16  ;;  %vm538_vm8 = vcmp.lt.f32.partialorder %v435_v34, 0.09  ;;  %v426_v36 = vmul.f32 %v394_v45, %v394_v45 }
  0xbd   : > { %v498_v55 = vadd.f32 1.0, %v394_v45  ;;  %vm738_vm9 = vcmp.eq.s32.totalorder %v7485_v23, 0  ;;  %vm737_vm10 = vcmp.eq.s32.totalorder %v7491_v37, 0  ;;  %vm740_vm11 = vcmp.eq.s32.totalorder %v7522_v57, 0  ;;  %vm7556_vm12 = vmand %vm530_vm7, %vm538_vm8 }
  0xbe   : > { %v7550_v21 = vadd.s32 %v7211_v59, %v7470_v60  ;;  %v7554_v32 = vsel %vm7382_vm1, 0.09, %v551_v28  ;;  %v434_v63 = vadd.f32 %v426_v36, %v7460_v44  ;;  %v7563_v56 = vsel %vm738_vm9, %v7489_v62, %v7390_v0 }
  0xbf   : > { %v575_v24 = vpop.permute.xlu1 %574  ;;  %v570_v29 = vpop.permute.xlu0 %569  ;;  %v7566_v25 = vadd.s32 %v7217_v5, %v7475_v19  ;;  %v7214_v60 = vtrunc.f32 %v498_v55  ;;  %v757_v49 = vsel %vm753_vm14, %v7563_v56, inf  ;;  %v7572_v14 = vsel %vm737_vm10, %v7511_v46, %v7400_v6 }
  0xc0   : > { %vm529_vm13 = vcmp.gt.f32.partialorder %v434_v63, 1e-10  ;;  %vm537_vm15 = vcmp.lt.f32.partialorder %v434_v63, 0.09  ;;  %758 = vmin.xlane.f32.xlu0 %v757_v49  ;;  %v754_v44 = vsel %vm753_vm14, %v7572_v14, inf  ;;  %v7580_v19 = vsel %vm740_vm11, %v7515_v20, %v7390_v0 }
  0xc1   : > { %v554_v7 = vsel %vm7556_vm12, %v435_v34, 1e+10  ;;  %v7215_v26 = vcvt.f32.s32 %v7214_v60  ;;  %vm545_vm2 = vmand %vm529_vm13, %vm537_vm15  ;;  %755 = vmin.xlane.f32.xlu1 %v754_v44  ;;  %vm739_vm3 = vcmp.eq.s32.totalorder %v7535_v61, 0  ;;  %vm742_vm4 = vcmp.eq.s32.totalorder %v7538_v10, 0 }
  0xc2   : > { %v553_v1 = vsel %vm545_vm2, %v434_v63, 1e+10  ;;  %v763_v43 = vsel %vm753_vm14, %v7580_v19, inf  ;;  %v7590_v30 = vsel %vm739_vm3, %v7526_v8, %v7400_v6  ;;  %vm741_vm5 = vcmp.eq.s32.totalorder %v7550_v21, 0 }
  0xc3   : > { %v580_v38 = vpop.permute.xlu1 %579  ;;  %v7593_v13 = vpop.permute.xlu0 %584  ;;  %v7596_v22 = vadd.s32 %v7215_v26, %v7483_v9  ;;  %v7600_v35 = vsel %vm7382_vm1, 0.09, %v553_v1  ;;  %v760_v11 = vsel %vm753_vm14, %v7590_v30, inf  ;;  %v7606_v39 = vsel %vm742_vm4, %v7544_v33, %v7390_v0 }
  0xc4   : > { %v7610_v47 = vsel %vm7376_vm0, 0.09, %v554_v7  ;;  %761 = vmin.xlane.f32.xlu0 %v760_v11  ;;  %v7614_v9 = vsel %vm741_vm5, %v7554_v32, %v7400_v6  ;;  %vm744_vm6 = vcmp.eq.s32.totalorder %v7566_v25, 0  ;;  %v769_v50 = vsel %vm753_vm14, %v7606_v39, inf }
  0xc5   : > { %764 = vmin.xlane.f32.xlu1 %v763_v43  ;;  %v766_v54 = vsel %vm753_vm14, %v7614_v9, inf  ;;  %vm743_vm1 = vcmp.eq.s32.totalorder %v7596_v22, 0  ;;  %v7633_v42 = vsel %vm744_vm6, %v7610_v47, %v7390_v0  ;;  %vm1263_vm0 = vcmp.eq.s32.totalorder %v7485_v23, 1 }
  0xc6   : > { %v7624_v52 = vsel %vm743_vm1, %v7600_v35, %v7400_v6  ;;  %vm1262_vm7 = vcmp.eq.s32.totalorder %v7491_v37, 1  ;;  %v610_v48 = vrot.slane %v565_v51, %v7289_v3  ;;  %v775_v18 = vsel %vm753_vm14, %v7633_v42, inf }
  0xc7   : > { %v590_v31 = vpop.permute.xlu1 %589  ;;  %v7626_v15 = vpop.permute.xlu0 %594  ;;  %v772_v53 = vsel %vm753_vm14, %v7624_v52, inf  ;;  %v7643_v41 = vrot.slane %v565_v51, %v7314_v12  ;;  %v7647_v59 = vsel %vm1263_vm0, %v7489_v62, %v7390_v0  ;;  %v7651_v27 = vsel %vm1262_vm7, %v7511_v46, %v7400_v6 }
  0xc8   : > { %767 = vmin.xlane.f32.xlu0 %v766_v54  ;;  %vm1265_vm8 = vcmp.eq.s32.totalorder %v7522_v57, 1  ;;  %vm1264_vm9 = vcmp.eq.s32.totalorder %v7535_v61, 1  ;;  %v612_v3 = vmul.f32 %v610_v48, %v575_v24  ;;  %v611_v16 = vmul.f32 %v610_v48, %v570_v29 }
  0xc9   : > { %770 = vmin.xlane.f32.xlu1 %v769_v50  ;;  %v1281_v12 = vsel %vm753_vm14, %v7647_v59, inf  ;;  %v1278_v45 = vsel %vm753_vm14, %v7651_v27, inf  ;;  %v7661_v28 = vsel %vm1265_vm8, %v7515_v20, %v7390_v0  ;;  %v7665_v55 = vsel %vm1264_vm9, %v7526_v8, %v7400_v6 }
  0xca   : > { %vm1267_vm10 = vcmp.eq.s32.totalorder %v7538_v10, 1  ;;  %vm1266_vm11 = vcmp.eq.s32.totalorder %v7550_v21, 1  ;;  %v613_v24 = vmul.f32 %v610_v48, %v580_v38  ;;  %v615_v29 = vmul.f32 %v610_v48, %v590_v31 }
  0xcb   : > { %v600_v58 = vpop.permute.xlu1 %599  ;;  %v605_v34 = vpop.permute.xlu0 %604  ;;  %v1287_v44 = vsel %vm753_vm14, %v7661_v28, inf  ;;  %v1284_v7 = vsel %vm753_vm14, %v7665_v55, inf  ;;  %v7679_v26 = vsel %vm1267_vm10, %v7544_v33, %v7390_v0  ;;  %v7683_v38 = vsel %vm1266_vm11, %v7554_v32, %v7400_v6 }
  0xcc   : > { %773 = vmin.xlane.f32.xlu0 %v772_v53  ;;  %10818 = vst [vmem:[#allocation3_spill] sm:$0xff] %v7679_v26  ;;  %10819 = vst [vmem:[#allocation4_spill] sm:$0xff] %v7683_v38  ;;  %vm1269_vm12 = vcmp.eq.s32.totalorder %v7566_v25, 1  ;;  %v7689_v50 = vrot.slane %v565_v51, %v7337_v17  ;;  %v614_v31 = vmul.f32 %v610_v48, %v7593_v13  ;;  %vm1268_vm13 = vcmp.eq.s32.totalorder %v7596_v22, 1 }
  0xcd   : > { %776 = vmin.xlane.f32.xlu1 %v775_v18  ;;  %v617_v53 = vmul.f32 %v610_v48, %v600_v58  ;;  %v1293_v18 = vsel %vm753_vm14, %v7679_v26, inf  ;;  %vm1903_vm15 = vcmp.eq.s32.totalorder %v7485_v23, 2  ;;  %v7704_v17 = vsel %vm1269_vm12, %v7610_v47, %v7390_v0 }
  0xce   : > { %vm1902_vm2 = vcmp.eq.s32.totalorder %v7491_v37, 2  ;;  %vm1905_vm3 = vcmp.eq.s32.totalorder %v7522_v57, 2  ;;  %v7710_v58 = vsel %vm1268_vm13, %v7600_v35, %v7400_v6  ;;  %vm1904_vm4 = vcmp.eq.s32.totalorder %v7535_v61, 2 }
  0xcf   : > { %10820 = vst [vmem:[#allocation5_spill] sm:$0xff] %v7710_v58  ;;  %vm1907_vm5 = vcmp.eq.s32.totalorder %v7538_v10, 2  ;;  %vm1906_vm6 = vcmp.eq.s32.totalorder %v7550_v21, 2  ;;  %vm3063_vm1 = vcmp.eq.s32.totalorder %v7485_v23, 4  ;;  %vm3065_vm0 = vcmp.eq.s32.totalorder %v7522_v57, 4 }
  0xd0   : > { %v621_v5 = vpop.permute.xlu1 %620  ;;  %v625_v36 = vpop.permute.xlu0 %624  ;;  %1279 = vmin.xlane.f32.xlu0 %v1278_v45  ;;  %vm3064_vm7 = vcmp.eq.s32.totalorder %v7535_v61, 4  ;;  %vm1909_vm8 = vcmp.eq.s32.totalorder %v7566_v25, 2  ;;  %vm1908_vm9 = vcmp.eq.s32.totalorder %v7596_v22, 2  ;;  %vm3067_vm10 = vcmp.eq.s32.totalorder %v7538_v10, 4 }
  0xd1   : > { %v655_v4 = vmul.f32 %v7643_v41, %v621_v5  ;;  %v656_v63 = vmul.f32 %v7643_v41, %v625_v36  ;;  %1282 = vmin.xlane.f32.xlu1 %v1281_v12  ;;  %v1290_v12 = vsel %vm753_vm14, %v7683_v38, inf  ;;  %v616_v36 = vmul.f32 %v610_v48, %v7626_v15 }
  0xd2   : > { %v7780_v2 = vsel %vm3064_vm7, %v7526_v8, %v7400_v6  ;;  %vm3066_vm11 = vcmp.eq.s32.totalorder %v7550_v21, 4  ;;  %vm3069_vm12 = vcmp.eq.s32.totalorder %v7566_v25, 4  ;;  %vm2427_vm13 = vcmp.eq.s32.totalorder %v7485_v23, 3 }
  0xd3   : > { %v663_v60 = vadd.f32 %v655_v4, %v611_v16  ;;  %v7671_v49 = vadd.f32 %v656_v63, %v612_v3  ;;  %v618_v4 = vmul.f32 %v610_v48, %v605_v34  ;;  %v7720_v63 = vsel %vm1903_vm15, %v7489_v62, %v7390_v0 }
  0xd4   : > { %v629_v1 = vpop.permute.xlu1 %628  ;;  %v637_v43 = vpop.permute.xlu0 %636  ;;  %1285 = vmin.xlane.f32.xlu0 %v1284_v7  ;;  %v1299_v48 = vsel %vm753_vm14, %v7704_v17, inf  ;;  %v1296_v34 = vsel %vm753_vm14, %v7710_v58, inf  ;;  %v7739_v7 = vsel %vm1904_vm4, %v7526_v8, %v7400_v6  ;;  %vm3068_vm15 = vcmp.eq.s32.totalorder %v7596_v22, 4 }
  0xd5   : > { %v657_v11 = vmul.f32 %v7643_v41, %v629_v1  ;;  %v659_v54 = vmul.f32 %v7643_v41, %v637_v43  ;;  %1288 = vmin.xlane.f32.xlu1 %v1287_v44  ;;  %10823 = vst [vmem:[#allocation8_spill] sm:$0xff] %v7739_v7  ;;  %v1921_v43 = vsel %vm753_vm14, %v7720_v63, inf  ;;  %vm3589_vm4 = vcmp.eq.s32.totalorder %v7522_v57, 5 }
  0xd6   : > { %v7849_v26 = vsel %vm2427_vm13, %v7489_v62, %v7390_v0  ;;  %vm3593_vm7 = vcmp.eq.s32.totalorder %v7566_v25, 5  ;;  %vm4225_vm13 = vcmp.eq.s32.totalorder %v7522_v57, 6 }
  0xd7   : > { %v7696_v3 = vadd.f32 %v657_v11, %v613_v24  ;;  %v7698_v16 = vadd.f32 %v659_v54, %v615_v29  ;;  %v7725_v24 = vsel %vm1902_vm2, %v7511_v46, %v7400_v6  ;;  %v7729_v29 = vsel %vm1905_vm3, %v7515_v20, %v7390_v0 }
  0xd8   : > { %v633_v13 = vpop.permute.xlu1 %632  ;;  %v645_v51 = vpop.permute.xlu0 %644  ;;  %1291 = vmin.xlane.f32.xlu0 %v1290_v12  ;;  %10821 = vst [vmem:[#allocation6_spill] sm:$0xff] %v7725_v24  ;;  %10822 = vst [vmem:[#allocation7_spill] sm:$0xff] %v7729_v29  ;;  %v7746_v11 = vsel %vm1907_vm5, %v7544_v33, %v7390_v0  ;;  %vm3587_vm2 = vcmp.eq.s32.totalorder %v7485_v23, 5  ;;  %vm3586_vm3 = vcmp.eq.s32.totalorder %v7491_v37, 5  ;;  %vm2426_vm5 = vcmp.eq.s32.totalorder %v7491_v37, 3 }
  0xd9   : > { %v658_v45 = vmul.f32 %v7643_v41, %v633_v13  ;;  %v661_v5 = vmul.f32 %v7643_v41, %v645_v51  ;;  %1294 = vmin.xlane.f32.xlu1 %v1293_v18  ;;  %10824 = vst [vmem:[#allocation9_spill] sm:$0xff] %v7746_v11  ;;  %v1927_v18 = vsel %vm753_vm14, %v7729_v29, inf  ;;  %v7757_v13 = vsel %vm3063_vm1, %v7489_v62, %v7390_v0 }
  0xda   : > { %v1924_v51 = vsel %vm753_vm14, %v7739_v7, inf  ;;  %v7789_v7 = vsel %vm3067_vm10, %v7544_v33, %v7390_v0  ;;  %vm3591_vm1 = vcmp.eq.s32.totalorder %v7538_v10, 5  ;;  %vm3592_vm10 = vcmp.eq.s32.totalorder %v7596_v22, 5 }
  0xdb   : > { %v666_v44 = vadd.f32 %v658_v45, %v614_v31  ;;  %v7731_v15 = vadd.f32 %v661_v5, %v617_v53  ;;  %v1918_v53 = vsel %vm753_vm14, %v7725_v24, inf  ;;  %v7763_v45 = vsel %vm1906_vm6, %v7554_v32, %v7400_v6 }
  0xdc   : > { %v641_v1 = vpop.permute.xlu1 %640  ;;  %1297 = vmin.xlane.f32.xlu0 %v1296_v34  ;;  %10825 = vst [vmem:[#allocation10_spill] sm:$0xff] %v7763_v45  ;;  %vm3588_vm6 = vcmp.eq.s32.totalorder %v7535_v61, 5 }
  0xdd   : > { %v660_v54 = vmul.f32 %v7643_v41, %v641_v1  ;;  %v673_v31 = vpop.permute.xlu0 %672  ;;  %1300 = vmin.xlane.f32.xlu1 %v1299_v48  ;;  %v1933_v48 = vsel %vm753_vm14, %v7746_v11, inf }
  0xde   : > { %v707_v12 = vmul.f32 %v7689_v50, %v673_v31  ;;  %v7772_v31 = vsel %vm3065_vm0, %v7515_v20, %v7390_v0  ;;  %vm3590_vm0 = vcmp.eq.s32.totalorder %v7550_v21, 5 }
  0xdf   : > { %v668_v5 = vadd.f32 %v660_v54, %v616_v36 }
  0xe0   : > { %v7768_v34 = vadd.f32 %v707_v12, %v663_v60  ;;  %v649_v1 = vpop.permute.xlu1 %648  ;;  %1919 = vmin.xlane.f32.xlu0 %v1918_v53  ;;  %v1930_v60 = vsel %vm753_vm14, %v7763_v45, inf }
  0xe1   : > { %v662_v36 = vmul.f32 %v7643_v41, %v649_v1  ;;  %v685_v54 = vpop.permute.xlu0 %684  ;;  %1922 = vmin.xlane.f32.xlu1 %v1921_v43  ;;  %v7793_v41 = vsel %vm3066_vm11, %v7554_v32, %v7400_v6  ;;  %v7798_v43 = vsel %vm1909_vm8, %v7610_v47, %v7390_v0  ;;  %v7802_v1 = vsel %vm1908_vm9, %v7600_v35, %v7400_v6 }
  0xe2   : > { %10826 = vst [vmem:[#allocation11_spill] sm:$0xff] %v7768_v34  ;;  %v710_v12 = vmul.f32 %v7689_v50, %v685_v54  ;;  %10827 = vst [vmem:[#allocation12_spill] sm:$0xff] %v7798_v43  ;;  %v1936_v58 = vsel %vm753_vm14, %v7802_v1, inf  ;;  %vm2429_vm8 = vcmp.eq.s32.totalorder %v7522_v57, 3  ;;  %vm2428_vm9 = vcmp.eq.s32.totalorder %v7535_v61, 3 }
  0xe3   : > { %v670_v53 = vadd.f32 %v662_v36, %v618_v4  ;;  %10828 = vst [vmem:[#allocation13_spill] sm:$0xff] %v7802_v1  ;;  %v7808_v4 = vsel %vm3069_vm12, %v7610_v47, %v7390_v0  ;;  %vm4223_vm11 = vcmp.eq.s32.totalorder %v7485_v23, 6  ;;  %vm4222_vm12 = vcmp.eq.s32.totalorder %v7491_v37, 6 }
  0xe4   : > { %v7804_v54 = vadd.f32 %v710_v12, %v666_v44  ;;  %1925 = vmin.xlane.f32.xlu0 %v1924_v51  ;;  %v7819_v51 = vsel %vm3068_vm15, %v7600_v35, %v7400_v6  ;;  %v1939_v12 = vsel %vm753_vm14, %v7798_v43, inf  ;;  %vm2431_vm15 = vcmp.eq.s32.totalorder %v7538_v10, 3 }
  0xe5   : > { %v677_v36 = vpop.permute.xlu1 %676  ;;  %v693_v45 = vpop.permute.xlu0 %692  ;;  %1928 = vmin.xlane.f32.xlu1 %v1927_v18  ;;  %v7827_v18 = vsel %vm3587_vm2, %v7489_v62, %v7390_v0  ;;  %vm4224_vm2 = vcmp.eq.s32.totalorder %v7535_v61, 6 }
  0xe6   : > { %10829 = vst [vmem:[#allocation14_spill] sm:$0xff] %v7804_v54  ;;  %v708_v24 = vmul.f32 %v7689_v50, %v677_v36  ;;  %v712_v44 = vmul.f32 %v7689_v50, %v693_v45  ;;  %6952 = vmatprep.subr.mxu1 %v7804_v54  ;;  %v7831_v45 = vsel %vm3586_vm3, %v7511_v46, %v7400_v6  ;;  %vm4227_vm3 = vcmp.eq.s32.totalorder %v7538_v10, 6 }
  0xe7   : > { %6953 = vmatpush3.msra.mxu1 %v7804_v54  ;;  %v7835_v36 = vsel %vm3589_vm4, %v7515_v20, %v7390_v0  ;;  %vm4229_vm4 = vcmp.eq.s32.totalorder %v7566_v25, 6 }
  0xe8   : > { %v7841_v43 = vadd.f32 %v708_v24, %v7671_v49  ;;  %v7843_v54 = vadd.f32 %v712_v44, %v668_v5  ;;  %1931 = vmin.xlane.f32.xlu0 %v1930_v60  ;;  %v7859_v5 = vsel %vm3588_vm6, %v7526_v8, %v7400_v6  ;;  %v7866_v60 = vsel %vm2426_vm5, %v7511_v46, %v7400_v6 }
  0xe9   : > { %v681_v11 = vpop.permute.xlu1 %680  ;;  %v701_v38 = vpop.permute.xlu0 %700  ;;  %1934 = vmin.xlane.f32.xlu1 %v1933_v48  ;;  %10832 = vst [vmem:[#allocation17_spill] sm:$0xff] %v7866_v60  ;;  %v7879_v48 = vsel %vm3593_vm7, %v7610_v47, %v7390_v0  ;;  %v2445_v44 = vsel %vm753_vm14, %v7849_v26, inf  ;;  %vm4747_vm5 = vcmp.eq.s32.totalorder %v7485_v23, 7  ;;  %vm2430_vm6 = vcmp.eq.s32.totalorder %v7550_v21, 3 }
  0xea   : > { %10830 = vst [vmem:[#allocation15_spill] sm:$0xff] %v7841_v43  ;;  %10831 = vst [vmem:[#allocation16_spill] sm:$0xff] %v7843_v54  ;;  %v709_v49 = vmul.f32 %v7689_v50, %v681_v11  ;;  %6945 = vmatprep.subr.mxu0 %v7841_v43  ;;  %v714_v24 = vmul.f32 %v7689_v50, %v701_v38  ;;  %v7871_v11 = vsel %vm3591_vm1, %v7544_v33, %v7390_v0 }
  0xeb   : > { %6946 = vmatpush3.msra.mxu0 %v7841_v43  ;;  %v7875_v38 = vsel %vm3590_vm0, %v7554_v32, %v7400_v6  ;;  %v7959_v23 = vsel %vm4747_vm5, %v7489_v62, %v7390_v0  ;;  %vm4749_vm1 = vcmp.eq.s32.totalorder %v7522_v57, 7  ;;  %vm4751_vm0 = vcmp.eq.s32.totalorder %v7538_v10, 7 }
  0xec   : > { %v7885_v1 = vadd.f32 %v709_v49, %v7696_v3  ;;  %v7887_v43 = vadd.f32 %v714_v24, %v670_v53  ;;  %6947 = vmatprep.subr.mxu0 %v7768_v34  ;;  %1937 = vmin.xlane.f32.xlu0 %v1936_v58  ;;  %v7899_v53 = vsel %vm3592_vm10, %v7600_v35, %v7400_v6  ;;  %v2442_v49 = vsel %vm753_vm14, %v7866_v60, inf }
  0xed   : > { %v689_v29 = vpop.permute.xlu1 %688  ;;  %6948 = vmatpush3.msra.mxu0 %v7768_v34  ;;  %1940 = vmin.xlane.f32.xlu1 %v1939_v12  ;;  %v7903_v58 = vsel %vm4223_vm11, %v7489_v62, %v7390_v0  ;;  %v7918_v12 = vsel %vm4222_vm12, %v7511_v46, %v7400_v6  ;;  %v7922_v24 = vsel %vm4225_vm13, %v7515_v20, %v7390_v0  ;;  %vm4753_vm7 = vcmp.eq.s32.totalorder %v7566_v25, 7 }
  0xee   : > { %10833 = vst [vmem:[#allocation18_spill] sm:$0xff] %v7885_v1  ;;  %10834 = vst [vmem:[#allocation19_spill] sm:$0xff] %v7887_v43  ;;  %v711_v3 = vmul.f32 %v7689_v50, %v689_v29  ;;  %6954 = vmatprep.subr.mxu1 %v7885_v1  ;;  %v7912_v29 = vsel %vm2429_vm8, %v7515_v20, %v7390_v0  ;;  %6959 = vmatprep.subr.mxu0 %v7843_v54  ;;  %vm4226_vm8 = vcmp.eq.s32.totalorder %v7550_v21, 6 }
  0xef   : > { %6955 = vmatpush3.msra.mxu1 %v7885_v1  ;;  %v7928_v34 = vsel %vm2428_vm9, %v7526_v8, %v7400_v6  ;;  %v7938_v60 = vsel %vm4224_vm2, %v7526_v8, %v7400_v6  ;;  %v7978_v62 = vsel %vm2430_vm6, %v7554_v32, %v7400_v6  ;;  %v7982_v57 = vsel %vm4751_vm0, %v7544_v33, %v7390_v0 }
  0xf0   : > { %v7932_v1 = vadd.f32 %v711_v3, %v7698_v16  ;;  %6966 = vmatprep.subr.mxu1 %v7887_v43  ;;  %2443 = vmin.xlane.f32.xlu0 %v2442_v49  ;;  %v7947_v3 = vsel %vm4227_vm3, %v7544_v33, %v7390_v0  ;;  %v7951_v49 = vsel %vm4229_vm4, %v7610_v47, %v7390_v0  ;;  %v2451_v43 = vsel %vm753_vm14, %v7912_v29, inf }
  0xf1   : > { %v697_v54 = vpop.permute.xlu1 %696  ;;  %2446 = vmin.xlane.f32.xlu1 %v2445_v44  ;;  %v7973_v44 = vsel %vm4749_vm1, %v7515_v20, %v7390_v0  ;;  %vm2432_vm9 = vcmp.eq.s32.totalorder %v7596_v22, 3  ;;  %v7989_v20 = vsel %vm4753_vm7, %v7610_v47, %v7390_v0  ;;  %v7993_v10 = vsel %vm4226_vm8, %v7554_v32, %v7400_v6 }
  0xf2   : > { %10835 = vst [vmem:[#allocation20_spill] sm:$0xff] %v7932_v1  ;;  %v713_v16 = vmul.f32 %v7689_v50, %v697_v54  ;;  %v2448_v1 = vsel %vm753_vm14, %v7928_v34, inf  ;;  %v7966_v50 = vsel %vm2431_vm15, %v7544_v33, %v7390_v0  ;;  %vm4228_vm10 = vcmp.eq.s32.totalorder %v7596_v22, 6 }
  0xf3   : > { %v2457_v33 = vsel %vm753_vm14, %v7966_v50, inf  ;;  %vm2433_vm11 = vcmp.eq.s32.totalorder %v7566_v25, 3  ;;  %vm4746_vm12 = vcmp.eq.s32.totalorder %v7491_v37, 7  ;;  %vm4748_vm13 = vcmp.eq.s32.totalorder %v7535_v61, 7 }
  0xf4   : > { %v7969_v54 = vadd.f32 %v713_v16, %v7731_v15  ;;  %2449 = vmin.xlane.f32.xlu0 %v2448_v1  ;;  %v8001_v15 = vsel %vm4228_vm10, %v7600_v35, %v7400_v6  ;;  %v8008_v1 = vsel %vm4746_vm12, %v7511_v46, %v7400_v6  ;;  %vm4750_vm15 = vcmp.eq.s32.totalorder %v7550_v21, 7 }
  0xf5   : > { %2452 = vmin.xlane.f32.xlu1 %v2451_v43  ;;  %v2454_v43 = vsel %vm753_vm14, %v7978_v62, inf  ;;  %v8014_v25 = vsel %vm2432_vm9, %v7600_v35, %v7400_v6  ;;  %v8018_v16 = vsel %vm4748_vm13, %v7526_v8, %v7400_v6  ;;  %vm4752_vm2 = vcmp.eq.s32.totalorder %v7596_v22, 7 }
  0xf6   : > { %10836 = vst [vmem:[#allocation21_spill] sm:$0xff] %v7969_v54  ;;  %v8022_v54 = vsel %vm4750_vm15, %v7554_v32, %v7400_v6  ;;  %v8027_v61 = vsel %vm2433_vm11, %v7610_v47, %v7390_v0  ;;  %vm3062_vm3 = vcmp.eq.s32.totalorder %v7491_v37, 4  ;;  %v8032_v21 = vsel %vm4752_vm2, %v7600_v35, %v7400_v6 }
  0xf7   : > { %v2460_v8 = vsel %vm753_vm14, %v8014_v25, inf  ;;  %v2463_v32 = vsel %vm753_vm14, %v8027_v61, inf  ;;  %v8040_v22 = vsel %vm3062_vm3, %v7511_v46, %v7400_v6  ;;  %v3081_v37 = vsel %vm753_vm14, %v7757_v13, inf }
  0xf8   : > { %2455 = vmin.xlane.f32.xlu0 %v2454_v43  ;;  %v3078_v0 = vsel %vm753_vm14, %v8040_v22, inf  ;;  %v3084_v35 = vsel %vm753_vm14, %v7780_v2, inf  ;;  %v3087_v47 = vsel %vm753_vm14, %v7772_v31, inf  ;;  %v3090_v6 = vsel %vm753_vm14, %v7793_v41, inf }
  0xf9   : > { %2458 = vmin.xlane.f32.xlu1 %v2457_v33  ;;  %v3093_v46 = vsel %vm753_vm14, %v7789_v7, inf  ;;  %v3096_v33 = vsel %vm753_vm14, %v7819_v51, inf  ;;  %v3099_v43 = vsel %vm753_vm14, %v7808_v4, inf }
  0xfc   : > { %2461 = vmin.xlane.f32.xlu0 %v2460_v8  ;;  %v3602_v8 = vsel %vm753_vm14, %v7831_v45, inf }
  0xfd   : > { %2464 = vmin.xlane.f32.xlu1 %v2463_v32  ;;  %v3605_v32 = vsel %vm753_vm14, %v7827_v18, inf }
 0x100   : > { %3079 = vmin.xlane.f32.xlu0 %v3078_v0  ;;  %v3608_v0 = vsel %vm753_vm14, %v7859_v5, inf }
 0x101   : > { %3082 = vmin.xlane.f32.xlu1 %v3081_v37  ;;  %v3611_v37 = vsel %vm753_vm14, %v7835_v36, inf }
 0x104   : > { %3085 = vmin.xlane.f32.xlu0 %v3084_v35  ;;  %v3614_v35 = vsel %vm753_vm14, %v7875_v38, inf }
 0x105   : > { %3088 = vmin.xlane.f32.xlu1 %v3087_v47  ;;  %v3617_v47 = vsel %vm753_vm14, %v7871_v11, inf }
 0x108   : > { %3091 = vmin.xlane.f32.xlu0 %v3090_v6  ;;  %v3620_v6 = vsel %vm753_vm14, %v7899_v53, inf }
 0x109   : > { %3094 = vmin.xlane.f32.xlu1 %v3093_v46  ;;  %v3623_v46 = vsel %vm753_vm14, %v7879_v48, inf }
 0x10c   : > { %3097 = vmin.xlane.f32.xlu0 %v3096_v33  ;;  %v4238_v33 = vsel %vm753_vm14, %v7918_v12, inf }
 0x10d   : > { %3100 = vmin.xlane.f32.xlu1 %v3099_v43  ;;  %v4241_v43 = vsel %vm753_vm14, %v7903_v58, inf }
 0x110   : > { %3603 = vmin.xlane.f32.xlu0 %v3602_v8  ;;  %v4244_v8 = vsel %vm753_vm14, %v7938_v60, inf }
 0x111   : > { %3606 = vmin.xlane.f32.xlu1 %v3605_v32  ;;  %v4247_v32 = vsel %vm753_vm14, %v7922_v24, inf }
 0x114   : > { %3609 = vmin.xlane.f32.xlu0 %v3608_v0  ;;  %v4253_v0 = vsel %vm753_vm14, %v7947_v3, inf }
 0x115   : > { %3612 = vmin.xlane.f32.xlu1 %v3611_v37  ;;  %v4259_v37 = vsel %vm753_vm14, %v7951_v49, inf }
 0x118   : > { %3615 = vmin.xlane.f32.xlu0 %v3614_v35  ;;  %v4765_v35 = vsel %vm753_vm14, %v7959_v23, inf }
 0x119   : > { %3618 = vmin.xlane.f32.xlu1 %v3617_v47  ;;  %v4771_v47 = vsel %vm753_vm14, %v7973_v44, inf }
 0x11c   : > { %3621 = vmin.xlane.f32.xlu0 %v3620_v6  ;;  %v4777_v6 = vsel %vm753_vm14, %v7982_v57, inf }
 0x11d   : > { %3624 = vmin.xlane.f32.xlu1 %v3623_v46  ;;  %v4783_v46 = vsel %vm753_vm14, %v7989_v20, inf }
 0x120   : > { %4239 = vmin.xlane.f32.xlu0 %v4238_v33 }
 0x121   : > { %4242 = vmin.xlane.f32.xlu1 %v4241_v43 }
 0x124   : > { %4245 = vmin.xlane.f32.xlu0 %v4244_v8 }
 0x125   : > { %4248 = vmin.xlane.f32.xlu1 %v4247_v32 }
 0x129   : > { %4254 = vmin.xlane.f32.xlu1 %v4253_v0 }
 0x12d   : > { %4260 = vmin.xlane.f32.xlu1 %v4259_v37 }
 0x131   : > { %4766 = vmin.xlane.f32.xlu1 %v4765_v35 }
 0x135   : > { %4772 = vmin.xlane.f32.xlu1 %v4771_v47 }
 0x139   : > { %4778 = vmin.xlane.f32.xlu1 %v4777_v6 }
 0x13d   : > { %4784 = vmin.xlane.f32.xlu1 %v4783_v46 }
 0x149   : > { %v759_v33 = vpop.xlane.xlu0 %758 }
 0x14a   : > { %v756_v43 = vpop.xlane.xlu1 %755  ;;  %vm779_vm4 = vcmp.le.f32.partialorder %v7563_v56, %v759_v33 }
 0x14b   : > { %vm778_vm5 = vcmp.le.f32.partialorder %v7572_v14, %v756_v43  ;;  %v787_v8 = vsel %vm779_vm4, %v7370_v40, 16 }
 0x14c   : > { %v786_v32 = vsel %vm778_vm5, %v7370_v40, 16  ;;  %v8102_v37 = vsel %vm753_vm14, %v787_v8, 2147483647 }
 0x14d   : > { %v8099_v0 = vsel %vm753_vm14, %v786_v32, 2147483647  ;;  %10837 = vst [vmem:[#allocation22_spill] sm:$0xff] %v8102_v37  ;;  %v762_v35 = vpop.xlane.xlu0 %761  ;;  %v811_v46 = vshra.s32 %v8102_v37, 16 }
 0x14e   : > { %v765_v47 = vpop.xlane.xlu1 %764  ;;  %vm780_vm6 = vcmp.le.f32.partialorder %v7590_v30, %v762_v35  ;;  %v796_v6 = vshra.s32 %v8099_v0, 16 }
 0x14f   : > { %vm781_vm1 = vcmp.le.f32.partialorder %v7580_v19, %v765_v47  ;;  %v788_v56 = vsel %vm780_vm6, %v7370_v40, 16  ;;  %v8117_v30 = vcvt.s32.f32 %v811_v46 }
 0x150   : > { %v8108_v14 = vcvt.s32.f32 %v796_v6  ;;  %v8112_v33 = vsel %vm753_vm14, %v788_v56, 2147483647  ;;  %v789_v8 = vsel %vm781_vm1, %v7370_v40, 16 }
 0x151   : > { %10839 = vst [vmem:[#allocation24_spill] sm:$0xff] %v8112_v33  ;;  %v768_v43 = vpop.xlane.xlu0 %767  ;;  %10840 = vst [vmem:[#allocation25_spill] sm:$0xff] %v8117_v30  ;;  %v826_v19 = vshra.s32 %v8112_v33, 16  ;;  %v8121_v35 = vsel %vm753_vm14, %v789_v8, 2147483647 }
 0x152   : > { %10838 = vst [vmem:[#allocation23_spill] sm:$0xff] %v8108_v14  ;;  %v771_v32 = vpop.xlane.xlu1 %770  ;;  %799 = vmin.xlane.f32.xlu0 %v8108_v14  ;;  %vm782_vm0 = vcmp.le.f32.partialorder %v7614_v9, %v768_v43  ;;  %10841 = vst [vmem:[#allocation26_spill] sm:$0xff] %v8121_v35  ;;  %v841_v14 = vshra.s32 %v8121_v35, 16 }
 0x153   : > { %v790_v6 = vsel %vm782_vm0, %v7370_v40, 16  ;;  %vm783_vm7 = vcmp.le.f32.partialorder %v7606_v39, %v771_v32  ;;  %v8126_v37 = vcvt.s32.f32 %v826_v19 }
 0x154   : > { %v8130_v9 = vsel %vm753_vm14, %v790_v6, 2147483647  ;;  %v791_v43 = vsel %vm783_vm7, %v7370_v40, 16  ;;  %v8135_v33 = vcvt.s32.f32 %v841_v14 }
 0x155   : > { %v774_v47 = vpop.xlane.xlu0 %773  ;;  %10842 = vst [vmem:[#allocation27_spill] sm:$0xff] %v8126_v37  ;;  %v8139_v39 = vsel %vm753_vm14, %v791_v43, 2147483647 }
 0x156   : > { %v777_v56 = vpop.xlane.xlu1 %776  ;;  %814 = vmin.xlane.f32.xlu0 %v8117_v30  ;;  %vm784_vm8 = vcmp.le.f32.partialorder %v7624_v52, %v774_v47  ;;  %10843 = vst [vmem:[#allocation28_spill] sm:$0xff] %v8135_v33  ;;  %v856_v30 = vshra.s32 %v8130_v9, 16  ;;  %10844 = vst [vmem:[#allocation29_spill] sm:$0xff] %v8139_v39 }
 0x157   : > { %v792_v32 = vsel %vm784_vm8, %v7370_v40, 16  ;;  %vm785_vm9 = vcmp.le.f32.partialorder %v7633_v42, %v777_v56 }
 0x158   : > { %v8144_v35 = vcvt.s32.f32 %v856_v30  ;;  %v8148_v52 = vsel %vm753_vm14, %v792_v32, 2147483647  ;;  %v793_v14 = vsel %vm785_vm9, %v7370_v40, 16 }
 0x159   : > { %v1280_v46 = vpop.xlane.xlu0 %1279  ;;  %10846 = vst [vmem:[#allocation31_spill] sm:$0xff] %v8148_v52  ;;  %v886_v42 = vshra.s32 %v8148_v52, 16  ;;  %v8159_v30 = vsel %vm753_vm14, %v793_v14, 2147483647 }
 0x15a   : > { %v1283_v8 = vpop.xlane.xlu1 %1282  ;;  %829 = vmin.xlane.f32.xlu0 %v8126_v37  ;;  %10845 = vst [vmem:[#allocation30_spill] sm:$0xff] %v8144_v35  ;;  %v871_v37 = vshra.s32 %v8139_v39, 16  ;;  %vm1302_vm10 = vcmp.le.f32.partialorder %v7651_v27, %v1280_v46 }
 0x15b   : > { %v1310_v39 = vsel %vm1302_vm10, %v7370_v40, 16  ;;  %vm1303_vm11 = vcmp.le.f32.partialorder %v7647_v59, %v1283_v8  ;;  %v8166_v27 = vcvt.s32.f32 %v886_v42 }
 0x15c   : > { %v8155_v43 = vcvt.s32.f32 %v871_v37  ;;  %v901_v37 = vshra.s32 %v8159_v30, 16  ;;  %v8170_v46 = vsel %vm753_vm14, %v1310_v39, 2147483647  ;;  %v1311_v52 = vsel %vm1303_vm11, %v7370_v40, 16 }
 0x15d   : > { %v1286_v6 = vpop.xlane.xlu0 %1285  ;;  %10847 = vst [vmem:[#allocation32_spill] sm:$0xff] %v8166_v27 }
 0x15e   : > { %v1289_v19 = vpop.xlane.xlu1 %1288  ;;  %844 = vmin.xlane.f32.xlu0 %v8135_v33  ;;  %vm1304_vm13 = vcmp.le.f32.partialorder %v7665_v55, %v1286_v6  ;;  %v8185_v42 = vcvt.s32.f32 %v901_v37 }
 0x15f   : > { %v1312_v55 = vsel %vm1304_vm13, %v7370_v40, 16  ;;  %vm1305_vm2 = vcmp.le.f32.partialorder %v7661_v28, %v1289_v19 }
 0x160   : > { %10850 = vst [vmem:[#allocation35_spill] sm:$0xff] %v8185_v42  ;;  %v1313_v28 = vsel %vm1305_vm2, %v7370_v40, 16 }
 0x161   : > { %v1292_v56 = vpop.xlane.xlu0 %1291 }
 0x162   : > { %v8151_v47 = vpop.xlane.xlu1 %1294  ;;  %859 = vmin.xlane.f32.xlu0 %v8144_v35 }
 0x166   : > { %v1301_v32 = vpop.xlane.xlu1 %1300  ;;  %874 = vmin.xlane.f32.xlu0 %v8155_v43 }
 0x167   : > { %vm1309_vm12 = vcmp.le.f32.partialorder %v7704_v17, %v1301_v32  ;;  %v8179_v17 = vpop.xlane.xlu0 %1297  ;;  %v8189_v32 = vsel %vm753_vm14, %v1311_v52, 2147483647 }
 0x168   : > { %v1317_v35 = vsel %vm1309_vm12, %v7370_v40, 16  ;;  %10851 = vst [vmem:[#allocation36_spill] sm:$0xff] %v8189_v32 }
 0x169   : > { %v8173_v14 = vsel %vm753_vm14, %v1317_v35, 2147483647  ;;  %v1320_v35 = vshra.s32 %v8170_v46, 16 }
 0x16a   : > { %10848 = vst [vmem:[#allocation33_spill] sm:$0xff] %v8173_v14  ;;  %v1923_v33 = vpop.xlane.xlu1 %1922  ;;  %889 = vmin.xlane.f32.xlu0 %v8166_v27  ;;  %v1425_v59 = vshra.s32 %v8173_v14, 16  ;;  %v8207_v14 = vsel %vm753_vm14, %v1312_v55, 2147483647 }
 0x16b   : > { %vm1943_vm15 = vcmp.le.f32.partialorder %v7720_v63, %v1923_v33  ;;  %v10853_v33 = vld [vmem:[#allocation7_spill] sm:$0xff]  ;;  %10855 = vst [vmem:[#allocation38_spill] sm:$0xff] %v8207_v14 }
 0x16c   : > { %v1951_v8 = vsel %vm1943_vm15, %v7370_v40, 16  ;;  %v8183_v39 = vcvt.s32.f32 %v1425_v59  ;;  %v8203_v59 = vcvt.s32.f32 %v1320_v35 }
 0x16d   : > { %v8192_v27 = vsel %vm753_vm14, %v1951_v8, 2147483647  ;;  %v1335_v8 = vshra.s32 %v8189_v32, 16  ;;  %v8227_v32 = vsel %vm753_vm14, %v1313_v28, 2147483647 }
 0x16e   : > { %10849 = vst [vmem:[#allocation34_spill] sm:$0xff] %v8183_v39  ;;  %10852 = vst [vmem:[#allocation37_spill] sm:$0xff] %v8192_v27  ;;  %1428 = vmin.xlane.f32.xlu1 %v8183_v39  ;;  %v1929_v6 = vpop.xlane.xlu1 %1928  ;;  %904 = vmin.xlane.f32.xlu0 %v8185_v42  ;;  %v1975_v63 = vshra.s32 %v8192_v27, 16  ;;  %v8209_v39 = vpop.xlane.xlu0 %1919 }
 0x16f   : > { %vm1945_vm3 = vcmp.le.f32.partialorder %v10853_v33, %v1929_v6  ;;  %v10857_v6 = vld [vmem:[#allocation4_spill] sm:$0xff]  ;;  %v8223_v27 = vcvt.s32.f32 %v1335_v8  ;;  %v10862_v8 = vld [vmem:[#allocation3_spill] sm:$0xff] }
 0x170   : > { %v1953_v37 = vsel %vm1945_vm3, %v7370_v40, 16  ;;  %v8201_v52 = vcvt.s32.f32 %v1975_v63  ;;  %vm1306_vm4 = vcmp.le.f32.partialorder %v10857_v6, %v1292_v56  ;;  %v10858_v63 = vld [vmem:[#allocation9_spill] sm:$0xff]  ;;  %vm1307_vm6 = vcmp.le.f32.partialorder %v10862_v8, %v8151_v47  ;;  %v10863_v6 = vld [vmem:[#allocation12_spill] sm:$0xff] }
 0x171   : > { %v8212_v42 = vsel %vm753_vm14, %v1953_v37, 2147483647  ;;  %v1350_v37 = vshra.s32 %v8207_v14, 16  ;;  %10860 = vst [vmem:[#allocation9_spill] sm:$0xff] %v8227_v32  ;;  %v1315_v47 = vsel %vm1307_vm6, %v7370_v40, 16 }
 0x172   : > { %10854 = vst [vmem:[#allocation7_spill] sm:$0xff] %v8201_v52  ;;  %10856 = vst [vmem:[#allocation39_spill] sm:$0xff] %v8212_v42  ;;  %1978 = vmin.xlane.f32.xlu1 %v8201_v52  ;;  %v1935_v19 = vpop.xlane.xlu1 %1934  ;;  %1323 = vmin.xlane.f32.xlu0 %v8203_v59  ;;  %v2005_v35 = vshra.s32 %v8212_v42, 16  ;;  %v1314_v42 = vsel %vm1306_vm4, %v7370_v40, 16 }
 0x173   : > { %vm1947_vm5 = vcmp.le.f32.partialorder %v10858_v63, %v1935_v19  ;;  %v8248_v14 = vsel %vm753_vm14, %v1314_v42, 2147483647 }
 0x174   : > { %v1955_v55 = vsel %vm1947_vm5, %v7370_v40, 16  ;;  %v8221_v33 = vcvt.s32.f32 %v2005_v35  ;;  %v8238_v35 = vpop.xlane.xlu0 %1925 }
 0x175   : > { %v8230_v52 = vsel %vm753_vm14, %v1955_v55, 2147483647  ;;  %v8244_v55 = vcvt.s32.f32 %v1350_v37 }
 0x176   : > { %10859 = vst [vmem:[#allocation4_spill] sm:$0xff] %v8221_v33  ;;  %10861 = vst [vmem:[#allocation40_spill] sm:$0xff] %v8230_v52  ;;  %2008 = vmin.xlane.f32.xlu1 %v8221_v33  ;;  %v1941_v56 = vpop.xlane.xlu1 %1940  ;;  %1338 = vmin.xlane.f32.xlu0 %v8223_v27  ;;  %v2035_v19 = vshra.s32 %v8230_v52, 16  ;;  %v1365_v33 = vshra.s32 %v8227_v32, 16 }
 0x177   : > { %vm1949_vm1 = vcmp.le.f32.partialorder %v10863_v6, %v1941_v56  ;;  %v1380_v6 = vshra.s32 %v8248_v14, 16 }
 0x178   : > { %v1957_v28 = vsel %vm1949_vm1, %v7370_v40, 16  ;;  %v8242_v63 = vcvt.s32.f32 %v2035_v19  ;;  %v8261_v42 = vcvt.s32.f32 %v1365_v33  ;;  %v8267_v32 = vpop.xlane.xlu0 %1931 }
 0x179   : > { %v8251_v52 = vsel %vm753_vm14, %v1957_v28, 2147483647  ;;  %v8265_v28 = vsel %vm753_vm14, %v1315_v47, 2147483647  ;;  %v8279_v47 = vcvt.s32.f32 %v1380_v6 }
 0x17a   : > { %10864 = vst [vmem:[#allocation3_spill] sm:$0xff] %v8242_v63  ;;  %10865 = vst [vmem:[#allocation12_spill] sm:$0xff] %v8251_v52  ;;  %2038 = vmin.xlane.f32.xlu1 %v8242_v63  ;;  %v2447_v8 = vpop.xlane.xlu1 %2446  ;;  %1353 = vmin.xlane.f32.xlu0 %v8244_v55  ;;  %v2065_v56 = vshra.s32 %v8251_v52, 16 }
 0x17b   : > { %vm2467_vm0 = vcmp.le.f32.partialorder %v7849_v26, %v2447_v8  ;;  %10867 = vst [vmem:[#allocation42_spill] sm:$0xff] %v8261_v42 }
 0x17c   : > { %v2475_v37 = vsel %vm2467_vm0, %v7370_v40, 16  ;;  %v8259_v19 = vcvt.s32.f32 %v2065_v56  ;;  %v1395_v56 = vshra.s32 %v8265_v28, 16 }
 0x17d   : > { %v8270_v63 = vsel %vm753_vm14, %v2475_v37, 2147483647 }
 0x17e   : > { %10866 = vst [vmem:[#allocation41_spill] sm:$0xff] %v8259_v19  ;;  %10868 = vst [vmem:[#allocation43_spill] sm:$0xff] %v8270_v63  ;;  %2068 = vmin.xlane.f32.xlu1 %v8259_v19  ;;  %v2453_v52 = vpop.xlane.xlu1 %2452  ;;  %1368 = vmin.xlane.f32.xlu0 %v8261_v42  ;;  %v2499_v26 = vshra.s32 %v8270_v63, 16  ;;  %v8288_v42 = vpop.xlane.xlu0 %1937  ;;  %v8294_v6 = vcvt.s32.f32 %v1395_v56 }
 0x17f   : > { %vm2469_vm7 = vcmp.le.f32.partialorder %v7912_v29, %v2453_v52 }
 0x180   : > { %v2477_v33 = vsel %vm2469_vm7, %v7370_v40, 16  ;;  %v8277_v8 = vcvt.s32.f32 %v2499_v26 }
 0x181   : > { %v8283_v37 = vsel %vm753_vm14, %v2477_v33, 2147483647 }
 0x182   : > { %10869 = vst [vmem:[#allocation44_spill] sm:$0xff] %v8277_v8  ;;  %10870 = vst [vmem:[#allocation45_spill] sm:$0xff] %v8283_v37  ;;  %2502 = vmin.xlane.f32.xlu1 %v8277_v8  ;;  %v2459_v19 = vpop.xlane.xlu1 %2458  ;;  %1383 = vmin.xlane.f32.xlu0 %v8279_v47  ;;  %v2529_v63 = vshra.s32 %v8283_v37, 16 }
 0x183   : > { %vm2471_vm8 = vcmp.le.f32.partialorder %v7966_v50, %v2459_v19 }
 0x184   : > { %v2479_v29 = vsel %vm2471_vm8, %v7370_v40, 16  ;;  %v8292_v52 = vcvt.s32.f32 %v2529_v63  ;;  %v8306_v63 = vpop.xlane.xlu0 %2443 }
 0x185   : > { %v8297_v26 = vsel %vm753_vm14, %v2479_v29, 2147483647  ;;  %v4250_v29 = vsel %vm753_vm14, %v7993_v10, inf }
 0x186   : > { %10871 = vst [vmem:[#allocation46_spill] sm:$0xff] %v8292_v52  ;;  %10872 = vst [vmem:[#allocation47_spill] sm:$0xff] %v8297_v26  ;;  %2532 = vmin.xlane.f32.xlu1 %v8292_v52  ;;  %v2465_v33 = vpop.xlane.xlu1 %2464  ;;  %1398 = vmin.xlane.f32.xlu0 %v8294_v6  ;;  %v2559_v37 = vshra.s32 %v8297_v26, 16 }
 0x187   : > { %vm2473_vm9 = vcmp.le.f32.partialorder %v8027_v61, %v2465_v33 }
 0x188   : > { %v2481_v50 = vsel %vm2473_vm9, %v7370_v40, 16  ;;  %v8304_v19 = vcvt.s32.f32 %v2559_v37 }
 0x189   : > { %v8309_v56 = vsel %vm753_vm14, %v2481_v50, 2147483647  ;;  %v4256_v50 = vsel %vm753_vm14, %v8001_v15, inf }
 0x18a   : > { %10873 = vst [vmem:[#allocation48_spill] sm:$0xff] %v8304_v19  ;;  %10874 = vst [vmem:[#allocation49_spill] sm:$0xff] %v8309_v56  ;;  %2562 = vmin.xlane.f32.xlu1 %v8304_v19  ;;  %v3083_v52 = vpop.xlane.xlu1 %3082  ;;  %4251 = vmin.xlane.f32.xlu0 %v4250_v29  ;;  %v2589_v26 = vshra.s32 %v8309_v56, 16  ;;  %v8326_v19 = vpop.xlane.xlu0 %2449 }
 0x18b   : > { %vm3103_vm10 = vcmp.le.f32.partialorder %v7757_v13, %v3083_v52  ;;  %vm2468_vm9 = vcmp.le.f32.partialorder %v7928_v34, %v8326_v19 }
 0x18c   : > { %v3111_v61 = vsel %vm3103_vm10, %v7370_v40, 16  ;;  %v8317_v37 = vcvt.s32.f32 %v2589_v26  ;;  %v2476_v34 = vsel %vm2468_vm9, %v7370_v40, 16 }
 0x18d   : > { %v8320_v33 = vsel %vm753_vm14, %v3111_v61, 2147483647  ;;  %v4762_v61 = vsel %vm753_vm14, %v8008_v1, inf }
 0x18e   : > { %10875 = vst [vmem:[#allocation50_spill] sm:$0xff] %v8317_v37  ;;  %10876 = vst [vmem:[#allocation51_spill] sm:$0xff] %v8320_v33  ;;  %2592 = vmin.xlane.f32.xlu1 %v8317_v37  ;;  %v3089_v8 = vpop.xlane.xlu1 %3088  ;;  %4257 = vmin.xlane.f32.xlu0 %v4256_v50  ;;  %v3135_v29 = vshra.s32 %v8320_v33, 16  ;;  %v10879_v33 = vld [vmem:[#allocation5_spill] sm:$0xff] }
 0x18f   : > { %vm3105_vm11 = vcmp.le.f32.partialorder %v7772_v31, %v3089_v8  ;;  %vm1308_vm12 = vcmp.le.f32.partialorder %v10879_v33, %v8179_v17  ;;  %v10882_v17 = vld [vmem:[#allocation6_spill] sm:$0xff] }
 0x190   : > { %v3113_v13 = vsel %vm3105_vm11, %v7370_v40, 16  ;;  %v8330_v52 = vcvt.s32.f32 %v3135_v29  ;;  %v8345_v29 = vpop.xlane.xlu0 %2455  ;;  %vm1942_vm15 = vcmp.le.f32.partialorder %v10882_v17, %v8209_v39 }
 0x191   : > { %v8333_v26 = vsel %vm753_vm14, %v3113_v13, 2147483647  ;;  %vm2470_vm11 = vcmp.le.f32.partialorder %v7978_v62, %v8345_v29 }
 0x192   : > { %10877 = vst [vmem:[#allocation52_spill] sm:$0xff] %v8330_v52  ;;  %10878 = vst [vmem:[#allocation53_spill] sm:$0xff] %v8333_v26  ;;  %3138 = vmin.xlane.f32.xlu1 %v8330_v52  ;;  %v3095_v37 = vpop.xlane.xlu1 %3094  ;;  %4763 = vmin.xlane.f32.xlu0 %v4762_v61  ;;  %v3165_v50 = vshra.s32 %v8333_v26, 16  ;;  %v4768_v52 = vsel %vm753_vm14, %v8018_v16, inf  ;;  %v1316_v61 = vsel %vm1308_vm12, %v7370_v40, 16 }
 0x193   : > { %vm3107_vm13 = vcmp.le.f32.partialorder %v7789_v7, %v3095_v37 }
 0x194   : > { %v3115_v31 = vsel %vm3107_vm13, %v7370_v40, 16  ;;  %v8343_v8 = vcvt.s32.f32 %v3165_v50  ;;  %v8362_v50 = vsel %vm753_vm14, %v1316_v61, 2147483647 }
 0x195   : > { %v8348_v13 = vsel %vm753_vm14, %v3115_v31, 2147483647 }
 0x196   : > { %10880 = vst [vmem:[#allocation5_spill] sm:$0xff] %v8343_v8  ;;  %10881 = vst [vmem:[#allocation54_spill] sm:$0xff] %v8348_v13  ;;  %3168 = vmin.xlane.f32.xlu1 %v8343_v8  ;;  %v3101_v26 = vpop.xlane.xlu1 %3100  ;;  %4769 = vmin.xlane.f32.xlu0 %v4768_v52  ;;  %v3195_v7 = vshra.s32 %v8348_v13, 16  ;;  %v4774_v52 = vsel %vm753_vm14, %v8022_v54, inf  ;;  %v1950_v13 = vsel %vm1942_vm15, %v7370_v40, 16 }
 0x197   : > { %vm3109_vm2 = vcmp.le.f32.partialorder %v7808_v4, %v3101_v26  ;;  %v10885_v26 = vld [vmem:[#allocation8_spill] sm:$0xff]  ;;  %v8382_v8 = vsel %vm753_vm14, %v1950_v13, 2147483647 }
 0x198   : > { %v3117_v37 = vsel %vm3109_vm2, %v7370_v40, 16  ;;  %v8359_v33 = vcvt.s32.f32 %v3195_v7  ;;  %vm1944_vm3 = vcmp.le.f32.partialorder %v10885_v26, %v8238_v35  ;;  %v8374_v7 = vpop.xlane.xlu0 %2461 }
 0x199   : > { %v8365_v31 = vsel %vm753_vm14, %v3117_v37, 2147483647  ;;  %v1410_v37 = vshra.s32 %v8362_v50, 16  ;;  %v1952_v35 = vsel %vm1944_vm3, %v7370_v40, 16  ;;  %vm2472_vm13 = vcmp.le.f32.partialorder %v8014_v25, %v8374_v7 }
 0x19a   : > { %10883 = vst [vmem:[#allocation6_spill] sm:$0xff] %v8359_v33  ;;  %10884 = vst [vmem:[#allocation55_spill] sm:$0xff] %v8365_v31  ;;  %3198 = vmin.xlane.f32.xlu1 %v8359_v33  ;;  %v3607_v39 = vpop.xlane.xlu1 %3606  ;;  %4775 = vmin.xlane.f32.xlu0 %v4774_v52  ;;  %v3225_v4 = vshra.s32 %v8365_v31, 16  ;;  %v4780_v31 = vsel %vm753_vm14, %v8032_v21, inf  ;;  %v1960_v33 = vshra.s32 %v8382_v8, 16  ;;  %v2480_v25 = vsel %vm2472_vm13, %v7370_v40, 16 }
 0x19b   : > { %vm3627_vm4 = vcmp.le.f32.partialorder %v7827_v18, %v3607_v39  ;;  %v8402_v56 = vsel %vm753_vm14, %v1952_v35, 2147483647 }
 0x19c   : > { %v3635_v61 = vsel %vm3627_vm4, %v7370_v40, 16  ;;  %v8378_v17 = vcvt.s32.f32 %v3225_v4  ;;  %v10888_v4 = vld [vmem:[#allocation10_spill] sm:$0xff] }
 0x19d   : > { %v8385_v52 = vsel %vm753_vm14, %v3635_v61, 2147483647  ;;  %vm1946_vm5 = vcmp.le.f32.partialorder %v10888_v4, %v8267_v32  ;;  %v8398_v61 = vcvt.s32.f32 %v1410_v37  ;;  %v8419_v4 = vcvt.s32.f32 %v1960_v33  ;;  %v10894_v33 = vld [vmem:[#allocation17_spill] sm:$0xff] }
 0x19e   : > { %10886 = vst [vmem:[#allocation8_spill] sm:$0xff] %v8378_v17  ;;  %10887 = vst [vmem:[#allocation56_spill] sm:$0xff] %v8385_v52  ;;  %3228 = vmin.xlane.f32.xlu1 %v8378_v17  ;;  %v3613_v18 = vpop.xlane.xlu1 %3612  ;;  %4781 = vmin.xlane.f32.xlu0 %v4780_v31  ;;  %v3659_v39 = vshra.s32 %v8385_v52, 16  ;;  %v8404_v17 = vpop.xlane.xlu0 %3079  ;;  %v1954_v32 = vsel %vm1946_vm5, %v7370_v40, 16  ;;  %vm2466_vm7 = vcmp.le.f32.partialorder %v10894_v33, %v8306_v63 }
 0x19f   : > { %vm3629_vm6 = vcmp.le.f32.partialorder %v7835_v36, %v3613_v18  ;;  %v10891_v18 = vld [vmem:[#allocation13_spill] sm:$0xff]  ;;  %v2474_v63 = vsel %vm2466_vm7, %v7370_v40, 16  ;;  %vm3102_vm2 = vcmp.le.f32.partialorder %v8040_v22, %v8404_v17 }
 0x1a0   : > { %v3637_v13 = vsel %vm3629_vm6, %v7370_v40, 16  ;;  %v8396_v26 = vcvt.s32.f32 %v3659_v39  ;;  %vm1948_vm1 = vcmp.le.f32.partialorder %v10891_v18, %v8288_v42 }
 0x1a1   : > { %v8407_v31 = vsel %vm753_vm14, %v3637_v13, 2147483647  ;;  %v1990_v13 = vshra.s32 %v8402_v56, 16 }
 0x1a2   : > { %10889 = vst [vmem:[#allocation10_spill] sm:$0xff] %v8396_v26  ;;  %10890 = vst [vmem:[#allocation57_spill] sm:$0xff] %v8407_v31  ;;  %3662 = vmin.xlane.f32.xlu1 %v8396_v26  ;;  %v3619_v36 = vpop.xlane.xlu1 %3618  ;;  %1413 = vmin.xlane.f32.xlu0 %v8398_v61  ;;  %v3689_v37 = vshra.s32 %v8407_v31, 16  ;;  %v8423_v26 = vsel %vm753_vm14, %v1954_v32, 2147483647  ;;  %v1956_v31 = vsel %vm1948_vm1, %v7370_v40, 16 }
 0x1a3   : > { %vm3631_vm0 = vcmp.le.f32.partialorder %v7871_v11, %v3619_v36  ;;  %v8434_v36 = vpop.xlane.xlu0 %3085  ;;  %v8440_v18 = vcvt.s32.f32 %v1990_v13 }
 0x1a4   : > { %v3639_v35 = vsel %vm3631_vm0, %v7370_v40, 16  ;;  %v8417_v39 = vcvt.s32.f32 %v3689_v37  ;;  %vm3104_vm4 = vcmp.le.f32.partialorder %v7780_v2, %v8434_v36 }
 0x1a5   : > { %v8426_v52 = vsel %vm753_vm14, %v3639_v35, 2147483647  ;;  %v2020_v35 = vshra.s32 %v8423_v26, 16 }
 0x1a6   : > { %10892 = vst [vmem:[#allocation13_spill] sm:$0xff] %v8417_v39  ;;  %10893 = vst [vmem:[#allocation58_spill] sm:$0xff] %v8426_v52  ;;  %3692 = vmin.xlane.f32.xlu1 %v8417_v39  ;;  %v3625_v42 = vpop.xlane.xlu1 %3624  ;;  %1963 = vmin.xlane.f32.xlu0 %v8419_v4  ;;  %v3719_v11 = vshra.s32 %v8426_v52, 16  ;;  %v8444_v39 = vsel %vm753_vm14, %v1956_v31, 2147483647 }
 0x1a7   : > { %vm3633_vm8 = vcmp.le.f32.partialorder %v7879_v48, %v3625_v42  ;;  %v8459_v42 = vcvt.s32.f32 %v2020_v35 }
 0x1a8   : > { %v3641_v32 = vsel %vm3633_vm8, %v7370_v40, 16  ;;  %v8438_v37 = vcvt.s32.f32 %v3719_v11  ;;  %v2050_v11 = vshra.s32 %v8444_v39, 16 }
 0x1a9   : > { %v8447_v52 = vsel %vm753_vm14, %v3641_v32, 2147483647  ;;  %v8463_v32 = vsel %vm753_vm14, %v2474_v63, 2147483647 }
 0x1aa   : > { %10895 = vst [vmem:[#allocation17_spill] sm:$0xff] %v8438_v37  ;;  %10896 = vst [vmem:[#allocation59_spill] sm:$0xff] %v8447_v52  ;;  %3722 = vmin.xlane.f32.xlu1 %v8438_v37  ;;  %v4243_v33 = vpop.xlane.xlu1 %4242  ;;  %1993 = vmin.xlane.f32.xlu0 %v8440_v18  ;;  %v3749_v48 = vshra.s32 %v8447_v52, 16  ;;  %v8465_v37 = vpop.xlane.xlu0 %3091 }
 0x1ab   : > { %vm4263_vm10 = vcmp.le.f32.partialorder %v7903_v58, %v4243_v33  ;;  %v8480_v33 = vcvt.s32.f32 %v2050_v11  ;;  %vm3106_vm6 = vcmp.le.f32.partialorder %v7793_v41, %v8465_v37 }
 0x1ac   : > { %v4271_v31 = vsel %vm4263_vm10, %v7370_v40, 16  ;;  %v8457_v13 = vcvt.s32.f32 %v3749_v48  ;;  %v2484_v48 = vshra.s32 %v8463_v32, 16 }
 0x1ad   : > { %v8468_v52 = vsel %vm753_vm14, %v4271_v31, 2147483647  ;;  %v8484_v31 = vsel %vm753_vm14, %v2476_v34, 2147483647 }
 0x1ae   : > { %10897 = vst [vmem:[#allocation60_spill] sm:$0xff] %v8457_v13  ;;  %10898 = vst [vmem:[#allocation61_spill] sm:$0xff] %v8468_v52  ;;  %3752 = vmin.xlane.f32.xlu1 %v8457_v13  ;;  %v4249_v58 = vpop.xlane.xlu1 %4248  ;;  %2023 = vmin.xlane.f32.xlu0 %v8459_v42  ;;  %v4295_v19 = vshra.s32 %v8468_v52, 16  ;;  %v2478_v52 = vsel %vm2470_vm11, %v7370_v40, 16  ;;  %v8495_v29 = vpop.xlane.xlu0 %3097 }
 0x1af   : > { %vm4265_vm12 = vcmp.le.f32.partialorder %v7922_v24, %v4249_v58  ;;  %v8501_v58 = vcvt.s32.f32 %v2484_v48  ;;  %vm3108_vm0 = vcmp.le.f32.partialorder %v7819_v51, %v8495_v29 }
 0x1b0   : > { %v4273_v35 = vsel %vm4265_vm12, %v7370_v40, 16  ;;  %v8478_v63 = vcvt.s32.f32 %v4295_v19  ;;  %v2514_v19 = vshra.s32 %v8484_v31, 16 }
 0x1b1   : > { %v8487_v13 = vsel %vm753_vm14, %v4273_v35, 2147483647  ;;  %v8505_v35 = vsel %vm753_vm14, %v2478_v52, 2147483647 }
 0x1b2   : > { %10899 = vst [vmem:[#allocation62_spill] sm:$0xff] %v8478_v63  ;;  %10900 = vst [vmem:[#allocation63_spill] sm:$0xff] %v8487_v13  ;;  %4298 = vmin.xlane.f32.xlu1 %v8478_v63  ;;  %v4255_v62 = vpop.xlane.xlu1 %4254  ;;  %2053 = vmin.xlane.f32.xlu0 %v8480_v33  ;;  %v4325_v24 = vshra.s32 %v8487_v13, 16 }
 0x1b3   : > { %vm4267_vm15 = vcmp.le.f32.partialorder %v7947_v3, %v4255_v62  ;;  %v8520_v62 = vcvt.s32.f32 %v2514_v19 }
 0x1b4   : > { %v4275_v11 = vsel %vm4267_vm15, %v7370_v40, 16  ;;  %v8499_v34 = vcvt.s32.f32 %v4325_v24  ;;  %v2544_v24 = vshra.s32 %v8505_v35, 16 }
 0x1b5   : > { %v8508_v13 = vsel %vm753_vm14, %v4275_v11, 2147483647  ;;  %v8524_v11 = vsel %vm753_vm14, %v2480_v25, 2147483647 }
 0x1b6   : > { %10901 = vst [vmem:[#allocation64_spill] sm:$0xff] %v8499_v34  ;;  %10902 = vst [vmem:[#allocation65_spill] sm:$0xff] %v8508_v13  ;;  %4328 = vmin.xlane.f32.xlu1 %v8499_v34  ;;  %v4261_v7 = vpop.xlane.xlu1 %4260  ;;  %2487 = vmin.xlane.f32.xlu0 %v8501_v58  ;;  %v4355_v3 = vshra.s32 %v8508_v13, 16  ;;  %v3604_v34 = vpop.xlane.xlu0 %3603  ;;  %v3110_v13 = vsel %vm3102_vm2, %v7370_v40, 16  ;;  %v8539_v25 = vcvt.s32.f32 %v2544_v24 }
 0x1b7   : > { %vm4269_vm3 = vcmp.le.f32.partialorder %v7951_v49, %v4261_v7  ;;  %v2574_v7 = vshra.s32 %v8524_v11, 16  ;;  %vm3626_vm8 = vcmp.le.f32.partialorder %v7831_v45, %v3604_v34 }
 0x1b8   : > { %v4277_v52 = vsel %vm4269_vm3, %v7370_v40, 16  ;;  %v8518_v48 = vcvt.s32.f32 %v4355_v3  ;;  %v8543_v3 = vsel %vm753_vm14, %v3110_v13, 2147483647 }
 0x1b9   : > { %v8527_v63 = vsel %vm753_vm14, %v4277_v52, 2147483647 }
 0x1ba   : > { %10903 = vst [vmem:[#allocation66_spill] sm:$0xff] %v8527_v63  ;;  %4358 = vmin.xlane.f32.xlu1 %v8518_v48  ;;  %v4767_v49 = vpop.xlane.xlu1 %4766  ;;  %2517 = vmin.xlane.f32.xlu0 %v8520_v62  ;;  %v4385_v22 = vshra.s32 %v8527_v63, 16  ;;  %v3112_v63 = vsel %vm3104_vm4, %v7370_v40, 16  ;;  %v3610_v36 = vpop.xlane.xlu0 %3609 }
 0x1bb   : > { %vm4787_vm5 = vcmp.le.f32.partialorder %v7959_v23, %v4767_v49  ;;  %v8558_v49 = vcvt.s32.f32 %v2574_v7  ;;  %vm3628_vm10 = vcmp.le.f32.partialorder %v7859_v5, %v3610_v36 }
 0x1bc   : > { %v4795_v17 = vsel %vm4787_vm5, %v7370_v40, 16  ;;  %v8537_v19 = vcvt.s32.f32 %v4385_v22  ;;  %v3120_v22 = vshra.s32 %v8543_v3, 16 }
 0x1bd   : > { %v8546_v52 = vsel %vm753_vm14, %v4795_v17, 2147483647  ;;  %v8562_v17 = vsel %vm753_vm14, %v3112_v63, 2147483647 }
 0x1be   : > { %10904 = vst [vmem:[#allocation67_spill] sm:$0xff] %v8537_v19  ;;  %10905 = vst [vmem:[#allocation68_spill] sm:$0xff] %v8546_v52  ;;  %4388 = vmin.xlane.f32.xlu1 %v8537_v19  ;;  %v4773_v2 = vpop.xlane.xlu1 %4772  ;;  %2547 = vmin.xlane.f32.xlu0 %v8539_v25  ;;  %v4819_v23 = vshra.s32 %v8546_v52, 16  ;;  %v3114_v52 = vsel %vm3106_vm6, %v7370_v40, 16  ;;  %v8577_v7 = vcvt.s32.f32 %v3120_v22 }
 0x1bf   : > { %vm4789_vm1 = vcmp.le.f32.partialorder %v7973_v44, %v4773_v2  ;;  %v3150_v2 = vshra.s32 %v8562_v17, 16 }
 0x1c0   : > { %v4797_v13 = vsel %vm4789_vm1, %v7370_v40, 16  ;;  %v8556_v24 = vcvt.s32.f32 %v4819_v23  ;;  %v8581_v23 = vsel %vm753_vm14, %v3114_v52, 2147483647 }
 0x1c1   : > { %v8565_v19 = vsel %vm753_vm14, %v4797_v13, 2147483647  ;;  %v3616_v13 = vpop.xlane.xlu0 %3615  ;;  %v8595_v22 = vcvt.s32.f32 %v3150_v2 }
 0x1c2   : > { %10906 = vst [vmem:[#allocation69_spill] sm:$0xff] %v8556_v24  ;;  %10907 = vst [vmem:[#allocation70_spill] sm:$0xff] %v8565_v19  ;;  %4822 = vmin.xlane.f32.xlu1 %v8556_v24  ;;  %v4779_v41 = vpop.xlane.xlu1 %4778  ;;  %2577 = vmin.xlane.f32.xlu0 %v8558_v49  ;;  %v4849_v44 = vshra.s32 %v8565_v19, 16  ;;  %v3116_v19 = vsel %vm3108_vm0, %v7370_v40, 16  ;;  %vm3630_vm11 = vcmp.le.f32.partialorder %v7875_v38, %v3616_v13 }
 0x1c3   : > { %vm4791_vm7 = vcmp.le.f32.partialorder %v7982_v57, %v4779_v41  ;;  %v3180_v41 = vshra.s32 %v8581_v23, 16 }
 0x1c4   : > { %v4799_v37 = vsel %vm4791_vm7, %v7370_v40, 16  ;;  %v8575_v63 = vcvt.s32.f32 %v4849_v44  ;;  %v8599_v44 = vsel %vm753_vm14, %v3116_v19, 2147483647 }
 0x1c5   : > { %v8584_v24 = vsel %vm753_vm14, %v4799_v37, 2147483647  ;;  %v8611_v2 = vcvt.s32.f32 %v3180_v41  ;;  %v3210_v19 = vshra.s32 %v8599_v44, 16 }
 0x1c6   : > { %10908 = vst [vmem:[#allocation71_spill] sm:$0xff] %v8575_v63  ;;  %10909 = vst [vmem:[#allocation72_spill] sm:$0xff] %v8584_v24  ;;  %4852 = vmin.xlane.f32.xlu1 %v8575_v63  ;;  %v4785_v51 = vpop.xlane.xlu1 %4784  ;;  %3123 = vmin.xlane.f32.xlu0 %v8577_v7  ;;  %v4879_v57 = vshra.s32 %v8584_v24, 16  ;;  %v3634_v24 = vsel %vm3626_vm8, %v7370_v40, 16 }
 0x1c7   : > { %vm4793_vm9 = vcmp.le.f32.partialorder %v7989_v20, %v4785_v51  ;;  %v3622_v20 = vpop.xlane.xlu0 %3621  ;;  %v8615_v51 = vsel %vm753_vm14, %v3634_v24, 2147483647 }
 0x1c8   : > { %v4801_v29 = vsel %vm4793_vm9, %v7370_v40, 16  ;;  %v8593_v52 = vcvt.s32.f32 %v4879_v57  ;;  %v3636_v57 = vsel %vm3628_vm10, %v7370_v40, 16  ;;  %v3644_v5 = vshra.s32 %v8615_v51, 16 }
 0x1c9   : > { %v8602_v37 = vsel %vm753_vm14, %v4801_v29, 2147483647  ;;  %v8621_v29 = vcvt.s32.f32 %v3210_v19  ;;  %v8625_v36 = vsel %vm753_vm14, %v3636_v57, 2147483647  ;;  %vm3632_vm12 = vcmp.le.f32.partialorder %v7899_v53, %v3622_v20 }
 0x1ca   : > { %10910 = vst [vmem:[#allocation73_spill] sm:$0xff] %v8593_v52  ;;  %10911 = vst [vmem:[#allocation74_spill] sm:$0xff] %v8602_v37  ;;  %4882 = vmin.xlane.f32.xlu1 %v8593_v52  ;;  %3153 = vmin.xlane.f32.xlu0 %v8595_v22  ;;  %v4909_v45 = vshra.s32 %v8602_v37, 16  ;;  %v8630_v24 = vcvt.s32.f32 %v3644_v5  ;;  %v3640_v13 = vsel %vm3632_vm12, %v7370_v40, 16  ;;  %v795_v57 = vand.u32 65535, %v8099_v0  ;;  %v10919_v0 = vld [vmem:[#allocation23_spill] sm:$0xff] }
 0x1cb   : > { %10913 = vst [vmem:[#allocation76_spill] sm:$0xff] %v8625_v36  ;;  %v4240_v41 = vpop.xlane.xlu0 %4239  ;;  %v8644_v20 = vsel %vm753_vm14, %v3640_v13, 2147483647 }
 0x1cc   : > { %v8609_v34 = vcvt.s32.f32 %v4909_v45  ;;  %v3638_v45 = vsel %vm3630_vm11, %v7370_v40, 16  ;;  %vm4262_vm13 = vcmp.le.f32.partialorder %v7918_v12, %v4240_v41  ;;  %10916 = vst [vmem:[#allocation79_spill] sm:$0xff] %v8644_v20  ;;  %v797_v52 = vcvt.s32.f32 %v795_v57  ;;  %v10917_v12 = vld [vmem:[#allocation22_spill] sm:$0xff]  ;;  %v10921_v57 = vld [vmem:[#allocation24_spill] sm:$0xff] }
 0x1cd   : > { %v8634_v38 = vsel %vm753_vm14, %v3638_v45, 2147483647  ;;  %v4270_v5 = vsel %vm4262_vm13, %v7370_v40, 16  ;;  %v810_v41 = vand.u32 65535, %v10917_v12 }
 0x1ce   : > { %10912 = vst [vmem:[#allocation75_spill] sm:$0xff] %v8609_v34  ;;  %4912 = vmin.xlane.f32.xlu1 %v8609_v34  ;;  %3183 = vmin.xlane.f32.xlu0 %v8611_v2  ;;  %v3674_v34 = vshra.s32 %v8625_v36, 16  ;;  %10914 = vst [vmem:[#allocation77_spill] sm:$0xff] %v8634_v38  ;;  %v3704_v53 = vshra.s32 %v8634_v38, 16  ;;  %v8658_v13 = vsel %vm753_vm14, %v4270_v5, 2147483647 }
 0x1cf   : > { %v4246_v19 = vpop.xlane.xlu0 %4245  ;;  %10920 = vst [vmem:[#allocation23_spill] sm:$0xff] %v8658_v13 }
 0x1d0   : > { %v8640_v37 = vcvt.s32.f32 %v3674_v34  ;;  %vm4264_vm15 = vcmp.le.f32.partialorder %v7938_v60, %v4246_v19  ;;  %v8652_v63 = vcvt.s32.f32 %v3704_v53  ;;  %v3734_v34 = vshra.s32 %v8644_v20, 16 }
 0x1d1   : > { %v812_v19 = vcvt.s32.f32 %v810_v41  ;;  %v825_v53 = vand.u32 65535, %v10921_v57  ;;  %v4280_v20 = vshra.s32 %v8658_v13, 16  ;;  %v10926_v41 = vld [vmem:[#allocation26_spill] sm:$0xff] }
 0x1d2   : > { %3213 = vmin.xlane.f32.xlu0 %v8621_v29  ;;  %10915 = vst [vmem:[#allocation78_spill] sm:$0xff] %v8640_v37  ;;  %10918 = vst [vmem:[#allocation22_spill] sm:$0xff] %v8652_v63  ;;  %v8665_v12 = vcvt.s32.f32 %v3734_v34  ;;  %v840_v36 = vand.u32 65535, %v10926_v41  ;;  %v10928_v34 = vld [vmem:[#allocation27_spill] sm:$0xff] }
 0x1d3   : > { %v8677_v57 = vcvt.s32.f32 %v4280_v20 }
 0x1d4   : > { %10922 = vst [vmem:[#allocation24_spill] sm:$0xff] %v8665_v12 }
 0x1d5   : > { %10927 = vst [vmem:[#allocation26_spill] sm:$0xff] %v8677_v57 }
 0x1d6   : > { %3647 = vmin.xlane.f32.xlu0 %v8630_v24 }
 0x1da   : > { %3677 = vmin.xlane.f32.xlu0 %v8640_v37  ;;  %v4272_v37 = vsel %vm4264_vm15, %v7370_v40, 16 }
 0x1db   : > { %v8649_v45 = vpop.xlane.xlu0 %799  ;;  %v8671_v5 = vsel %vm753_vm14, %v4272_v37, 2147483647 }
 0x1dc   : > { %vm801_vm2 = vcmp.eq.f32.partialorder %v10919_v0, %v8649_v45  ;;  %v10923_v0 = vld [vmem:[#allocation25_spill] sm:$0xff] }
 0x1dd   : > { %v802_v38 = vsel %vm801_vm2, %v797_v52, inf  ;;  %10924 = vst [vmem:[#allocation25_spill] sm:$0xff] %v8671_v5 }
 0x1de   : > { %3707 = vmin.xlane.f32.xlu0 %v8652_v63  ;;  %803 = vmin.xlane.f32.xlu1 %v802_v38  ;;  %v827_v63 = vcvt.s32.f32 %v825_v53  ;;  %v10929_v53 = vld [vmem:[#allocation28_spill] sm:$0xff] }
 0x1df   : > { %v8662_v60 = vpop.xlane.xlu0 %814 }
 0x1e0   : > { %vm816_vm3 = vcmp.eq.f32.partialorder %v10923_v0, %v8662_v60  ;;  %v4310_v0 = vshra.s32 %v8671_v5, 16 }
 0x1e1   : > { %v817_v52 = vsel %vm816_vm3, %v812_v19, inf  ;;  %v842_v19 = vcvt.s32.f32 %v840_v36 }
 0x1e2   : > { %3737 = vmin.xlane.f32.xlu0 %v8665_v12  ;;  %818 = vmin.xlane.f32.xlu1 %v817_v52  ;;  %v855_v52 = vand.u32 65535, %v8130_v9  ;;  %v8686_v12 = vcvt.s32.f32 %v4310_v0 }
 0x1e3   : > { %v8674_v38 = vpop.xlane.xlu0 %829 }
 0x1e4   : > { %10925 = vst [vmem:[#allocation80_spill] sm:$0xff] %v8674_v38  ;;  %vm831_vm4 = vcmp.eq.f32.partialorder %v10928_v34, %v8674_v38  ;;  %v10930_v34 = vld [vmem:[#allocation29_spill] sm:$0xff] }
 0x1e5   : > { %v832_v13 = vsel %vm831_vm4, %v827_v63, inf  ;;  %v857_v63 = vcvt.s32.f32 %v855_v52  ;;  %v870_v5 = vand.u32 65535, %v10930_v34  ;;  %v10934_v34 = vld [vmem:[#allocation32_spill] sm:$0xff] }
 0x1e6   : > { %4283 = vmin.xlane.f32.xlu0 %v8677_v57  ;;  %833 = vmin.xlane.f32.xlu1 %v832_v13  ;;  %v10931_v13 = vld [vmem:[#allocation30_spill] sm:$0xff]  ;;  %v10932_v57 = vld [vmem:[#allocation31_spill] sm:$0xff] }
 0x1e7   : > { %v8683_v37 = vpop.xlane.xlu0 %844  ;;  %v872_v0 = vcvt.s32.f32 %v870_v5  ;;  %v885_v38 = vand.u32 65535, %v10932_v57 }
 0x1e8   : > { %vm846_vm5 = vcmp.eq.f32.partialorder %v10929_v53, %v8683_v37 }
 0x1e9   : > { %v847_v20 = vsel %vm846_vm5, %v842_v19, inf  ;;  %v887_v52 = vcvt.s32.f32 %v885_v38 }
 0x1ea   : > { %4313 = vmin.xlane.f32.xlu0 %v8686_v12  ;;  %848 = vmin.xlane.f32.xlu1 %v847_v20  ;;  %v900_v20 = vand.u32 65535, %v8159_v30 }
 0x1eb   : > { %v8691_v41 = vpop.xlane.xlu0 %859 }
 0x1ec   : > { %vm861_vm6 = vcmp.eq.f32.partialorder %v10931_v13, %v8691_v41  ;;  %v902_v57 = vcvt.s32.f32 %v900_v20 }
 0x1ed   : > { %v862_v36 = vsel %vm861_vm6, %v857_v63, inf }
 0x1ee   : > { %863 = vmin.xlane.f32.xlu1 %v862_v36  ;;  %v1319_v36 = vand.u32 65535, %v8170_v46 }
 0x1ef   : > { %v8696_v9 = vpop.xlane.xlu0 %874 }
 0x1f0   : > { %vm876_vm1 = vcmp.eq.f32.partialorder %v8155_v43, %v8696_v9  ;;  %v10937_v43 = vld [vmem:[#allocation35_spill] sm:$0xff] }
 0x1f1   : > { %v877_v19 = vsel %vm876_vm1, %v872_v0, inf }
 0x1f2   : > { %878 = vmin.xlane.f32.xlu1 %v877_v19  ;;  %v1321_v19 = vcvt.s32.f32 %v1319_v36 }
 0x1f3   : > { %v8701_v53 = vpop.xlane.xlu0 %889 }
 0x1f4   : > { %10933 = vst [vmem:[#allocation27_spill] sm:$0xff] %v8701_v53  ;;  %vm891_vm0 = vcmp.eq.f32.partialorder %v10934_v34, %v8701_v53  ;;  %v10940_v34 = vld [vmem:[#allocation36_spill] sm:$0xff] }
 0x1f5   : > { %v892_v63 = vsel %vm891_vm0, %v887_v52, inf  ;;  %v1334_v52 = vand.u32 65535, %v10940_v34 }
 0x1f6   : > { %893 = vmin.xlane.f32.xlu1 %v892_v63 }
 0x1f7   : > { %v8706_v13 = vpop.xlane.xlu1 %1428  ;;  %v8708_v5 = vpop.xlane.xlu0 %904  ;;  %v1336_v53 = vcvt.s32.f32 %v1334_v52 }
 0x1f8   : > { %10935 = vst [vmem:[#allocation28_spill] sm:$0xff] %v8706_v13  ;;  %10936 = vst [vmem:[#allocation29_spill] sm:$0xff] %v8708_v5  ;;  %vm906_vm7 = vcmp.eq.f32.partialorder %v10937_v43, %v8708_v5  ;;  %v10943_v43 = vld [vmem:[#allocation38_spill] sm:$0xff] }
 0x1f9   : > { %v907_v0 = vsel %vm906_vm7, %v902_v57, inf  ;;  %v1349_v57 = vand.u32 65535, %v10943_v43 }
 0x1fa   : > { %908 = vmin.xlane.f32.xlu1 %v907_v0 }
 0x1fb   : > { %v8713_v38 = vpop.xlane.xlu1 %1978  ;;  %v8715_v30 = vpop.xlane.xlu0 %1323  ;;  %v1351_v5 = vcvt.s32.f32 %v1349_v57 }
 0x1fc   : > { %10938 = vst [vmem:[#allocation30_spill] sm:$0xff] %v8713_v38  ;;  %10939 = vst [vmem:[#allocation31_spill] sm:$0xff] %v8715_v30  ;;  %vm1325_vm8 = vcmp.eq.f32.partialorder %v8203_v59, %v8715_v30  ;;  %v10945_v59 = vld [vmem:[#allocation9_spill] sm:$0xff] }
 0x1fd   : > { %v1326_v63 = vsel %vm1325_vm8, %v1321_v19, inf  ;;  %v1364_v19 = vand.u32 65535, %v10945_v59 }
 0x1fe   : > { %1327 = vmin.xlane.f32.xlu1 %v1326_v63 }
 0x1ff   : > { %v8720_v20 = vpop.xlane.xlu1 %2008  ;;  %v8722_v46 = vpop.xlane.xlu0 %1338  ;;  %v1366_v30 = vcvt.s32.f32 %v1364_v19 }
 0x200   : > { %10941 = vst [vmem:[#allocation32_spill] sm:$0xff] %v8720_v20  ;;  %10942 = vst [vmem:[#allocation35_spill] sm:$0xff] %v8722_v46  ;;  %vm1340_vm9 = vcmp.eq.f32.partialorder %v8223_v27, %v8722_v46  ;;  %v1379_v27 = vand.u32 65535, %v8248_v14 }
 0x201   : > { %v1341_v0 = vsel %vm1340_vm9, %v1336_v53, inf  ;;  %v10948_v53 = vld [vmem:[#allocation42_spill] sm:$0xff] }
 0x202   : > { %1342 = vmin.xlane.f32.xlu1 %v1341_v0  ;;  %v1381_v46 = vcvt.s32.f32 %v1379_v27  ;;  %v10953_v27 = vld [vmem:[#allocation34_spill] sm:$0xff] }
 0x203   : > { %v8727_v36 = vpop.xlane.xlu1 %2038  ;;  %v8729_v34 = vpop.xlane.xlu0 %1353  ;;  %vm1430_vm15 = vcmp.eq.f32.partialorder %v10953_v27, %v8706_v13  ;;  %v10957_v13 = vld [vmem:[#allocation39_spill] sm:$0xff] }
 0x204   : > { %10944 = vst [vmem:[#allocation36_spill] sm:$0xff] %v8727_v36  ;;  %vm1355_vm10 = vcmp.eq.f32.partialorder %v8244_v55, %v8729_v34  ;;  %v1394_v55 = vand.u32 65535, %v8265_v28 }
 0x205   : > { %v1356_v63 = vsel %vm1355_vm10, %v1351_v5, inf }
 0x206   : > { %1357 = vmin.xlane.f32.xlu1 %v1356_v63  ;;  %v1396_v63 = vcvt.s32.f32 %v1394_v55 }
 0x207   : > { %v8734_v52 = vpop.xlane.xlu1 %2068  ;;  %v8736_v43 = vpop.xlane.xlu0 %1368 }
 0x208   : > { %10946 = vst [vmem:[#allocation38_spill] sm:$0xff] %v8734_v52  ;;  %10947 = vst [vmem:[#allocation9_spill] sm:$0xff] %v8736_v43  ;;  %vm1370_vm11 = vcmp.eq.f32.partialorder %v10948_v53, %v8736_v43  ;;  %v10952_v53 = vld [vmem:[#allocation33_spill] sm:$0xff] }
 0x209   : > { %v1371_v0 = vsel %vm1370_vm11, %v1366_v30, inf  ;;  %v1424_v30 = vand.u32 65535, %v10952_v53 }
 0x20a   : > { %1372 = vmin.xlane.f32.xlu1 %v1371_v0 }
 0x20b   : > { %v8741_v57 = vpop.xlane.xlu1 %2502  ;;  %v8743_v59 = vpop.xlane.xlu0 %1383 }
 0x20c   : > { %10949 = vst [vmem:[#allocation42_spill] sm:$0xff] %v8741_v57  ;;  %10950 = vst [vmem:[#allocation81_spill] sm:$0xff] %v8743_v59  ;;  %vm1385_vm12 = vcmp.eq.f32.partialorder %v8279_v47, %v8743_v59 }
 0x20d   : > { %v1386_v5 = vsel %vm1385_vm12, %v1381_v46, inf  ;;  %v1426_v46 = vcvt.s32.f32 %v1424_v30 }
 0x20e   : > { %1387 = vmin.xlane.f32.xlu1 %v1386_v5  ;;  %v10955_v5 = vld [vmem:[#allocation37_spill] sm:$0xff] }
 0x20f   : > { %v8748_v19 = vpop.xlane.xlu1 %2532  ;;  %v8750_v14 = vpop.xlane.xlu0 %1398  ;;  %v1974_v59 = vand.u32 65535, %v10955_v5  ;;  %v1431_v43 = vsel %vm1430_vm15, %v1426_v46, inf  ;;  %v2004_v5 = vand.u32 65535, %v10957_v13 }
 0x210   : > { %10951 = vst [vmem:[#allocation82_spill] sm:$0xff] %v8748_v19  ;;  %vm1400_vm13 = vcmp.eq.f32.partialorder %v8294_v6, %v8750_v14  ;;  %v10956_v6 = vld [vmem:[#allocation7_spill] sm:$0xff] }
 0x211   : > { %v1401_v0 = vsel %vm1400_vm13, %v1396_v63, inf  ;;  %vm1980_vm3 = vcmp.eq.f32.partialorder %v10956_v6, %v8713_v38  ;;  %v1976_v27 = vcvt.s32.f32 %v1974_v59  ;;  %v2006_v13 = vcvt.s32.f32 %v2004_v5 }
 0x212   : > { %1402 = vmin.xlane.f32.xlu1 %v1401_v0 }
 0x213   : > { %v8757_v28 = vpop.xlane.xlu1 %2562  ;;  %v4252_v47 = vpop.xlane.xlu0 %4251 }
 0x214   : > { %10954 = vst [vmem:[#allocation33_spill] sm:$0xff] %v8757_v28  ;;  %vm4266_vm2 = vcmp.le.f32.partialorder %v7993_v10, %v4252_v47  ;;  %v1981_v47 = vsel %vm1980_vm3, %v1976_v27, inf }
 0x215   : > { %v4274_v55 = vsel %vm4266_vm2, %v7370_v40, 16 }
 0x216   : > { %v8763_v53 = vsel %vm753_vm14, %v4274_v55, 2147483647  ;;  %1432 = vmin.xlane.f32.xlu1 %v1431_v43  ;;  %v10959_v55 = vld [vmem:[#allocation4_spill] sm:$0xff] }
 0x217   : > { %v8767_v63 = vpop.xlane.xlu1 %2592  ;;  %v4258_v0 = vpop.xlane.xlu0 %4257  ;;  %v4340_v30 = vshra.s32 %v8763_v53, 16  ;;  %vm2010_vm5 = vcmp.eq.f32.partialorder %v10959_v55, %v8720_v20  ;;  %v10962_v55 = vld [vmem:[#allocation3_spill] sm:$0xff] }
 0x218   : > { %vm4268_vm4 = vcmp.le.f32.partialorder %v8001_v15, %v4258_v0  ;;  %v10960_v0 = vld [vmem:[#allocation40_spill] sm:$0xff]  ;;  %vm2040_vm1 = vcmp.eq.f32.partialorder %v10962_v55, %v8727_v36  ;;  %v10965_v55 = vld [vmem:[#allocation41_spill] sm:$0xff] }
 0x219   : > { %v4276_v10 = vsel %vm4268_vm4, %v7370_v40, 16  ;;  %v8773_v46 = vcvt.s32.f32 %v4340_v30  ;;  %v2034_v38 = vand.u32 65535, %v10960_v0  ;;  %v2011_v30 = vsel %vm2010_vm5, %v2006_v13, inf }
 0x21a   : > { %v8776_v43 = vsel %vm753_vm14, %v4276_v10, 2147483647  ;;  %1982 = vmin.xlane.f32.xlu1 %v1981_v47  ;;  %vm2070_vm7 = vcmp.eq.f32.partialorder %v10965_v55, %v8734_v52  ;;  %v10969_v55 = vld [vmem:[#allocation44_spill] sm:$0xff] }
 0x21b   : > { %10958 = vst [vmem:[#allocation34_spill] sm:$0xff] %v8773_v46  ;;  %v8780_v6 = vpop.xlane.xlu1 %3138  ;;  %4343 = vmin.xlane.f32.xlu0 %v8773_v46  ;;  %v4764_v59 = vpop.xlane.xlu0 %4763  ;;  %v4370_v15 = vshra.s32 %v8776_v43, 16  ;;  %v2036_v0 = vcvt.s32.f32 %v2034_v38  ;;  %vm2504_vm9 = vcmp.eq.f32.partialorder %v10969_v55, %v8741_v57  ;;  %v10972_v55 = vld [vmem:[#allocation46_spill] sm:$0xff] }
 0x21c   : > { %vm4786_vm6 = vcmp.le.f32.partialorder %v8008_v1, %v4764_v59  ;;  %v10963_v59 = vld [vmem:[#allocation12_spill] sm:$0xff]  ;;  %vm2534_vm11 = vcmp.eq.f32.partialorder %v10972_v55, %v8748_v19 }
 0x21d   : > { %v4794_v27 = vsel %vm4786_vm6, %v7370_v40, 16  ;;  %v8787_v10 = vcvt.s32.f32 %v4370_v15  ;;  %v2064_v46 = vand.u32 65535, %v10963_v59  ;;  %v2041_v15 = vsel %vm2040_vm1, %v2036_v0, inf }
 0x21e   : > { %v8790_v47 = vsel %vm753_vm14, %v4794_v27, 2147483647  ;;  %2012 = vmin.xlane.f32.xlu1 %v2011_v30 }
 0x21f   : > { %10961 = vst [vmem:[#allocation37_spill] sm:$0xff] %v8787_v10  ;;  %v8794_v20 = vpop.xlane.xlu1 %3168  ;;  %4373 = vmin.xlane.f32.xlu0 %v8787_v10  ;;  %v4770_v5 = vpop.xlane.xlu0 %4769  ;;  %v4804_v1 = vshra.s32 %v8790_v47, 16  ;;  %v2066_v59 = vcvt.s32.f32 %v2064_v46 }
 0x220   : > { %vm4788_vm0 = vcmp.le.f32.partialorder %v8018_v16, %v4770_v5  ;;  %v10967_v5 = vld [vmem:[#allocation43_spill] sm:$0xff] }
 0x221   : > { %v4796_v13 = vsel %vm4788_vm0, %v7370_v40, 16  ;;  %v8801_v27 = vcvt.s32.f32 %v4804_v1  ;;  %v2498_v10 = vand.u32 65535, %v10967_v5  ;;  %v2071_v1 = vsel %vm2070_vm7, %v2066_v59, inf }
 0x222   : > { %v8804_v30 = vsel %vm753_vm14, %v4796_v13, 2147483647  ;;  %2042 = vmin.xlane.f32.xlu1 %v2041_v15 }
 0x223   : > { %10964 = vst [vmem:[#allocation7_spill] sm:$0xff] %v8801_v27  ;;  %v8808_v36 = vpop.xlane.xlu1 %3198  ;;  %4807 = vmin.xlane.f32.xlu0 %v8801_v27  ;;  %v4776_v38 = vpop.xlane.xlu0 %4775  ;;  %v4834_v16 = vshra.s32 %v8804_v30, 16  ;;  %v2500_v5 = vcvt.s32.f32 %v2498_v10 }
 0x224   : > { %10966 = vst [vmem:[#allocation39_spill] sm:$0xff] %v8808_v36  ;;  %vm4790_vm8 = vcmp.le.f32.partialorder %v8022_v54, %v4776_v38  ;;  %v10970_v38 = vld [vmem:[#allocation45_spill] sm:$0xff] }
 0x225   : > { %v4798_v0 = vsel %vm4790_vm8, %v7370_v40, 16  ;;  %v8815_v13 = vcvt.s32.f32 %v4834_v16  ;;  %v2528_v27 = vand.u32 65535, %v10970_v38  ;;  %v2505_v16 = vsel %vm2504_vm9, %v2500_v5, inf }
 0x226   : > { %v8818_v15 = vsel %vm753_vm14, %v4798_v0, 2147483647  ;;  %2072 = vmin.xlane.f32.xlu1 %v2071_v1 }
 0x227   : > { %10968 = vst [vmem:[#allocation4_spill] sm:$0xff] %v8815_v13  ;;  %v8822_v52 = vpop.xlane.xlu1 %3228  ;;  %4837 = vmin.xlane.f32.xlu0 %v8815_v13  ;;  %v4782_v46 = vpop.xlane.xlu0 %4781  ;;  %v4864_v54 = vshra.s32 %v8818_v15, 16  ;;  %v2530_v38 = vcvt.s32.f32 %v2528_v27 }
 0x228   : > { %vm4792_vm10 = vcmp.le.f32.partialorder %v8032_v21, %v4782_v46  ;;  %v10973_v46 = vld [vmem:[#allocation47_spill] sm:$0xff] }
 0x229   : > { %v4800_v59 = vsel %vm4792_vm10, %v7370_v40, 16  ;;  %v8829_v0 = vcvt.s32.f32 %v4864_v54  ;;  %v2558_v5 = vand.u32 65535, %v10973_v46  ;;  %v1409_v54 = vand.u32 65535, %v8362_v50  ;;  %v10976_v46 = vld [vmem:[#allocation49_spill] sm:$0xff] }
 0x22a   : > { %v8832_v1 = vsel %vm753_vm14, %v4800_v59, 2147483647  ;;  %2506 = vmin.xlane.f32.xlu1 %v2505_v16  ;;  %v2535_v13 = vsel %vm2534_vm11, %v2530_v38, inf  ;;  %v10975_v16 = vld [vmem:[#allocation48_spill] sm:$0xff]  ;;  %v1959_v38 = vand.u32 65535, %v8382_v8  ;;  %v1989_v8 = vand.u32 65535, %v8402_v56 }
 0x22b   : > { %10971 = vst [vmem:[#allocation40_spill] sm:$0xff] %v8829_v0  ;;  %v8836_v57 = vpop.xlane.xlu1 %3662  ;;  %4867 = vmin.xlane.f32.xlu0 %v8829_v0  ;;  %v8839_v10 = vpop.xlane.xlu0 %1413  ;;  %v4894_v21 = vshra.s32 %v8832_v1, 16  ;;  %vm2564_vm12 = vcmp.eq.f32.partialorder %v10975_v16, %v8757_v28  ;;  %v2560_v27 = vcvt.s32.f32 %v2558_v5  ;;  %v2588_v0 = vand.u32 65535, %v10976_v46  ;;  %v10977_v16 = vld [vmem:[#allocation50_spill] sm:$0xff] }
 0x22c   : > { %vm1415_vm13 = vcmp.eq.f32.partialorder %v8398_v61, %v8839_v10  ;;  %v1411_v50 = vcvt.s32.f32 %v1409_v54  ;;  %vm2594_vm15 = vcmp.eq.f32.partialorder %v10977_v16, %v8767_v63  ;;  %v10978_v61 = vld [vmem:[#allocation51_spill] sm:$0xff]  ;;  %v1961_v54 = vcvt.s32.f32 %v1959_v38 }
 0x22d   : > { %v8844_v59 = vcvt.s32.f32 %v4894_v21  ;;  %v2565_v21 = vsel %vm2564_vm12, %v2560_v27, inf  ;;  %v2590_v5 = vcvt.s32.f32 %v2588_v0  ;;  %v3134_v46 = vand.u32 65535, %v10978_v61 }
 0x22e   : > { %2536 = vmin.xlane.f32.xlu1 %v2535_v13  ;;  %v1416_v13 = vsel %vm1415_vm13, %v1411_v50, inf  ;;  %v1991_v38 = vcvt.s32.f32 %v1989_v8  ;;  %v2019_v56 = vand.u32 65535, %v8423_v26  ;;  %v2049_v26 = vand.u32 65535, %v8444_v39 }
 0x22f   : > { %10974 = vst [vmem:[#allocation3_spill] sm:$0xff] %v8844_v59  ;;  %v8848_v55 = vpop.xlane.xlu1 %3692  ;;  %4897 = vmin.xlane.f32.xlu0 %v8844_v59  ;;  %v8851_v19 = vpop.xlane.xlu0 %1963  ;;  %v2595_v27 = vsel %vm2594_vm15, %v2590_v5, inf  ;;  %v3136_v0 = vcvt.s32.f32 %v3134_v46  ;;  %v2483_v39 = vand.u32 65535, %v8463_v32 }
 0x230   : > { %vm1965_vm2 = vcmp.eq.f32.partialorder %v8419_v4, %v8851_v19  ;;  %v10980_v4 = vld [vmem:[#allocation53_spill] sm:$0xff]  ;;  %v2021_v8 = vcvt.s32.f32 %v2019_v56  ;;  %v2051_v56 = vcvt.s32.f32 %v2049_v26  ;;  %v2513_v26 = vand.u32 65535, %v8484_v31 }
 0x231   : > { %v1966_v50 = vsel %vm1965_vm2, %v1961_v54, inf  ;;  %v3164_v61 = vand.u32 65535, %v10980_v4  ;;  %v2543_v31 = vand.u32 65535, %v8505_v35  ;;  %v2573_v35 = vand.u32 65535, %v8524_v11 }
 0x232   : > { %2566 = vmin.xlane.f32.xlu1 %v2565_v21  ;;  %v10979_v21 = vld [vmem:[#allocation52_spill] sm:$0xff] }
 0x233   : > { %v8859_v28 = vpop.xlane.xlu1 %3722  ;;  %1417 = vmin.xlane.f32.xlu0 %v1416_v13  ;;  %v8861_v59 = vpop.xlane.xlu0 %1993  ;;  %vm3140_vm3 = vcmp.eq.f32.partialorder %v10979_v21, %v8780_v6  ;;  %v3166_v46 = vcvt.s32.f32 %v3164_v61 }
 0x234   : > { %vm1995_vm4 = vcmp.eq.f32.partialorder %v8440_v18, %v8861_v59  ;;  %v3141_v5 = vsel %vm3140_vm3, %v3136_v0, inf  ;;  %v10982_v18 = vld [vmem:[#allocation54_spill] sm:$0xff] }
 0x235   : > { %v1996_v54 = vsel %vm1995_vm4, %v1991_v38, inf  ;;  %v3194_v4 = vand.u32 65535, %v10982_v18 }
 0x236   : > { %2596 = vmin.xlane.f32.xlu1 %v2595_v27  ;;  %v10981_v27 = vld [vmem:[#allocation5_spill] sm:$0xff] }
 0x237   : > { %v8869_v16 = vpop.xlane.xlu1 %3752  ;;  %1967 = vmin.xlane.f32.xlu0 %v1966_v50  ;;  %v8871_v13 = vpop.xlane.xlu0 %2023  ;;  %vm3170_vm5 = vcmp.eq.f32.partialorder %v10981_v27, %v8794_v20  ;;  %v3196_v61 = vcvt.s32.f32 %v3194_v4  ;;  %v10986_v4 = vld [vmem:[#allocation56_spill] sm:$0xff] }
 0x238   : > { %vm2025_vm6 = vcmp.eq.f32.partialorder %v8459_v42, %v8871_v13  ;;  %v3171_v0 = vsel %vm3170_vm5, %v3166_v46, inf  ;;  %v10984_v42 = vld [vmem:[#allocation55_spill] sm:$0xff] }
 0x239   : > { %v2026_v38 = vsel %vm2025_vm6, %v2021_v8, inf  ;;  %v3224_v18 = vand.u32 65535, %v10984_v42 }
 0x23a   : > { %3142 = vmin.xlane.f32.xlu1 %v3141_v5  ;;  %v10983_v5 = vld [vmem:[#allocation6_spill] sm:$0xff] }
 0x23b   : > { %v8879_v21 = vpop.xlane.xlu1 %4298  ;;  %1997 = vmin.xlane.f32.xlu0 %v1996_v54  ;;  %v8881_v50 = vpop.xlane.xlu0 %2053  ;;  %vm3200_vm1 = vcmp.eq.f32.partialorder %v10983_v5, %v8808_v36  ;;  %v2485_v36 = vcvt.s32.f32 %v2483_v39  ;;  %v2515_v39 = vcvt.s32.f32 %v2513_v26  ;;  %v2545_v26 = vcvt.s32.f32 %v2543_v31 }
 0x23c   : > { %vm2055_vm0 = vcmp.eq.f32.partialorder %v8480_v33, %v8881_v50  ;;  %v3201_v46 = vsel %vm3200_vm1, %v3196_v61, inf  ;;  %v3658_v33 = vand.u32 65535, %v10986_v4  ;;  %v3119_v31 = vand.u32 65535, %v8543_v3 }
 0x23d   : > { %v2056_v8 = vsel %vm2055_vm0, %v2051_v56, inf  ;;  %v10988_v56 = vld [vmem:[#allocation10_spill] sm:$0xff]  ;;  %v3149_v3 = vand.u32 65535, %v8562_v17  ;;  %v3179_v17 = vand.u32 65535, %v8581_v23 }
 0x23e   : > { %3172 = vmin.xlane.f32.xlu1 %v3171_v0  ;;  %v10985_v0 = vld [vmem:[#allocation8_spill] sm:$0xff]  ;;  %vm3664_vm9 = vcmp.eq.f32.partialorder %v10988_v56, %v8836_v57 }
 0x23f   : > { %v8889_v27 = vpop.xlane.xlu1 %4328  ;;  %2027 = vmin.xlane.f32.xlu0 %v2026_v38  ;;  %v8891_v54 = vpop.xlane.xlu0 %2487  ;;  %vm3230_vm7 = vcmp.eq.f32.partialorder %v10985_v0, %v8822_v52  ;;  %v3226_v38 = vcvt.s32.f32 %v3224_v18  ;;  %v3660_v18 = vcvt.s32.f32 %v3658_v33 }
 0x240   : > { %vm2489_vm8 = vcmp.eq.f32.partialorder %v8501_v58, %v8891_v54  ;;  %v10989_v58 = vld [vmem:[#allocation57_spill] sm:$0xff] }
 0x241   : > { %v3231_v32 = vsel %vm3230_vm7, %v3226_v38, inf  ;;  %v2490_v61 = vsel %vm2489_vm8, %v2485_v36, inf  ;;  %v3665_v0 = vsel %vm3664_vm9, %v3660_v18, inf  ;;  %v10990_v36 = vld [vmem:[#allocation13_spill] sm:$0xff] }
 0x242   : > { %3202 = vmin.xlane.f32.xlu1 %v3201_v46  ;;  %vm3694_vm11 = vcmp.eq.f32.partialorder %v10990_v36, %v8848_v55 }
 0x243   : > { %2057 = vmin.xlane.f32.xlu0 %v2056_v8  ;;  %v8899_v5 = vpop.xlane.xlu0 %2517  ;;  %v8905_v42 = vpop.xlane.xlu1 %4358  ;;  %v3688_v8 = vand.u32 65535, %v10989_v58  ;;  %v10993_v58 = vld [vmem:[#allocation17_spill] sm:$0xff] }
 0x244   : > { %10987 = vst [vmem:[#allocation12_spill] sm:$0xff] %v8905_v42  ;;  %vm2519_vm10 = vcmp.eq.f32.partialorder %v8520_v62, %v8899_v5  ;;  %v10992_v62 = vld [vmem:[#allocation58_spill] sm:$0xff]  ;;  %vm3724_vm13 = vcmp.eq.f32.partialorder %v10993_v58, %v8859_v28  ;;  %vm4360_vm0 = vcmp.eq.f32.partialorder %v8518_v48, %v8905_v42 }
 0x245   : > { %v2520_v38 = vsel %vm2519_vm10, %v2515_v39, inf  ;;  %v3690_v33 = vcvt.s32.f32 %v3688_v8  ;;  %v10994_v8 = vld [vmem:[#allocation59_spill] sm:$0xff] }
 0x246   : > { %3232 = vmin.xlane.f32.xlu1 %v3231_v32 }
 0x247   : > { %2491 = vmin.xlane.f32.xlu0 %v2490_v61  ;;  %v8909_v46 = vpop.xlane.xlu0 %2547  ;;  %v8917_v4 = vpop.xlane.xlu1 %4388  ;;  %v3718_v61 = vand.u32 65535, %v10992_v62  ;;  %v3695_v56 = vsel %vm3694_vm11, %v3690_v33, inf  ;;  %v10996_v62 = vld [vmem:[#allocation60_spill] sm:$0xff] }
 0x248   : > { %10991 = vst [vmem:[#allocation41_spill] sm:$0xff] %v8917_v4  ;;  %vm2549_vm12 = vcmp.eq.f32.partialorder %v8539_v25, %v8909_v46  ;;  %v3748_v25 = vand.u32 65535, %v10994_v8  ;;  %vm3754_vm2 = vcmp.eq.f32.partialorder %v10996_v62, %v8869_v16 }
 0x249   : > { %v2550_v18 = vsel %vm2549_vm12, %v2545_v26, inf }
 0x24a   : > { %3666 = vmin.xlane.f32.xlu1 %v3665_v0  ;;  %v3720_v0 = vcvt.s32.f32 %v3718_v61  ;;  %v3750_v61 = vcvt.s32.f32 %v3748_v25 }
 0x24b   : > { %2521 = vmin.xlane.f32.xlu0 %v2520_v38  ;;  %v8919_v32 = vpop.xlane.xlu0 %2577  ;;  %v2575_v38 = vcvt.s32.f32 %v2573_v35  ;;  %v8933_v36 = vpop.xlane.xlu1 %4822  ;;  %v3121_v35 = vcvt.s32.f32 %v3119_v31  ;;  %v3151_v31 = vcvt.s32.f32 %v3149_v3  ;;  %v3209_v3 = vand.u32 65535, %v8599_v44 }
 0x24c   : > { %vm2579_vm15 = vcmp.eq.f32.partialorder %v8558_v49, %v8919_v32  ;;  %10995 = vst [vmem:[#allocation43_spill] sm:$0xff] %v8933_v36  ;;  %v3725_v11 = vsel %vm3724_vm13, %v3720_v0, inf  ;;  %v10997_v49 = vld [vmem:[#allocation61_spill] sm:$0xff]  ;;  %v10998_v0 = vld [vmem:[#allocation62_spill] sm:$0xff]  ;;  %v3643_v44 = vand.u32 65535, %v8615_v51 }
 0x24d   : > { %v2580_v33 = vsel %vm2579_vm15, %v2575_v38, inf  ;;  %vm4300_vm4 = vcmp.eq.f32.partialorder %v10998_v0, %v8879_v21 }
 0x24e   : > { %3696 = vmin.xlane.f32.xlu1 %v3695_v56  ;;  %v4294_v56 = vand.u32 65535, %v10997_v49  ;;  %v3645_v51 = vcvt.s32.f32 %v3643_v44 }
 0x24f   : > { %2551 = vmin.xlane.f32.xlu0 %v2550_v18  ;;  %v8927_v39 = vpop.xlane.xlu0 %3123  ;;  %v3755_v18 = vsel %vm3754_vm2, %v3750_v61, inf  ;;  %v8945_v8 = vpop.xlane.xlu1 %4852  ;;  %v11001_v61 = vld [vmem:[#allocation64_spill] sm:$0xff] }
 0x250   : > { %vm3125_vm3 = vcmp.eq.f32.partialorder %v8577_v7, %v8927_v39  ;;  %10999 = vst [vmem:[#allocation44_spill] sm:$0xff] %v8945_v8  ;;  %v4296_v25 = vcvt.s32.f32 %v4294_v56  ;;  %v11000_v7 = vld [vmem:[#allocation63_spill] sm:$0xff]  ;;  %vm4330_vm6 = vcmp.eq.f32.partialorder %v11001_v61, %v8889_v27  ;;  %v11002_v56 = vld [vmem:[#allocation65_spill] sm:$0xff] }
 0x251   : > { %v3126_v58 = vsel %vm3125_vm3, %v3121_v35, inf }
 0x252   : > { %3726 = vmin.xlane.f32.xlu1 %v3725_v11  ;;  %v4324_v11 = vand.u32 65535, %v11000_v7 }
 0x253   : > { %2581 = vmin.xlane.f32.xlu0 %v2580_v33  ;;  %v8937_v26 = vpop.xlane.xlu0 %3153  ;;  %v4301_v33 = vsel %vm4300_vm4, %v4296_v25, inf }
 0x254   : > { %vm3155_vm5 = vcmp.eq.f32.partialorder %v8595_v22, %v8937_v26  ;;  %v4326_v35 = vcvt.s32.f32 %v4324_v11  ;;  %v4354_v22 = vand.u32 65535, %v11002_v56 }
 0x255   : > { %v3156_v62 = vsel %vm3155_vm5, %v3151_v31, inf  ;;  %v3211_v31 = vcvt.s32.f32 %v3209_v3 }
 0x256   : > { %3756 = vmin.xlane.f32.xlu1 %v3755_v18  ;;  %v3181_v18 = vcvt.s32.f32 %v3179_v17  ;;  %v4331_v23 = vsel %vm4330_vm6, %v4326_v35, inf  ;;  %v4356_v7 = vcvt.s32.f32 %v4354_v22  ;;  %v806_v22 = vcvt.f32.s32 %v8649_v45  ;;  %v11012_v45 = vld [vmem:[#allocation70_spill] sm:$0xff] }
 0x257   : > { %3127 = vmin.xlane.f32.xlu0 %v3126_v58  ;;  %v8947_v38 = vpop.xlane.xlu0 %3183  ;;  %v8961_v58 = vpop.xlane.xlu1 %4882  ;;  %v4848_v44 = vand.u32 65535, %v11012_v45  ;;  %v11014_v45 = vld [vmem:[#allocation22_spill] sm:$0xff] }
 0x258   : > { %vm3185_vm1 = vcmp.eq.f32.partialorder %v8611_v2, %v8947_v38  ;;  %11003 = vst [vmem:[#allocation45_spill] sm:$0xff] %v8961_v58  ;;  %v11004_v2 = vld [vmem:[#allocation66_spill] sm:$0xff]  ;;  %v4361_v17 = vsel %vm4360_vm0, %v4356_v7, inf }
 0x259   : > { %v3186_v0 = vsel %vm3185_vm1, %v3181_v18, inf  ;;  %v4384_v11 = vand.u32 65535, %v11004_v2  ;;  %v11008_v18 = vld [vmem:[#allocation76_spill] sm:$0xff] }
 0x25a   : > { %4302 = vmin.xlane.f32.xlu1 %v4301_v33  ;;  %v3673_v3 = vand.u32 65535, %v11008_v18 }
 0x25b   : > { %3157 = vmin.xlane.f32.xlu0 %v3156_v62  ;;  %v8955_v49 = vpop.xlane.xlu0 %3213  ;;  %v11005_v62 = vld [vmem:[#allocation67_spill] sm:$0xff]  ;;  %v8973_v61 = vpop.xlane.xlu1 %4912  ;;  %v4386_v35 = vcvt.s32.f32 %v4384_v11 }
 0x25c   : > { %vm3215_vm7 = vcmp.eq.f32.partialorder %v8621_v29, %v8955_v49  ;;  %vm4390_vm8 = vcmp.eq.f32.partialorder %v11005_v62, %v8917_v4  ;;  %11006 = vst [vmem:[#allocation46_spill] sm:$0xff] %v8973_v61  ;;  %v11007_v29 = vld [vmem:[#allocation68_spill] sm:$0xff]  ;;  %v807_v62 = vshll.u32 %v806_v22, 16  ;;  %v3675_v18 = vcvt.s32.f32 %v3673_v3 }
 0x25d   : > { %v3216_v33 = vsel %vm3215_vm7, %v3211_v31, inf  ;;  %v4818_v56 = vand.u32 65535, %v11007_v29  ;;  %v11010_v31 = vld [vmem:[#allocation69_spill] sm:$0xff]  ;;  %v11015_v22 = vld [vmem:[#allocation72_spill] sm:$0xff] }
 0x25e   : > { %4332 = vmin.xlane.f32.xlu1 %v4331_v23  ;;  %v4391_v23 = vsel %vm4390_vm8, %v4386_v35, inf  ;;  %vm4824_vm10 = vcmp.eq.f32.partialorder %v11010_v31, %v8933_v36  ;;  %v821_v35 = vcvt.f32.s32 %v8662_v60  ;;  %v4878_v60 = vand.u32 65535, %v11015_v22  ;;  %v11019_v22 = vld [vmem:[#allocation23_spill] sm:$0xff] }
 0x25f   : > { %3187 = vmin.xlane.f32.xlu0 %v3186_v0  ;;  %v8965_v25 = vpop.xlane.xlu0 %3647  ;;  %v11009_v0 = vld [vmem:[#allocation77_spill] sm:$0xff] }
 0x260   : > { %vm3649_vm9 = vcmp.eq.f32.partialorder %v8630_v24, %v8965_v25  ;;  %v3703_v7 = vand.u32 65535, %v11009_v0  ;;  %v4820_v24 = vcvt.s32.f32 %v4818_v56 }
 0x261   : > { %v3650_v2 = vsel %vm3649_vm9, %v3645_v51, inf }
 0x262   : > { %4362 = vmin.xlane.f32.xlu1 %v4361_v17  ;;  %v3705_v51 = vcvt.s32.f32 %v3703_v7  ;;  %v11017_v7 = vld [vmem:[#allocation80_spill] sm:$0xff] }
 0x263   : > { %3217 = vmin.xlane.f32.xlu0 %v3216_v33  ;;  %v8975_v48 = vpop.xlane.xlu0 %3677  ;;  %v11011_v33 = vld [vmem:[#allocation78_spill] sm:$0xff] }
 0x264   : > { %vm3679_vm11 = vcmp.eq.f32.partialorder %v11011_v33, %v8975_v48  ;;  %v4850_v33 = vcvt.s32.f32 %v4848_v44 }
 0x265   : > { %v3680_v0 = vsel %vm3679_vm11, %v3675_v18, inf }
 0x266   : > { %4392 = vmin.xlane.f32.xlu1 %v4391_v23  ;;  %v4825_v23 = vsel %vm4824_vm10, %v4820_v24, inf  ;;  %v822_v24 = vshll.u32 %v821_v35, 16 }
 0x267   : > { %v804_v17 = vpop.xlane.xlu1 %803  ;;  %3651 = vmin.xlane.f32.xlu0 %v3650_v2  ;;  %v8985_v11 = vpop.xlane.xlu0 %3707  ;;  %v11013_v2 = vld [vmem:[#allocation71_spill] sm:$0xff] }
 0x268   : > { %v805_v29 = vcvt.f32.s32 %v804_v17  ;;  %vm4854_vm12 = vcmp.eq.f32.partialorder %v11013_v2, %v8945_v8  ;;  %vm3709_vm13 = vcmp.eq.f32.partialorder %v11014_v45, %v8985_v11  ;;  %v11016_v17 = vld [vmem:[#allocation79_spill] sm:$0xff]  ;;  %v11018_v45 = vld [vmem:[#allocation73_spill] sm:$0xff]  ;;  %v11020_v8 = vld [vmem:[#allocation24_spill] sm:$0xff] }
 0x269   : > { %v3733_v3 = vand.u32 65535, %v11016_v17  ;;  %v3710_v44 = vsel %vm3709_vm13, %v3705_v51, inf  ;;  %vm4884_vm2 = vcmp.eq.f32.partialorder %v11018_v45, %v8961_v58  ;;  %v4279_v17 = vand.u32 65535, %v11019_v22  ;;  %v11022_v22 = vld [vmem:[#allocation16_spill] sm:$0xff] }
 0x26a   : > { %4826 = vmin.xlane.f32.xlu1 %v4825_v23  ;;  %v808_v31 = vadd.s32 %v807_v62, %v805_v29  ;;  %v836_v23 = vcvt.f32.s32 %v11017_v7  ;;  %v10772_v62 = vmov 0.0  }
 0x26b   : > { %v819_v36 = vpop.xlane.xlu1 %818  ;;  %3681 = vmin.xlane.f32.xlu0 %v3680_v0  ;;  %v8993_v56 = vpop.xlane.xlu0 %3737  ;;  %v4855_v0 = vsel %vm4854_vm12, %v4850_v33, inf  ;;  %v11021_v33 = vld [vmem:[#allocation74_spill] sm:$0xff] }
 0x26c   : > { %v820_v18 = vcvt.f32.s32 %v819_v36  ;;  %vm914_vm15 = vcmp.eq.s32.totalorder %v7370_v40, %v808_v31  ;;  %v4880_v36 = vcvt.s32.f32 %v4878_v60  ;;  %v3735_v31 = vcvt.s32.f32 %v3733_v3 }
 0x26d   : > { %v6686_v29 = vsel %vm914_vm15, 1.0, %v10772_v62  ;;  %vm3739_vm3 = vcmp.eq.f32.partialorder %v11020_v8, %v8993_v56  ;;  %v4281_v3 = vcvt.s32.f32 %v4279_v17 }
 0x26e   : > { %v823_v2 = vadd.s32 %v822_v24, %v820_v18  ;;  %6949 = vmatprep.mubr.msk.f32.mxu0 %vm753_vm14, %v6686_v29  ;;  %4856 = vmin.xlane.f32.xlu1 %v4855_v0  ;;  %v4908_v24 = vand.u32 65535, %v11021_v33  ;;  %v837_v18 = vshll.u32 %v836_v23, 16  ;;  %v851_v29 = vcvt.f32.s32 %v8683_v37  ;;  %v11023_v23 = vld [vmem:[#allocation75_spill] sm:$0xff]  ;;  %v11024_v37 = vld [vmem:[#allocation26_spill] sm:$0xff] }
 0x26f   : > { %v834_v35 = vpop.xlane.xlu1 %833  ;;  %3711 = vmin.xlane.f32.xlu0 %v3710_v44  ;;  %v9006_v7 = vpop.xlane.xlu0 %4283  ;;  %v4885_v45 = vsel %vm4884_vm2, %v4880_v36, inf  ;;  %v3740_v44 = vsel %vm3739_vm3, %v3735_v31, inf  ;;  %vm4914_vm5 = vcmp.eq.f32.partialorder %v11023_v23, %v8973_v61 }
 0x270   : > { %v835_v51 = vcvt.f32.s32 %v834_v35  ;;  %vm915_vm4 = vcmp.eq.s32.totalorder %v7370_v40, %v823_v2  ;;  %v4910_v33 = vcvt.s32.f32 %v4908_v24  ;;  %vm4285_vm6 = vcmp.eq.f32.partialorder %v11024_v37, %v9006_v7  ;;  %v11025_v2 = vld [vmem:[#allocation25_spill] sm:$0xff] }
 0x271   : > { %v6687_v0 = vsel %vm915_vm4, 1.0, %v10772_v62  ;;  %v4309_v35 = vand.u32 65535, %v11025_v2  ;;  %v852_v36 = vshll.u32 %v851_v29, 16  ;;  %v4286_v29 = vsel %vm4285_vm6, %v4281_v3, inf  ;;  %v11028_v3 = vld [vmem:[#allocation19_spill] sm:$0xff] }
 0x272   : > { %6950 = vmatmul.mubr.msk.f32.vlgmr.msra.gmra.mxu0 %vm753_vm14, %v6687_v0  ;;  %4886 = vmin.xlane.f32.xlu1 %v4885_v45  ;;  %v838_v60 = vadd.s32 %v837_v18, %v835_v51  ;;  %v866_v0 = vcvt.f32.s32 %v8691_v41  ;;  %v11026_v45 = vld [vmem:[#allocation20_spill] sm:$0xff]  ;;  %v11027_v51 = vld [vmem:[#allocation15_spill] sm:$0xff] }
 0x273   : > { %6960 = vmatpush3.msra.mxu0 %v11022_v22  ;;  %v849_v8 = vpop.xlane.xlu1 %848  ;;  %3741 = vmin.xlane.f32.xlu0 %v3740_v44  ;;  %v9023_v17 = vpop.xlane.xlu0 %4313  ;;  %v4915_v44 = vsel %vm4914_vm5, %v4910_v33, inf  ;;  %v4311_v23 = vcvt.s32.f32 %v4309_v35 }
 0x274   : > { %6961 = vmatprep.subr.mxu0 %v11026_v45  ;;  %v850_v31 = vcvt.f32.s32 %v849_v8  ;;  %vm916_vm1 = vcmp.eq.s32.totalorder %v7370_v40, %v838_v60  ;;  %vm4315_vm0 = vcmp.eq.f32.partialorder %v8686_v12, %v9023_v17  ;;  %v867_v8 = vshll.u32 %v866_v0, 16  ;;  %v11030_v12 = vld [vmem:[#allocation21_spill] sm:$0xff] }
 0x275   : > { %6962 = vmatpush3.msra.mxu0 %v11026_v45  ;;  %v6688_v24 = vsel %vm916_vm1, 1.0, %v10772_v62  ;;  %v881_v60 = vcvt.f32.s32 %v8696_v9  ;;  %v4316_v33 = vsel %vm4315_vm0, %v4311_v23, inf }
 0x276   : > { %v853_v18 = vadd.s32 %v852_v36, %v850_v31  ;;  %6973 = vmatprep.subr.mxu0 %v11027_v51  ;;  %6956 = vmatprep.mubr.msk.f32.mxu1 %vm753_vm14, %v6688_v24  ;;  %v11029_v24 = vld [vmem:[#allocation27_spill] sm:$0xff] }
 0x277   : > { %4916 = vmin.xlane.f32.xlu1 %v4915_v44  ;;  %v864_v41 = vpop.xlane.xlu1 %863  ;;  %4287 = vmin.xlane.f32.xlu0 %v4286_v29  ;;  %v882_v35 = vshll.u32 %v881_v60, 16  ;;  %v896_v44 = vcvt.f32.s32 %v11029_v24  ;;  %v11031_v29 = vld [vmem:[#allocation14_spill] sm:$0xff] }
 0x278   : > { %v865_v37 = vcvt.f32.s32 %v864_v41  ;;  %vm917_vm7 = vcmp.eq.s32.totalorder %v7370_v40, %v853_v18 }
 0x279   : > { %v6689_v2 = vsel %vm917_vm7, 1.0, %v10772_v62  ;;  %v897_v23 = vshll.u32 %v896_v44, 16 }
 0x27a   : > { %v868_v36 = vadd.s32 %v867_v8, %v865_v37  ;;  %6957 = vmatmul.mubr.msk.f32.vlgmr.msra.gmra.mxu1 %vm753_vm14, %v6689_v2  ;;  %v11032_v8 = vld [vmem:[#allocation29_spill] sm:$0xff] }
 0x27b   : > { %6967 = vmatpush3.msra.mxu1 %v11028_v3  ;;  %v879_v31 = vpop.xlane.xlu1 %878  ;;  %4317 = vmin.xlane.f32.xlu0 %v4316_v33  ;;  %v911_v60 = vcvt.f32.s32 %v11032_v8  ;;  %v11035_v8 = vld [vmem:[#allocation35_spill] sm:$0xff] }
 0x27c   : > { %6968 = vmatprep.subr.mxu1 %v11030_v12  ;;  %v880_v0 = vcvt.f32.s32 %v879_v31  ;;  %vm918_vm8 = vcmp.eq.s32.totalorder %v7370_v40, %v868_v36 }
 0x27d   : > { %6969 = vmatpush3.msra.mxu1 %v11030_v12  ;;  %v6690_v9 = vsel %vm918_vm8, 1.0, %v10772_v62  ;;  %v912_v31 = vshll.u32 %v911_v60, 16  ;;  %v1345_v60 = vcvt.f32.s32 %v11035_v8  ;;  %v11037_v8 = vld [vmem:[#allocation9_spill] sm:$0xff] }
 0x27e   : > { %v883_v18 = vadd.s32 %v882_v35, %v880_v0  ;;  %6980 = vmatprep.subr.mxu1 %v11031_v29  ;;  %6963 = vmatprep.mubr.msk.f32.mxu0 %vm753_vm14, %v6690_v9  ;;  %v11033_v35 = vld [vmem:[#allocation31_spill] sm:$0xff] }
 0x27f   : > { %v894_v41 = vpop.xlane.xlu1 %893  ;;  %v1330_v24 = vcvt.f32.s32 %v11033_v35  ;;  %v11034_v0 = vld [vmem:[#allocation11_spill] sm:$0xff]  ;;  %v1360_v35 = vcvt.f32.s32 %v8729_v34 }
 0x280   : > { %vm919_vm9 = vcmp.eq.s32.totalorder %v7370_v40, %v883_v18  ;;  %v895_v37 = vcvt.f32.s32 %v894_v41 }
 0x281   : > { %v6691_v2 = vsel %vm919_vm9, 1.0, %v10772_v62 }
 0x282   : > { %v898_v33 = vadd.s32 %v897_v23, %v895_v37  ;;  %6964 = vmatmul.mubr.msk.f32.vlgmr.msra.gmra.mxu0 %vm753_vm14, %v6691_v2  ;;  %v1331_v23 = vshll.u32 %v1330_v24, 16 }
 0x283   : > { %6974 = vmatpush3.msra.mxu0 %v11027_v51  ;;  %v909_v36 = vpop.xlane.xlu1 %908 }
 0x284   : > { %6975 = vmatprep.subr.mxu0 %v11034_v0  ;;  %v910_v9 = vcvt.f32.s32 %v909_v36  ;;  %vm920_vm10 = vcmp.eq.s32.totalorder %v7370_v40, %v898_v33 }
 0x285   : > { %6976 = vmatpush3.msra.mxu0 %v11034_v0  ;;  %v6692_v44 = vsel %vm920_vm10, 1.0, %v10772_v62 }
 0x286   : > { %v913_v18 = vadd.s32 %v912_v31, %v910_v9  ;;  %6987 = vmatprep.subr.mxu0 %v11022_v22  ;;  %6970 = vmatprep.mubr.msk.f32.mxu1 %vm753_vm14, %v6692_v44  ;;  %v1346_v31 = vshll.u32 %v1345_v60, 16  ;;  %v11036_v9 = vld [vmem:[#allocation18_spill] sm:$0xff]  ;;  %v1375_v60 = vcvt.f32.s32 %v11037_v8  ;;  %v1405_v8 = vcvt.f32.s32 %v8750_v14 }
 0x287   : > { %v1328_v41 = vpop.xlane.xlu1 %1327 }
 0x288   : > { %vm921_vm11 = vcmp.eq.s32.totalorder %v7370_v40, %v913_v18  ;;  %v1329_v37 = vcvt.f32.s32 %v1328_v41 }
 0x289   : > { %v6693_v2 = vsel %vm921_vm11, 1.0, %v10772_v62 }
 0x28a   : > { %v1332_v36 = vadd.s32 %v1331_v23, %v1329_v37  ;;  %6971 = vmatmul.mubr.msk.f32.vlgmr.msra.gmra.mxu1 %vm753_vm14, %v6693_v2  ;;  %v1361_v23 = vshll.u32 %v1360_v35, 16 }
 0x28b   : > { %6981 = vmatpush3.msra.mxu1 %v11031_v29  ;;  %v1343_v33 = vpop.xlane.xlu1 %1342 }
 0x28c   : > { %6982 = vmatprep.subr.mxu1 %v11036_v9  ;;  %v1344_v44 = vcvt.f32.s32 %v1343_v33  ;;  %vm1438_vm12 = vcmp.eq.s32.totalorder %v7370_v40, %v1332_v36  ;;  %v1376_v33 = vshll.u32 %v1375_v60, 16 }
 0x28d   : > { %6983 = vmatpush3.msra.mxu1 %v11036_v9  ;;  %v6702_v24 = vsel %vm1438_vm12, 1.0, %v10772_v62 }
 0x28e   : > { %v1347_v18 = vadd.s32 %v1346_v31, %v1344_v44  ;;  %6994 = vmatprep.subr.mxu1 %v11028_v3  ;;  %6977 = vmatprep.mubr.msk.f32.mxu0 %vm753_vm14, %v6702_v24  ;;  %v11038_v31 = vld [vmem:[#allocation81_spill] sm:$0xff] }
 0x28f   : > { %v1358_v41 = vpop.xlane.xlu1 %1357  ;;  %v1390_v44 = vcvt.f32.s32 %v11038_v31 }
 0x290   : > { %vm1439_vm13 = vcmp.eq.s32.totalorder %v7370_v40, %v1347_v18  ;;  %v1359_v34 = vcvt.f32.s32 %v1358_v41 }
 0x291   : > { %v6703_v37 = vsel %vm1439_vm13, 1.0, %v10772_v62 }
 0x292   : > { %v1362_v2 = vadd.s32 %v1361_v23, %v1359_v34  ;;  %6978 = vmatmul.mubr.msk.f32.vlgmr.msra.gmra.mxu0 %vm753_vm14, %v6703_v37  ;;  %v1391_v23 = vshll.u32 %v1390_v44, 16 }
 0x293   : > { %6988 = vmatpush3.msra.mxu0 %v11022_v22  ;;  %v1373_v36 = vpop.xlane.xlu1 %1372 }
 0x294   : > { %6989 = vmatprep.subr.mxu0 %v11026_v45  ;;  %v1374_v24 = vcvt.f32.s32 %v1373_v36  ;;  %vm1440_vm15 = vcmp.eq.s32.totalorder %v7370_v40, %v1362_v2  ;;  %v1406_v36 = vshll.u32 %v1405_v8, 16  ;;  %v4369_v8 = vand.u32 65535, %v8776_v43 }
 0x295   : > { %6990 = vmatpush3.msra.mxu0 %v11026_v45  ;;  %v6704_v35 = vsel %vm1440_vm15, 1.0, %v10772_v62 }
 0x296   : > { %v1377_v18 = vadd.s32 %v1376_v33, %v1374_v24  ;;  %7001 = vmatprep.subr.mxu0 %v11027_v51  ;;  %6984 = vmatprep.mubr.msk.f32.mxu1 %vm753_vm14, %v6704_v35  ;;  %v4339_v24 = vand.u32 65535, %v8763_v53 }
 0x297   : > { %v1388_v41 = vpop.xlane.xlu1 %1387 }
 0x298   : > { %vm1441_vm2 = vcmp.eq.s32.totalorder %v7370_v40, %v1377_v18  ;;  %v1389_v60 = vcvt.f32.s32 %v1388_v41 }
 0x299   : > { %v6705_v34 = vsel %vm1441_vm2, 1.0, %v10772_v62 }
 0x29a   : > { %v1392_v37 = vadd.s32 %v1391_v23, %v1389_v60  ;;  %6985 = vmatmul.mubr.msk.f32.vlgmr.msra.gmra.mxu1 %vm753_vm14, %v6705_v34  ;;  %v4341_v23 = vcvt.s32.f32 %v4339_v24  ;;  %v11040_v60 = vld [vmem:[#allocation34_spill] sm:$0xff] }
 0x29b   : > { %6995 = vmatpush3.msra.mxu1 %v11028_v3  ;;  %v1403_v2 = vpop.xlane.xlu1 %1402 }
 0x29c   : > { %6996 = vmatprep.subr.mxu1 %v11030_v12  ;;  %v1404_v33 = vcvt.f32.s32 %v1403_v2  ;;  %vm1442_vm3 = vcmp.eq.s32.totalorder %v7370_v40, %v1392_v37  ;;  %v4371_v2 = vcvt.s32.f32 %v4369_v8 }
 0x29d   : > { %6997 = vmatpush3.msra.mxu1 %v11030_v12  ;;  %v6706_v14 = vsel %vm1442_vm3, 1.0, %v10772_v62 }
 0x29e   : > { %v1407_v31 = vadd.s32 %v1406_v36, %v1404_v33  ;;  %7008 = vmatprep.subr.mxu1 %v11031_v29  ;;  %6991 = vmatprep.mubr.msk.f32.mxu0 %vm753_vm14, %v6706_v14  ;;  %v4803_v36 = vand.u32 65535, %v8790_v47  ;;  %v11042_v33 = vld [vmem:[#allocation37_spill] sm:$0xff] }
 0x29f   : > { %v1433_v44 = vpop.xlane.xlu1 %1432 }
 0x2a0   : > { %vm1443_vm4 = vcmp.eq.s32.totalorder %v7370_v40, %v1407_v31  ;;  %v4805_v24 = vcvt.s32.f32 %v4803_v36 }
 0x2a1   : > { %v6707_v35 = vsel %vm1443_vm4, 1.0, %v10772_v62 }
 0x2a2   : > { %6992 = vmatmul.mubr.msk.f32.vlgmr.msra.gmra.mxu0 %vm753_vm14, %v6707_v35  ;;  %v4833_v35 = vand.u32 65535, %v8804_v30 }
 0x2a3   : > { %7002 = vmatpush3.msra.mxu0 %v11027_v51  ;;  %v1983_v18 = vpop.xlane.xlu1 %1982 }
 0x2a4   : > { %7003 = vmatprep.subr.mxu0 %v11034_v0  ;;  %v9097_v41 = vpop.xlane.xlu0 %4343  ;;  %v4835_v8 = vcvt.s32.f32 %v4833_v35 }
 0x2a5   : > { %11039 = vst [vmem:[#allocation47_spill] sm:$0xff] %v9097_v41  ;;  %7004 = vmatpush3.msra.mxu0 %v11034_v0  ;;  %vm4345_vm5 = vcmp.eq.f32.partialorder %v11040_v60, %v9097_v41  ;;  %v11052_v41 = vld [vmem:[#allocation32_spill] sm:$0xff] }
 0x2a6   : > { %7015 = vmatprep.subr.mxu0 %v11022_v22  ;;  %v4346_v53 = vsel %vm4345_vm5, %v4341_v23, inf  ;;  %v11044_v23 = vld [vmem:[#allocation7_spill] sm:$0xff] }
 0x2a7   : > { %v9104_v34 = vpop.xlane.xlu1 %2012  ;;  %4347 = vmin.xlane.f32.xlu0 %v4346_v53 }
 0x2a8   : > { %v9106_v37 = vpop.xlane.xlu0 %4373 }
 0x2a9   : > { %11041 = vst [vmem:[#allocation48_spill] sm:$0xff] %v9106_v37  ;;  %vm4375_vm6 = vcmp.eq.f32.partialorder %v11042_v33, %v9106_v37  ;;  %v11046_v33 = vld [vmem:[#allocation4_spill] sm:$0xff] }
 0x2aa   : > { %v4376_v43 = vsel %vm4375_vm6, %v4371_v2, inf  ;;  %v4863_v2 = vand.u32 65535, %v8818_v15  ;;  %v1434_v15 = vcvt.f32.s32 %v1433_v44  ;;  %v1970_v44 = vcvt.f32.s32 %v8851_v19 }
 0x2ab   : > { %v9111_v14 = vpop.xlane.xlu1 %2042  ;;  %4377 = vmin.xlane.f32.xlu0 %v4376_v43 }
 0x2ac   : > { %v9113_v31 = vpop.xlane.xlu0 %4807  ;;  %v4865_v36 = vcvt.s32.f32 %v4863_v2 }
 0x2ad   : > { %11043 = vst [vmem:[#allocation49_spill] sm:$0xff] %v9113_v31  ;;  %vm4809_vm1 = vcmp.eq.f32.partialorder %v11044_v23, %v9113_v31  ;;  %v11048_v23 = vld [vmem:[#allocation40_spill] sm:$0xff] }
 0x2ae   : > { %v4810_v60 = vsel %vm4809_vm1, %v4805_v24, inf  ;;  %v4893_v24 = vand.u32 65535, %v8832_v1  ;;  %v11051_v1 = vld [vmem:[#allocation30_spill] sm:$0xff] }
 0x2af   : > { %v9118_v53 = vpop.xlane.xlu1 %2072  ;;  %4811 = vmin.xlane.f32.xlu0 %v4810_v60  ;;  %v11049_v60 = vld [vmem:[#allocation28_spill] sm:$0xff]  ;;  %v1985_v31 = vcvt.f32.s32 %v11051_v1  ;;  %v1971_v1 = vshll.u32 %v1970_v44, 16 }
 0x2b0   : > { %v9120_v47 = vpop.xlane.xlu0 %4837  ;;  %v1435_v61 = vcvt.f32.s32 %v11049_v60  ;;  %v1984_v60 = vcvt.f32.s32 %v1983_v18 }
 0x2b1   : > { %11045 = vst [vmem:[#allocation50_spill] sm:$0xff] %v9120_v47  ;;  %vm4839_vm0 = vcmp.eq.f32.partialorder %v11046_v33, %v9120_v47  ;;  %v11050_v47 = vld [vmem:[#allocation3_spill] sm:$0xff] }
 0x2b2   : > { %v4840_v43 = vsel %vm4839_vm0, %v4835_v8, inf  ;;  %v4895_v8 = vcvt.s32.f32 %v4893_v24  ;;  %v1436_v2 = vshll.u32 %v1435_v61, 16  ;;  %v1986_v24 = vshll.u32 %v1985_v31, 16 }
 0x2b3   : > { %v9125_v62 = vpop.xlane.xlu1 %2506  ;;  %4841 = vmin.xlane.f32.xlu0 %v4840_v43  ;;  %v1420_v43 = vcvt.f32.s32 %v8839_v10  ;;  %v2015_v10 = vcvt.f32.s32 %v11052_v41 }
 0x2b4   : > { %v9127_v30 = vpop.xlane.xlu0 %4867  ;;  %v1987_v61 = vadd.s32 %v1986_v24, %v1984_v60  ;;  %v11055_v24 = vld [vmem:[#allocation38_spill] sm:$0xff] }
 0x2b5   : > { %11047 = vst [vmem:[#allocation51_spill] sm:$0xff] %v9127_v30  ;;  %vm4869_vm7 = vcmp.eq.f32.partialorder %v11048_v23, %v9127_v30  ;;  %v2016_v19 = vshll.u32 %v2015_v10, 16  ;;  %v2075_v10 = vcvt.f32.s32 %v11055_v24 }
 0x2b6   : > { %v4870_v35 = vsel %vm4869_vm7, %v4865_v36, inf  ;;  %v1437_v36 = vadd.s32 %v1436_v2, %v1434_v15  ;;  %vm2079_vm11 = vcmp.eq.s32.totalorder %v7370_v40, %v1987_v61 }
 0x2b7   : > { %v9133_v58 = vpop.xlane.xlu1 %2536  ;;  %4871 = vmin.xlane.f32.xlu0 %v4870_v35  ;;  %v1421_v35 = vshll.u32 %v1420_v43, 16  ;;  %v11054_v43 = vmov 0.0   ;;  %v2076_v61 = vshll.u32 %v2075_v10, 16  ;;  %v11057_v10 = vld [vmem:[#allocation82_spill] sm:$0xff] }
 0x2b8   : > { %v9135_v33 = vpop.xlane.xlu0 %4897  ;;  %vm1445_vm9 = vcmp.eq.s32.totalorder %v7370_v40, %v1437_v36 }
 0x2b9   : > { %vm4899_vm8 = vcmp.eq.f32.partialorder %v11050_v47, %v9135_v33  ;;  %v2014_v47 = vcvt.f32.s32 %v9104_v34  ;;  %v6709_v2 = vsel %vm1445_vm9, 1.0, %v11054_v43 }
 0x2ba   : > { %v4900_v37 = vsel %vm4899_vm8, %v4895_v8, inf }
 0x2bb   : > { %v9141_v23 = vpop.xlane.xlu1 %2566  ;;  %4901 = vmin.xlane.f32.xlu0 %v4900_v37  ;;  %v2000_v37 = vcvt.f32.s32 %v8861_v59  ;;  %v2017_v34 = vadd.s32 %v2016_v19, %v2014_v47  ;;  %v2044_v59 = vcvt.f32.s32 %v9111_v14 }
 0x2bc   : > { %v1418_v30 = vpop.xlane.xlu0 %1417 }
 0x2bd   : > { %v1419_v4 = vcvt.f32.s32 %v1418_v30  ;;  %v11053_v30 = vld [vmem:[#allocation36_spill] sm:$0xff]  ;;  %v2001_v60 = vshll.u32 %v2000_v37, 16  ;;  %vm2081_vm13 = vcmp.eq.s32.totalorder %v7370_v40, %v2017_v34  ;;  %v2074_v37 = vcvt.f32.s32 %v9118_v53 }
 0x2be   : > { %v2045_v31 = vcvt.f32.s32 %v11053_v30  ;;  %v2060_v30 = vcvt.f32.s32 %v8881_v50  ;;  %v6721_v50 = vsel %vm2081_vm13, 1.0, %v11054_v43 }
 0x2bf   : > { %v1422_v42 = vadd.s32 %v1421_v35, %v1419_v4  ;;  %v9148_v15 = vpop.xlane.xlu1 %2596 }
 0x2c0   : > { %v1968_v8 = vpop.xlane.xlu0 %1967  ;;  %v2046_v44 = vshll.u32 %v2045_v31, 16 }
 0x2c1   : > { %v1969_v18 = vcvt.f32.s32 %v1968_v8  ;;  %vm1444_vm10 = vcmp.eq.s32.totalorder %v7370_v40, %v1422_v42  ;;  %v2030_v42 = vcvt.f32.s32 %v8871_v13  ;;  %v6719_v13 = vsel %vm2079_vm11, 1.0, %v11054_v43 }
 0x2c2   : > { %v6708_v41 = vsel %vm1444_vm10, 1.0, %v11054_v43 }
 0x2c3   : > { %v1972_v4 = vadd.s32 %v1971_v1, %v1969_v18  ;;  %6998 = vmatprep.mubr.msk.f32.mxu1 %vm753_vm14, %v6708_v41  ;;  %v9164_v8 = vpop.xlane.xlu1 %3142  ;;  %v2047_v1 = vadd.s32 %v2046_v44, %v2044_v59  ;;  %v2031_v19 = vshll.u32 %v2030_v42, 16  ;;  %v11056_v41 = vld [vmem:[#allocation42_spill] sm:$0xff]  ;;  %v2077_v59 = vadd.s32 %v2076_v61, %v2074_v37  ;;  %v11058_v61 = vld [vmem:[#allocation33_spill] sm:$0xff] }
 0x2c4   : > { %6999 = vmatmul.mubr.msk.f32.vlgmr.msra.gmra.mxu1 %vm753_vm14, %v6709_v2  ;;  %v1998_v36 = vpop.xlane.xlu0 %1997  ;;  %v2061_v42 = vshll.u32 %v2060_v30, 16  ;;  %v2538_v37 = vcvt.f32.s32 %v9133_v58  ;;  %v2524_v30 = vcvt.f32.s32 %v8899_v5 }
 0x2c5   : > { %7009 = vmatpush3.msra.mxu1 %v11031_v29  ;;  %v1999_v35 = vcvt.f32.s32 %v1998_v36  ;;  %vm2078_vm12 = vcmp.eq.s32.totalorder %v7370_v40, %v1972_v4  ;;  %v2509_v4 = vcvt.f32.s32 %v11056_v41  ;;  %vm2083_vm2 = vcmp.eq.s32.totalorder %v7370_v40, %v2047_v1 }
 0x2c6   : > { %7010 = vmatprep.subr.mxu1 %v11036_v9  ;;  %v6718_v47 = vsel %vm2078_vm12, 1.0, %v11054_v43  ;;  %v2508_v36 = vcvt.f32.s32 %v9125_v62  ;;  %vm2085_vm4 = vcmp.eq.s32.totalorder %v7370_v40, %v2077_v59  ;;  %v2569_v41 = vcvt.f32.s32 %v11058_v61 }
 0x2c7   : > { %v2002_v14 = vadd.s32 %v2001_v60, %v1999_v35  ;;  %7011 = vmatpush3.msra.mxu1 %v11036_v9  ;;  %7005 = vmatprep.mubr.msk.f32.mxu0 %vm753_vm14, %v6718_v47  ;;  %v2494_v35 = vcvt.f32.s32 %v8891_v54  ;;  %v9191_v44 = vpop.xlane.xlu1 %3172  ;;  %v2510_v34 = vshll.u32 %v2509_v4, 16  ;;  %v2539_v47 = vcvt.f32.s32 %v11057_v10 }
 0x2c8   : > { %7022 = vmatprep.subr.mxu1 %v11028_v3  ;;  %7006 = vmatmul.mubr.msk.f32.vlgmr.msra.gmra.mxu0 %vm753_vm14, %v6719_v13  ;;  %v2028_v18 = vpop.xlane.xlu0 %2027  ;;  %v6723_v54 = vsel %vm2083_vm2, 1.0, %v11054_v43  ;;  %v6725_v5 = vsel %vm2085_vm4, 1.0, %v11054_v43  ;;  %v2570_v59 = vshll.u32 %v2569_v41, 16  ;;  %v3130_v61 = vcvt.f32.s32 %v8927_v39 }
 0x2c9   : > { %7016 = vmatpush3.msra.mxu0 %v11022_v22  ;;  %v2029_v31 = vcvt.f32.s32 %v2028_v18  ;;  %vm2080_vm15 = vcmp.eq.s32.totalorder %v7370_v40, %v2002_v14  ;;  %v2511_v13 = vadd.s32 %v2510_v34, %v2508_v36  ;;  %v2540_v1 = vshll.u32 %v2539_v47, 16 }
 0x2ca   : > { %7017 = vmatprep.subr.mxu0 %v11026_v45  ;;  %v6720_v53 = vsel %vm2080_vm15, 1.0, %v11054_v43  ;;  %v2598_v47 = vcvt.f32.s32 %v9148_v15 }
 0x2cb   : > { %v2032_v2 = vadd.s32 %v2031_v19, %v2029_v31  ;;  %7018 = vmatpush3.msra.mxu0 %v11026_v45  ;;  %7012 = vmatprep.mubr.msk.f32.mxu1 %vm753_vm14, %v6720_v53  ;;  %v2495_v19 = vshll.u32 %v2494_v35, 16  ;;  %v9213_v4 = vpop.xlane.xlu1 %3202  ;;  %vm2603_vm6 = vcmp.eq.s32.totalorder %v7370_v40, %v2511_v13 }
 0x2cc   : > { %7029 = vmatprep.subr.mxu0 %v11027_v51  ;;  %7013 = vmatmul.mubr.msk.f32.vlgmr.msra.gmra.mxu1 %vm753_vm14, %v6721_v50  ;;  %v2058_v60 = vpop.xlane.xlu0 %2057  ;;  %v2568_v50 = vcvt.f32.s32 %v9141_v23 }
 0x2cd   : > { %7023 = vmatpush3.msra.mxu1 %v11028_v3  ;;  %v2059_v24 = vcvt.f32.s32 %v2058_v60  ;;  %vm2082_vm3 = vcmp.eq.s32.totalorder %v7370_v40, %v2032_v2  ;;  %v2541_v2 = vadd.s32 %v2540_v1, %v2538_v37  ;;  %v2525_v60 = vshll.u32 %v2524_v30, 16 }
 0x2ce   : > { %7024 = vmatprep.subr.mxu1 %v11030_v12  ;;  %v6722_v62 = vsel %vm2082_vm3, 1.0, %v11054_v43  ;;  %v2571_v10 = vadd.s32 %v2570_v59, %v2568_v50 }
 0x2cf   : > { %v2062_v14 = vadd.s32 %v2061_v42, %v2059_v24  ;;  %7025 = vmatpush3.msra.mxu1 %v11030_v12  ;;  %7019 = vmatprep.mubr.msk.f32.mxu0 %vm753_vm14, %v6722_v62  ;;  %v2554_v42 = vcvt.f32.s32 %v8909_v46  ;;  %v2599_v24 = vcvt.f32.s32 %v8767_v63  ;;  %v6735_v46 = vsel %vm2603_vm6, 1.0, %v11054_v43 }
 0x2d0   : > { %7036 = vmatprep.subr.mxu1 %v11031_v29  ;;  %7020 = vmatmul.mubr.msk.f32.vlgmr.msra.gmra.mxu0 %vm753_vm14, %v6723_v54  ;;  %v2492_v18 = vpop.xlane.xlu0 %2491  ;;  %vm2605_vm0 = vcmp.eq.s32.totalorder %v7370_v40, %v2541_v2  ;;  %v9240_v54 = vpop.xlane.xlu1 %3232  ;;  %vm2607_vm8 = vcmp.eq.s32.totalorder %v7370_v40, %v2571_v10  ;;  %v3204_v10 = vcvt.f32.s32 %v9213_v4 }
 0x2d1   : > { %7030 = vmatpush3.msra.mxu0 %v11027_v51  ;;  %v2493_v31 = vcvt.f32.s32 %v2492_v18  ;;  %vm2084_vm5 = vcmp.eq.s32.totalorder %v7370_v40, %v2062_v14  ;;  %v2555_v62 = vshll.u32 %v2554_v42, 16  ;;  %v2584_v14 = vcvt.f32.s32 %v8919_v32 }
 0x2d2   : > { %7031 = vmatprep.subr.mxu0 %v11034_v0  ;;  %v6724_v58 = vsel %vm2084_vm5, 1.0, %v11054_v43  ;;  %v2600_v13 = vshll.u32 %v2599_v24, 16  ;;  %v3145_v18 = vcvt.f32.s32 %v8780_v6  ;;  %v6737_v32 = vsel %vm2605_vm0, 1.0, %v11054_v43  ;;  %v11059_v24 = vld [vmem:[#allocation39_spill] sm:$0xff] }
 0x2d3   : > { %v2496_v53 = vadd.s32 %v2495_v19, %v2493_v31  ;;  %7032 = vmatpush3.msra.mxu0 %v11034_v0  ;;  %7026 = vmatprep.mubr.msk.f32.mxu1 %vm753_vm14, %v6724_v58  ;;  %v3144_v31 = vcvt.f32.s32 %v9164_v8  ;;  %v2585_v1 = vshll.u32 %v2584_v14, 16  ;;  %v6739_v39 = vsel %vm2607_vm8, 1.0, %v11054_v43 }
 0x2d4   : > { %7043 = vmatprep.subr.mxu0 %v11022_v22  ;;  %7027 = vmatmul.mubr.msk.f32.vlgmr.msra.gmra.mxu1 %vm753_vm14, %v6725_v5  ;;  %v2522_v36 = vpop.xlane.xlu0 %2521  ;;  %v2601_v30 = vadd.s32 %v2600_v13, %v2598_v47  ;;  %v3146_v58 = vshll.u32 %v3145_v18, 16  ;;  %v9262_v5 = vpop.xlane.xlu1 %3666  ;;  %v3160_v42 = vcvt.f32.s32 %v8937_v26  ;;  %v3235_v18 = vcvt.f32.s32 %v8822_v52 }
 0x2d5   : > { %7037 = vmatpush3.msra.mxu1 %v11031_v29  ;;  %v2523_v35 = vcvt.f32.s32 %v2522_v36  ;;  %vm2602_vm1 = vcmp.eq.s32.totalorder %v7370_v40, %v2496_v53  ;;  %v3175_v53 = vcvt.f32.s32 %v8794_v20  ;;  %v3174_v20 = vcvt.f32.s32 %v9191_v44 }
 0x2d6   : > { %7038 = vmatprep.subr.mxu1 %v11036_v9  ;;  %v6734_v23 = vsel %vm2602_vm1, 1.0, %v11054_v43  ;;  %vm2609_vm10 = vcmp.eq.s32.totalorder %v7370_v40, %v2601_v30  ;;  %v3147_v50 = vadd.s32 %v3146_v58, %v3144_v31  ;;  %v3220_v31 = vcvt.f32.s32 %v8955_v49 }
 0x2d7   : > { %v2526_v34 = vadd.s32 %v2525_v60, %v2523_v35  ;;  %7039 = vmatpush3.msra.mxu1 %v11036_v9  ;;  %7033 = vmatprep.mubr.msk.f32.mxu0 %vm753_vm14, %v6734_v23  ;;  %v3131_v60 = vshll.u32 %v3130_v61, 16  ;;  %v3176_v59 = vshll.u32 %v3175_v53, 16  ;;  %v3205_v23 = vcvt.f32.s32 %v11059_v24 }
 0x2d8   : > { %7050 = vmatprep.subr.mxu1 %v11028_v3  ;;  %7034 = vmatmul.mubr.msk.f32.vlgmr.msra.gmra.mxu0 %vm753_vm14, %v6735_v46  ;;  %v2552_v63 = vpop.xlane.xlu0 %2551  ;;  %v6741_v26 = vsel %vm2609_vm10, 1.0, %v11054_v43  ;;  %vm3239_vm12 = vcmp.eq.s32.totalorder %v7370_v40, %v3147_v50  ;;  %v9289_v14 = vpop.xlane.xlu1 %3696  ;;  %v3669_v61 = vcvt.f32.s32 %v8836_v57  ;;  %v3668_v57 = vcvt.f32.s32 %v9262_v5 }
 0x2d9   : > { %7044 = vmatpush3.msra.mxu0 %v11022_v22  ;;  %v2553_v37 = vcvt.f32.s32 %v2552_v63  ;;  %vm2604_vm7 = vcmp.eq.s32.totalorder %v7370_v40, %v2526_v34  ;;  %v3177_v46 = vadd.s32 %v3176_v59, %v3174_v20  ;;  %v3161_v63 = vshll.u32 %v3160_v42, 16 }
 0x2da   : > { %7045 = vmatprep.subr.mxu0 %v11026_v45  ;;  %v6736_v15 = vsel %vm2604_vm7, 1.0, %v11054_v43  ;;  %v3206_v13 = vshll.u32 %v3205_v23, 16  ;;  %v3670_v20 = vshll.u32 %v3669_v61, 16  ;;  %v3684_v24 = vcvt.f32.s32 %v8975_v48 }
 0x2db   : > { %v2556_v19 = vadd.s32 %v2555_v62, %v2553_v37  ;;  %7046 = vmatpush3.msra.mxu0 %v11026_v45  ;;  %7040 = vmatprep.mubr.msk.f32.mxu1 %vm753_vm14, %v6736_v15  ;;  %v3190_v62 = vcvt.f32.s32 %v8947_v38  ;;  %v6751_v38 = vsel %vm3239_vm12, 1.0, %v11054_v43  ;;  %vm3241_vm15 = vcmp.eq.s32.totalorder %v7370_v40, %v3177_v46 }
 0x2dc   : > { %7057 = vmatprep.subr.mxu0 %v11027_v51  ;;  %7041 = vmatmul.mubr.msk.f32.vlgmr.msra.gmra.mxu1 %vm753_vm14, %v6737_v32  ;;  %v2582_v6 = vpop.xlane.xlu0 %2581  ;;  %v3234_v32 = vcvt.f32.s32 %v9240_v54  ;;  %v6753_v49 = vsel %vm3241_vm15, 1.0, %v11054_v43  ;;  %v3671_v42 = vadd.s32 %v3670_v20, %v3668_v57 }
 0x2dd   : > { %7051 = vmatpush3.msra.mxu1 %v11028_v3  ;;  %v2583_v41 = vcvt.f32.s32 %v2582_v6  ;;  %vm2606_vm9 = vcmp.eq.s32.totalorder %v7370_v40, %v2556_v19  ;;  %v3207_v19 = vadd.s32 %v3206_v13, %v3204_v10  ;;  %v3191_v30 = vshll.u32 %v3190_v62, 16 }
 0x2de   : > { %7052 = vmatprep.subr.mxu1 %v11030_v12  ;;  %v6738_v8 = vsel %vm2606_vm9, 1.0, %v11054_v43  ;;  %vm3763_vm1 = vcmp.eq.s32.totalorder %v7370_v40, %v3671_v42  ;;  %v3685_v62 = vshll.u32 %v3684_v24, 16 }
 0x2df   : > { %v2586_v2 = vadd.s32 %v2585_v1, %v2583_v41  ;;  %7053 = vmatpush3.msra.mxu1 %v11030_v12  ;;  %7047 = vmatprep.mubr.msk.f32.mxu0 %vm753_vm14, %v6738_v8  ;;  %v3236_v1 = vshll.u32 %v3235_v18, 16  ;;  %v9311_v41 = vpop.xlane.xlu1 %3726  ;;  %vm3243_vm3 = vcmp.eq.s32.totalorder %v7370_v40, %v3207_v19  ;;  %v3759_v18 = vcvt.f32.s32 %v8869_v16 }
 0x2e0   : > { %7064 = vmatprep.subr.mxu1 %v11031_v29  ;;  %7048 = vmatmul.mubr.msk.f32.vlgmr.msra.gmra.mxu0 %vm753_vm14, %v6739_v39  ;;  %v3128_v36 = vpop.xlane.xlu0 %3127  ;;  %v3654_v39 = vcvt.f32.s32 %v8965_v25  ;;  %v6755_v25 = vsel %vm3243_vm3, 1.0, %v11054_v43 }
 0x2e1   : > { %7058 = vmatpush3.msra.mxu0 %v11027_v51  ;;  %v3129_v35 = vcvt.f32.s32 %v3128_v36  ;;  %vm2608_vm11 = vcmp.eq.s32.totalorder %v7370_v40, %v2586_v2  ;;  %v3237_v53 = vadd.s32 %v3236_v1, %v3234_v32  ;;  %v3221_v2 = vshll.u32 %v3220_v31, 16 }
 0x2e2   : > { %7059 = vmatprep.subr.mxu0 %v11034_v0  ;;  %v6740_v44 = vsel %vm2608_vm11, 1.0, %v11054_v43  ;;  %v3699_v36 = vcvt.f32.s32 %v8848_v55  ;;  %v3655_v59 = vshll.u32 %v3654_v39, 16  ;;  %v4305_v1 = vcvt.f32.s32 %v8879_v21 }
 0x2e3   : > { %v3132_v34 = vadd.s32 %v3131_v60, %v3129_v35  ;;  %7060 = vmatpush3.msra.mxu0 %v11034_v0  ;;  %7054 = vmatprep.mubr.msk.f32.mxu1 %vm753_vm14, %v6740_v44  ;;  %vm3245_vm5 = vcmp.eq.s32.totalorder %v7370_v40, %v3237_v53  ;;  %v3698_v35 = vcvt.f32.s32 %v9289_v14  ;;  %v3757_v23 = vpop.xlane.xlu1 %3756  ;;  %v3714_v14 = vcvt.f32.s32 %v8985_v11 }
 0x2e4   : > { %7071 = vmatprep.subr.mxu0 %v11022_v22  ;;  %7055 = vmatmul.mubr.msk.f32.vlgmr.msra.gmra.mxu1 %vm753_vm14, %v6741_v26  ;;  %v3158_v47 = vpop.xlane.xlu0 %3157  ;;  %v3729_v26 = vcvt.f32.s32 %v8859_v28  ;;  %v6757_v48 = vsel %vm3245_vm5, 1.0, %v11054_v43  ;;  %v6767_v11 = vsel %vm3763_vm1, 1.0, %v11054_v43  ;;  %v3758_v32 = vcvt.f32.s32 %v3757_v23 }
 0x2e5   : > { %7065 = vmatpush3.msra.mxu1 %v11031_v29  ;;  %v3159_v37 = vcvt.f32.s32 %v3158_v47  ;;  %vm3238_vm13 = vcmp.eq.s32.totalorder %v7370_v40, %v3132_v34  ;;  %v3700_v34 = vshll.u32 %v3699_v36, 16  ;;  %v4290_v53 = vcvt.f32.s32 %v9006_v7 }
 0x2e6   : > { %7066 = vmatprep.subr.mxu1 %v11036_v9  ;;  %v6750_v4 = vsel %vm3238_vm13, 1.0, %v11054_v43  ;;  %v3730_v13 = vshll.u32 %v3729_v26, 16  ;;  %v4335_v39 = vcvt.f32.s32 %v8889_v27 }
 0x2e7   : > { %v3162_v15 = vadd.s32 %v3161_v63, %v3159_v37  ;;  %7067 = vmatpush3.msra.mxu1 %v11036_v9  ;;  %7061 = vmatprep.mubr.msk.f32.mxu0 %vm753_vm14, %v6750_v4  ;;  %v3701_v47 = vadd.s32 %v3700_v34, %v3698_v35  ;;  %v3728_v63 = vcvt.f32.s32 %v9311_v41 }
 0x2e8   : > { %7078 = vmatprep.subr.mxu1 %v11028_v3  ;;  %7062 = vmatmul.mubr.msk.f32.vlgmr.msra.gmra.mxu0 %vm753_vm14, %v6751_v38  ;;  %v3188_v52 = vpop.xlane.xlu0 %3187  ;;  %v4336_v35 = vshll.u32 %v4335_v39, 16 }
 0x2e9   : > { %7072 = vmatpush3.msra.mxu0 %v11022_v22  ;;  %v3189_v6 = vcvt.f32.s32 %v3188_v52  ;;  %vm3240_vm2 = vcmp.eq.s32.totalorder %v7370_v40, %v3162_v15  ;;  %v4303_v15 = vpop.xlane.xlu1 %4302  ;;  %vm3765_vm7 = vcmp.eq.s32.totalorder %v7370_v40, %v3701_v47  ;;  %v3731_v19 = vadd.s32 %v3730_v13, %v3728_v63 }
 0x2ea   : > { %7073 = vmatprep.subr.mxu0 %v11026_v45  ;;  %v6752_v54 = vsel %vm3240_vm2, 1.0, %v11054_v43  ;;  %v3715_v52 = vshll.u32 %v3714_v14, 16 }
 0x2eb   : > { %v3192_v58 = vadd.s32 %v3191_v30, %v3189_v6  ;;  %7074 = vmatpush3.msra.mxu0 %v11026_v45  ;;  %7068 = vmatprep.mubr.msk.f32.mxu1 %vm753_vm14, %v6752_v54  ;;  %v3744_v30 = vcvt.f32.s32 %v8993_v56  ;;  %v3760_v6 = vshll.u32 %v3759_v18, 16  ;;  %v6769_v56 = vsel %vm3765_vm7, 1.0, %v11054_v43  ;;  %v11061_v18 = vld [vmem:[#allocation47_spill] sm:$0xff] }
 0x2ec   : > { %7085 = vmatprep.subr.mxu0 %v11027_v51  ;;  %7069 = vmatmul.mubr.msk.f32.vlgmr.msra.gmra.mxu1 %vm753_vm14, %v6753_v49  ;;  %v3218_v8 = vpop.xlane.xlu0 %3217  ;;  %vm3767_vm9 = vcmp.eq.s32.totalorder %v7370_v40, %v3731_v19 }
 0x2ed   : > { %7079 = vmatpush3.msra.mxu1 %v11028_v3  ;;  %v3219_v50 = vcvt.f32.s32 %v3218_v8  ;;  %vm3242_vm4 = vcmp.eq.s32.totalorder %v7370_v40, %v3192_v58  ;;  %v3761_v41 = vadd.s32 %v3760_v6, %v3758_v32  ;;  %v4304_v58 = vcvt.f32.s32 %v4303_v15  ;;  %v4333_v57 = vpop.xlane.xlu1 %4332 }
 0x2ee   : > { %7080 = vmatprep.subr.mxu1 %v11030_v12  ;;  %v6754_v5 = vsel %vm3242_vm4, 1.0, %v11054_v43  ;;  %v3745_v49 = vshll.u32 %v3744_v30, 16  ;;  %v6771_v7 = vsel %vm3767_vm9, 1.0, %v11054_v43  ;;  %v11063_v30 = vld [vmem:[#allocation48_spill] sm:$0xff] }
 0x2ef   : > { %v3222_v60 = vadd.s32 %v3221_v2, %v3219_v50  ;;  %7081 = vmatpush3.msra.mxu1 %v11030_v12  ;;  %7075 = vmatprep.mubr.msk.f32.mxu0 %vm753_vm14, %v6754_v5  ;;  %v4306_v2 = vshll.u32 %v4305_v1, 16  ;;  %vm3769_vm11 = vcmp.eq.s32.totalorder %v7370_v40, %v3761_v41  ;;  %v4334_v5 = vcvt.f32.s32 %v4333_v57  ;;  %v11065_v57 = vld [vmem:[#allocation49_spill] sm:$0xff] }
 0x2f0   : > { %7092 = vmatprep.subr.mxu1 %v11031_v29  ;;  %7076 = vmatmul.mubr.msk.f32.vlgmr.msra.gmra.mxu0 %vm753_vm14, %v6755_v25  ;;  %v3652_v55 = vpop.xlane.xlu0 %3651  ;;  %v4320_v25 = vcvt.f32.s32 %v9023_v17  ;;  %v6773_v24 = vsel %vm3769_vm11, 1.0, %v11054_v43 }
 0x2f1   : > { %7086 = vmatpush3.msra.mxu0 %v11027_v51  ;;  %v3653_v44 = vcvt.f32.s32 %v3652_v55  ;;  %vm3244_vm6 = vcmp.eq.s32.totalorder %v7370_v40, %v3222_v60  ;;  %v4307_v36 = vadd.s32 %v4306_v2, %v4304_v58  ;;  %v4291_v60 = vshll.u32 %v4290_v53, 16  ;;  %v4363_v63 = vpop.xlane.xlu1 %4362 }
 0x2f2   : > { %7087 = vmatprep.subr.mxu0 %v11034_v0  ;;  %v6756_v46 = vsel %vm3244_vm6, 1.0, %v11054_v43  ;;  %v4337_v17 = vadd.s32 %v4336_v35, %v4334_v5  ;;  %v4364_v13 = vcvt.f32.s32 %v4363_v63 }
 0x2f3   : > { %v3656_v10 = vadd.s32 %v3655_v59, %v3653_v44  ;;  %7088 = vmatpush3.msra.mxu0 %v11034_v0  ;;  %7082 = vmatprep.mubr.msk.f32.mxu1 %vm753_vm14, %v6756_v46  ;;  %vm4399_vm13 = vcmp.eq.s32.totalorder %v7370_v40, %v4307_v36  ;;  %v4321_v44 = vshll.u32 %v4320_v25, 16 }
 0x2f4   : > { %7099 = vmatprep.subr.mxu0 %v11022_v22  ;;  %7083 = vmatmul.mubr.msk.f32.vlgmr.msra.gmra.mxu1 %vm753_vm14, %v6757_v48  ;;  %v3682_v28 = vpop.xlane.xlu0 %3681  ;;  %vm4401_vm2 = vcmp.eq.s32.totalorder %v7370_v40, %v4337_v17 }
 0x2f5   : > { %7093 = vmatpush3.msra.mxu1 %v11031_v29  ;;  %v3683_v37 = vcvt.f32.s32 %v3682_v28  ;;  %vm3762_vm0 = vcmp.eq.s32.totalorder %v7370_v40, %v3656_v10  ;;  %v6783_v10 = vsel %vm4399_vm13, 1.0, %v11054_v43  ;;  %v6785_v47 = vsel %vm4401_vm2, 1.0, %v11054_v43  ;;  %v4393_v28 = vpop.xlane.xlu1 %4392 }
 0x2f6   : > { %7094 = vmatprep.subr.mxu1 %v11036_v9  ;;  %v6766_v4 = vsel %vm3762_vm0, 1.0, %v11054_v43  ;;  %v4394_v32 = vcvt.f32.s32 %v4393_v28  ;;  %v11069_v28 = vld [vmem:[#allocation51_spill] sm:$0xff]  ;;  %vm1827_vm2 = vcmask 130112  }
 0x2f7   : > { %v3686_v38 = vadd.s32 %v3685_v62, %v3683_v37  ;;  %7095 = vmatpush3.msra.mxu1 %v11036_v9  ;;  %7089 = vmatprep.mubr.msk.f32.mxu0 %vm753_vm14, %v6766_v4  ;;  %v11060_v62 = vld [vmem:[#allocation12_spill] sm:$0xff]  ;;  %v4350_v4 = vcvt.f32.s32 %v11061_v18  ;;  %v11070_v18 = vld [vmem:[#allocation46_spill] sm:$0xff] }
 0x2f8   : > { %7106 = vmatprep.subr.mxu1 %v11028_v3  ;;  %7090 = vmatmul.mubr.msk.f32.vlgmr.msra.gmra.mxu0 %vm753_vm14, %v6767_v11  ;;  %v3712_v16 = vpop.xlane.xlu0 %3711  ;;  %v4365_v14 = vcvt.f32.s32 %v11060_v62  ;;  %v4874_v62 = vcvt.f32.s32 %v11069_v28 }
 0x2f9   : > { %7100 = vmatpush3.msra.mxu0 %v11022_v22  ;;  %v3713_v31 = vcvt.f32.s32 %v3712_v16  ;;  %vm3764_vm8 = vcmp.eq.s32.totalorder %v7370_v40, %v3686_v38  ;;  %v4827_v37 = vpop.xlane.xlu1 %4826  ;;  %v11062_v38 = vld [vmem:[#allocation41_spill] sm:$0xff] }
 0x2fa   : > { %7101 = vmatprep.subr.mxu0 %v11026_v45  ;;  %v6768_v61 = vsel %vm3764_vm8, 1.0, %v11054_v43  ;;  %v4366_v15 = vshll.u32 %v4365_v14, 16  ;;  %v4395_v11 = vcvt.f32.s32 %v11062_v38 }
 0x2fb   : > { %v3716_v54 = vadd.s32 %v3715_v52, %v3713_v31  ;;  %7102 = vmatpush3.msra.mxu0 %v11026_v45  ;;  %7096 = vmatprep.mubr.msk.f32.mxu1 %vm753_vm14, %v6768_v61  ;;  %v4351_v52 = vshll.u32 %v4350_v4, 16  ;;  %v4380_v31 = vcvt.f32.s32 %v11063_v30  ;;  %v4919_v4 = vcvt.f32.s32 %v11070_v18 }
 0x2fc   : > { %7113 = vmatprep.subr.mxu0 %v11027_v51  ;;  %7097 = vmatmul.mubr.msk.f32.vlgmr.msra.gmra.mxu1 %vm753_vm14, %v6769_v56  ;;  %v3742_v21 = vpop.xlane.xlu0 %3741  ;;  %v4367_v19 = vadd.s32 %v4366_v15, %v4364_v13  ;;  %v4396_v61 = vshll.u32 %v4395_v11, 16  ;;  %v4904_v30 = vcvt.f32.s32 %v9135_v33 }
 0x2fd   : > { %7107 = vmatpush3.msra.mxu1 %v11028_v3  ;;  %v3743_v8 = vcvt.f32.s32 %v3742_v21  ;;  %vm3766_vm10 = vcmp.eq.s32.totalorder %v7370_v40, %v3716_v54  ;;  %v4857_v6 = vpop.xlane.xlu1 %4856  ;;  %v11064_v54 = vld [vmem:[#allocation43_spill] sm:$0xff]  ;;  %v4828_v21 = vcvt.f32.s32 %v4827_v37  ;;  %v4381_v53 = vshll.u32 %v4380_v31, 16 }
 0x2fe   : > { %7108 = vmatprep.subr.mxu1 %v11030_v12  ;;  %v6770_v50 = vsel %vm3766_vm10, 1.0, %v11054_v43  ;;  %v4829_v56 = vcvt.f32.s32 %v11064_v54  ;;  %vm4403_vm4 = vcmp.eq.s32.totalorder %v7370_v40, %v4367_v19  ;;  %v4397_v58 = vadd.s32 %v4396_v61, %v4394_v32 }
 0x2ff   : > { %v3746_v20 = vadd.s32 %v3745_v49, %v3743_v8  ;;  %7109 = vmatpush3.msra.mxu1 %v11030_v12  ;;  %7103 = vmatprep.mubr.msk.f32.mxu0 %vm753_vm14, %v6770_v50  ;;  %v4814_v8 = vcvt.f32.s32 %v11065_v57  ;;  %v11066_v50 = vld [vmem:[#allocation44_spill] sm:$0xff]  ;;  %v4858_v25 = vcvt.f32.s32 %v4857_v6  ;;  %v4920_v6 = vshll.u32 %v4919_v4, 16 }
 0x300   : > { %7120 = vmatprep.subr.mxu1 %v11031_v29  ;;  %7104 = vmatmul.mubr.msk.f32.vlgmr.msra.gmra.mxu0 %vm753_vm14, %v6771_v7  ;;  %v4288_v27 = vpop.xlane.xlu0 %4287  ;;  %v4830_v39 = vshll.u32 %v4829_v56, 16  ;;  %vm4405_vm6 = vcmp.eq.s32.totalorder %v7370_v40, %v4397_v58 }
 0x301   : > { %7114 = vmatpush3.msra.mxu0 %v11027_v51  ;;  %v4289_v42 = vcvt.f32.s32 %v4288_v27  ;;  %vm3768_vm12 = vcmp.eq.s32.totalorder %v7370_v40, %v3746_v20  ;;  %v4859_v20 = vcvt.f32.s32 %v11066_v50  ;;  %v4887_v36 = vpop.xlane.xlu1 %4886  ;;  %v6787_v27 = vsel %vm4403_vm4, 1.0, %v11054_v43 }
 0x302   : > { %7115 = vmatprep.subr.mxu0 %v11034_v0  ;;  %v6772_v55 = vsel %vm3768_vm12, 1.0, %v11054_v43  ;;  %v4815_v35 = vshll.u32 %v4814_v8, 16  ;;  %vm1877_vm4 = vcmask 261312  }
 0x303   : > { %v4292_v59 = vadd.s32 %v4291_v60, %v4289_v42  ;;  %7116 = vmatpush3.msra.mxu0 %v11034_v0  ;;  %7110 = vmatprep.mubr.msk.f32.mxu1 %vm753_vm14, %v6772_v55  ;;  %v4831_v60 = vadd.s32 %v4830_v39, %v4828_v21  ;;  %v11067_v55 = vld [vmem:[#allocation50_spill] sm:$0xff]  ;;  %v4860_v17 = vshll.u32 %v4859_v20, 16 }
 0x304   : > { %7127 = vmatprep.subr.mxu0 %v11022_v22  ;;  %7111 = vmatmul.mubr.msk.f32.vlgmr.msra.gmra.mxu1 %vm753_vm14, %v6773_v24  ;;  %v4318_v23 = vpop.xlane.xlu0 %4317 }
 0x305   : > { %7121 = vmatpush3.msra.mxu1 %v11031_v29  ;;  %v4319_v34 = vcvt.f32.s32 %v4318_v23  ;;  %vm4398_vm15 = vcmp.eq.s32.totalorder %v7370_v40, %v4292_v59  ;;  %v4844_v59 = vcvt.f32.s32 %v11067_v55  ;;  %v11068_v23 = vld [vmem:[#allocation45_spill] sm:$0xff]  ;;  %vm4923_vm0 = vcmp.eq.s32.totalorder %v7370_v40, %v4831_v60  ;;  %v4917_v14 = vpop.xlane.xlu1 %4916 }
 0x306   : > { %7122 = vmatprep.subr.mxu1 %v11036_v9  ;;  %v6782_v26 = vsel %vm4398_vm15, 1.0, %v11054_v43  ;;  %v6799_v11 = vsel %vm4923_vm0, 1.0, %v11054_v43  ;;  %v4918_v32 = vcvt.f32.s32 %v4917_v14  ;;  %vm1802_vm15 = vcmask 64512  }
 0x307   : > { %v4322_v46 = vadd.s32 %v4321_v44, %v4319_v34  ;;  %7123 = vmatpush3.msra.mxu1 %v11036_v9  ;;  %7117 = vmatprep.mubr.msk.f32.mxu0 %vm753_vm14, %v6782_v26  ;;  %v4889_v44 = vcvt.f32.s32 %v11068_v23  ;;  %v4845_v63 = vshll.u32 %v4844_v59, 16  ;;  %vm6286_vm0 = vcmask 1043456  }
 0x308   : > { %7134 = vmatprep.subr.mxu1 %v11028_v3  ;;  %7118 = vmatmul.mubr.msk.f32.vlgmr.msra.gmra.mxu0 %vm753_vm14, %v6783_v10  ;;  %v4861_v10 = vadd.s32 %v4860_v17, %v4858_v25  ;;  %v4921_v33 = vadd.s32 %v4920_v6, %v4918_v32 }
 0x309   : > { %7128 = vmatpush3.msra.mxu0 %v11022_v22  ;;  %vm4400_vm3 = vcmp.eq.s32.totalorder %v7370_v40, %v4322_v46  ;;  %v6789_v46 = vsel %vm4405_vm6, 1.0, %v11054_v43  ;;  %v4890_v13 = vshll.u32 %v4889_v44, 16  ;;  %vm6276_vm6 = vcmask 1041408  }
 0x30a   : > { %7129 = vmatprep.subr.mxu0 %v11026_v45  ;;  %v6784_v48 = vsel %vm4400_vm3, 1.0, %v11054_v43  ;;  %vm4925_vm8 = vcmp.eq.s32.totalorder %v7370_v40, %v4861_v10  ;;  %vm4929_vm12 = vcmp.eq.s32.totalorder %v7370_v40, %v4921_v33  ;;  %vm1852_vm3 = vcmask 195712  }
 0x30b   : > { %7130 = vmatpush3.msra.mxu0 %v11026_v45  ;;  %7124 = vmatprep.mubr.msk.f32.mxu1 %vm753_vm14, %v6784_v48  ;;  %v4888_v48 = vcvt.f32.s32 %v4887_v36  ;;  %v6801_v54 = vsel %vm4925_vm8, 1.0, %v11054_v43  ;;  %v6805_v39 = vsel %vm4929_vm12, 1.0, %v11054_v43  ;;  %v9503_v36 = vld [vmem:[%s10645_s3] ss:$0 sm:$0xff]  ;;  %vm6296_vm8 = vcmask 1045504  }
 0x30c   : > { %7141 = vmatprep.subr.mxu0 %v11027_v51  ;;  %7125 = vmatmul.mubr.msk.f32.vlgmr.msra.gmra.mxu1 %vm753_vm14, %v6785_v47  ;;  %v9507_v60 = vsub.f32 %v9503_v36, %v11027_v51  ;;  %v9514_v55 = vsub.f32 %v9503_v36, %v11034_v0  ;;  %v9528_v10 = vsub.f32 %v9503_v36, %v11036_v9 }
 0x30d   : > { %7135 = vmatpush3.msra.mxu1 %v11028_v3  ;;  %v4891_v19 = vadd.s32 %v4890_v13, %v4888_v48  ;;  %v9544_v32 = vsub.f32 %v9503_v36, %v11022_v22 }
 0x30e   : > { %7136 = vmatprep.subr.mxu1 %v11030_v12 }
 0x30f   : > { %7137 = vmatpush3.msra.mxu1 %v11030_v12  ;;  %vm4927_vm10 = vcmp.eq.s32.totalorder %v7370_v40, %v4891_v19 }
 0x310   : > { %7148 = vmatprep.subr.mxu1 %v11031_v29  ;;  %v6803_v57 = vsel %vm4927_vm10, 1.0, %v11054_v43  ;;  %vm6592_vm10 = vcmask 126976  }
 0x330   : > { %v4348_v16 = vpop.xlane.xlu0 %4347 }
 0x331   : > { %v4349_v1 = vcvt.f32.s32 %v4348_v16 }
 0x332   : > { %v6951_v21 = vpop.f32.mrf.mxu0 }
 0x333   : > { %v4352_v41 = vadd.s32 %v4351_v52, %v4349_v1  ;;  %v4875_v52 = vshll.u32 %v4874_v62, 16 }
 0x334   : > { %v4378_v49 = vpop.xlane.xlu0 %4377  ;;  %v1010_v8 = vpop.f32.mrf.mxu0 }
 0x335   : > { %v4379_v2 = vcvt.f32.s32 %v4378_v49  ;;  %vm4402_vm5 = vcmp.eq.s32.totalorder %v7370_v40, %v4352_v41  ;;  %v4905_v41 = vshll.u32 %v4904_v30, 16 }
 0x336   : > { %v6786_v7 = vsel %vm4402_vm5, 1.0, %v11054_v43  ;;  %vm6271_vm5 = vcmask 1040384  }
 0x337   : > { %v4382_v5 = vadd.s32 %v4381_v53, %v4379_v2  ;;  %7131 = vmatprep.mubr.msk.f32.mxu0 %vm753_vm14, %v6786_v7 }
 0x338   : > { %7132 = vmatmul.mubr.msk.f32.vlgmr.msra.gmra.mxu0 %vm753_vm14, %v6787_v27  ;;  %v4812_v42 = vpop.xlane.xlu0 %4811 }
 0x339   : > { %7142 = vmatpush3.msra.mxu0 %v11027_v51  ;;  %v4813_v24 = vcvt.f32.s32 %v4812_v42  ;;  %vm4404_vm1 = vcmp.eq.s32.totalorder %v7370_v40, %v4382_v5 }
 0x33a   : > { %7143 = vmatprep.subr.mxu0 %v11034_v0  ;;  %v6788_v34 = vsel %vm4404_vm1, 1.0, %v11054_v43  ;;  %v6958_v20 = vpop.f32.mrf.mxu1  ;;  %vm6281_vm1 = vcmask 1042432  }
 0x33b   : > { %v4816_v26 = vadd.s32 %v4815_v35, %v4813_v24  ;;  %7144 = vmatpush3.msra.mxu0 %v11034_v0  ;;  %7138 = vmatprep.mubr.msk.f32.mxu1 %vm753_vm14, %v6788_v34  ;;  %v9523_v34 = vsub.f32 %v9503_v36, %v11031_v29 }
 0x33c   : > { %7155 = vmatprep.subr.mxu0 %v11022_v22  ;;  %7139 = vmatmul.mubr.msk.f32.vlgmr.msra.gmra.mxu1 %vm753_vm14, %v6789_v46  ;;  %v4842_v47 = vpop.xlane.xlu0 %4841  ;;  %v1091_v5 = vpop.f32.mrf.mxu1 }
 0x33d   : > { %7149 = vmatpush3.msra.mxu1 %v11031_v29  ;;  %v4843_v37 = vcvt.f32.s32 %v4842_v47  ;;  %vm4922_vm7 = vcmp.eq.s32.totalorder %v7370_v40, %v4816_v26 }
 0x33e   : > { %7150 = vmatprep.subr.mxu1 %v11036_v9  ;;  %v6798_v15 = vsel %vm4922_vm7, 1.0, %v11054_v43  ;;  %vm6291_vm7 = vcmask 1044480  }
 0x33f   : > { %v4846_v38 = vadd.s32 %v4845_v63, %v4843_v37  ;;  %7151 = vmatpush3.msra.mxu1 %v11036_v9  ;;  %7145 = vmatprep.mubr.msk.f32.mxu0 %vm753_vm14, %v6798_v15 }
 0x340   : > { %7162 = vmatprep.subr.mxu1 %v11028_v3  ;;  %7146 = vmatmul.mubr.msk.f32.vlgmr.msra.gmra.mxu0 %vm753_vm14, %v6799_v11  ;;  %v4872_v16 = vpop.xlane.xlu0 %4871 }
 0x341   : > { %7156 = vmatpush3.msra.mxu0 %v11022_v22  ;;  %v4873_v31 = vcvt.f32.s32 %v4872_v16  ;;  %vm4924_vm9 = vcmp.eq.s32.totalorder %v7370_v40, %v4846_v38 }
 0x342   : > { %7157 = vmatprep.subr.mxu0 %v11026_v45  ;;  %v6800_v1 = vsel %vm4924_vm9, 1.0, %v11054_v43  ;;  %v6965_v50 = vpop.f32.mrf.mxu0  ;;  %vm6301_vm9 = vcmask 1046528  }
 0x343   : > { %v4876_v61 = vadd.s32 %v4875_v52, %v4873_v31  ;;  %7158 = vmatpush3.msra.mxu0 %v11026_v45  ;;  %7152 = vmatprep.mubr.msk.f32.mxu1 %vm753_vm14, %v6800_v1  ;;  %v9551_v31 = vsub.f32 %v9503_v36, %v11026_v45 }
 0x344   : > { %7153 = vmatmul.mubr.msk.f32.vlgmr.msra.gmra.mxu1 %vm753_vm14, %v6801_v54  ;;  %v4902_v56 = vpop.xlane.xlu0 %4901  ;;  %v9498_v7 = vpop.f32.mrf.mxu0 }
 0x345   : > { %7163 = vmatpush3.msra.mxu1 %v11028_v3  ;;  %v4903_v58 = vcvt.f32.s32 %v4902_v56  ;;  %vm4926_vm11 = vcmp.eq.s32.totalorder %v7370_v40, %v4876_v61  ;;  %v9560_v56 = vsub.f32 %v9503_v36, %v11028_v3 }
 0x346   : > { %7164 = vmatprep.subr.mxu1 %v11030_v12  ;;  %v6802_v49 = vsel %vm4926_vm11, 1.0, %v11054_v43 }
 0x347   : > { %v4906_v53 = vadd.s32 %v4905_v41, %v4903_v58  ;;  %7165 = vmatpush3.msra.mxu1 %v11030_v12  ;;  %7159 = vmatprep.mubr.msk.f32.mxu0 %vm753_vm14, %v6802_v49 }
 0x348   : > { %7160 = vmatmul.mubr.msk.f32.vlgmr.msra.gmra.mxu0 %vm753_vm14, %v6803_v57 }
 0x349   : > { %vm4928_vm13 = vcmp.eq.s32.totalorder %v7370_v40, %v4906_v53 }
 0x34a   : > { %v6804_v2 = vsel %vm4928_vm13, 1.0, %v11054_v43  ;;  %v9509_v42 = vpop.f32.mrf.mxu1 }
 0x34b   : > { %7166 = vmatprep.mubr.msk.f32.mxu1 %vm753_vm14, %v6804_v2 }
 0x34c   : > { %7167 = vmatmul.mubr.msk.f32.vlgmr.msra.gmra.mxu1 %vm753_vm14, %v6805_v39  ;;  %v9518_v23 = vpop.f32.mrf.mxu1 }
 0x352   : > { %v6979_v27 = vpop.f32.mrf.mxu0 }
 0x353   : > { %v1787_v25 = vmax.f32 %v6951_v21, %v6979_v27  ;;  %v9566_v21 = vsub.f32 %v9503_v36, %v11030_v12 }
 0x354   : > { %v1534_v43 = vpop.f32.mrf.mxu0 }
 0x355   : > { %v1795_v35 = vadd.f32 %v1787_v25, %v9507_v60  ;;  %v1786_v59 = vmax.f32 %v1010_v8, %v1534_v43 }
 0x357   : > { %v1794_v24 = vadd.f32 %v1786_v59, %v9514_v55  ;;  %v1806_v17 = vsel %vm1802_vm15, %v1795_v35, -inf  ;;  %v1831_v29 = vsel %vm1827_vm2, %v1795_v35, -inf  ;;  %v1856_v37 = vsel %vm1852_vm3, %v1795_v35, -inf }
 0x358   : > { %1807 = vmax.xlane.f32.xlu1 %v1806_v17  ;;  %v1881_v19 = vsel %vm1877_vm4, %v1795_v35, -inf }
 0x359   : > { %v1803_v51 = vsel %vm1802_vm15, %v1794_v24, -inf  ;;  %v1828_v62 = vsel %vm1827_vm2, %v1794_v24, -inf  ;;  %v1853_v13 = vsel %vm1852_vm3, %v1794_v24, -inf  ;;  %v1878_v52 = vsel %vm1877_vm4, %v1794_v24, -inf }
 0x35a   : > { %v6986_v44 = vpop.f32.mrf.mxu1  ;;  %1804 = vmax.xlane.f32.xlu0 %v1803_v51 }
 0x35b   : > { %v1789_v26 = vmax.f32 %v6958_v20, %v6986_v44 }
 0x35c   : > { %v1615_v46 = vpop.f32.mrf.mxu1 }
 0x35d   : > { %v1797_v0 = vadd.f32 %v1789_v26, %v9523_v34  ;;  %v1788_v48 = vmax.f32 %v1091_v5, %v1615_v46 }
 0x35f   : > { %v1796_v47 = vadd.f32 %v1788_v48, %v9528_v10  ;;  %v1812_v63 = vsel %vm1802_vm15, %v1797_v0, -inf  ;;  %v1837_v14 = vsel %vm1827_vm2, %v1797_v0, -inf  ;;  %v1862_v4 = vsel %vm1852_vm3, %v1797_v0, -inf }
 0x360   : > { %1813 = vmax.xlane.f32.xlu1 %v1812_v63  ;;  %v1887_v6 = vsel %vm1877_vm4, %v1797_v0, -inf }
 0x361   : > { %v1809_v28 = vsel %vm1802_vm15, %v1796_v47, -inf  ;;  %v1834_v9 = vsel %vm1827_vm2, %v1796_v47, -inf  ;;  %v1859_v15 = vsel %vm1852_vm3, %v1796_v47, -inf  ;;  %v1884_v61 = vsel %vm1877_vm4, %v1796_v47, -inf }
 0x362   : > { %1810 = vmax.xlane.f32.xlu0 %v1809_v28  ;;  %v6993_v18 = vpop.f32.mrf.mxu0 }
 0x363   : > { %v1791_v11 = vmax.f32 %v6965_v50, %v6993_v18 }
 0x364   : > { %1832 = vmax.xlane.f32.xlu1 %v1831_v29  ;;  %v1696_v38 = vpop.f32.mrf.mxu0 }
 0x365   : > { %v1790_v16 = vmax.f32 %v9498_v7, %v1696_v38  ;;  %v1799_v30 = vadd.f32 %v1791_v11, %v9544_v32 }
 0x366   : > { %1829 = vmax.xlane.f32.xlu0 %v1828_v62 }
 0x367   : > { %v1798_v1 = vadd.f32 %v1790_v16, %v9551_v31  ;;  %v1818_v22 = vsel %vm1802_vm15, %v1799_v30, -inf  ;;  %v1843_v2 = vsel %vm1827_vm2, %v1799_v30, -inf  ;;  %v1868_v27 = vsel %vm1852_vm3, %v1799_v30, -inf }
 0x368   : > { %1838 = vmax.xlane.f32.xlu1 %v1837_v14  ;;  %v1893_v26 = vsel %vm1877_vm4, %v1799_v30, -inf }
 0x369   : > { %v1815_v54 = vsel %vm1802_vm15, %v1798_v1, -inf  ;;  %v1840_v39 = vsel %vm1827_vm2, %v1798_v1, -inf  ;;  %v1865_v43 = vsel %vm1852_vm3, %v1798_v1, -inf  ;;  %v1890_v0 = vsel %vm1877_vm4, %v1798_v1, -inf }
 0x36a   : > { %1835 = vmax.xlane.f32.xlu0 %v1834_v9 }
 0x36c   : > { %1857 = vmax.xlane.f32.xlu1 %v1856_v37 }
 0x36e   : > { %1854 = vmax.xlane.f32.xlu0 %v1853_v13 }
 0x370   : > { %1863 = vmax.xlane.f32.xlu1 %v1862_v4 }
 0x372   : > { %1860 = vmax.xlane.f32.xlu0 %v1859_v15 }
 0x374   : > { %1882 = vmax.xlane.f32.xlu1 %v1881_v19 }
 0x376   : > { %1879 = vmax.xlane.f32.xlu0 %v1878_v52 }
 0x378   : > { %1888 = vmax.xlane.f32.xlu1 %v1887_v6 }
 0x37a   : > { %1885 = vmax.xlane.f32.xlu0 %v1884_v61 }
 0x37c   : > { %1819 = vmax.xlane.f32.xlu1 %v1818_v22 }
 0x37e   : > { %1816 = vmax.xlane.f32.xlu0 %v1815_v54 }
 0x384   : > { %v7000_v33 = vpop.f32.mrf.mxu1 }
 0x385   : > { %v1793_v45 = vmax.f32 %v9509_v42, %v7000_v33 }
 0x386   : > { %v1777_v41 = vpop.f32.mrf.mxu1 }
 0x387   : > { %v1801_v58 = vadd.f32 %v1793_v45, %v9560_v56  ;;  %v1792_v49 = vmax.f32 %v9518_v23, %v1777_v41 }
 0x388   : > { %v7007_v3 = vpop.f32.mrf.mxu0 }
 0x389   : > { %v1800_v53 = vadd.f32 %v1792_v49, %v9566_v21  ;;  %v1824_v57 = vsel %vm1802_vm15, %v1801_v58, -inf  ;;  %v1849_v12 = vsel %vm1827_vm2, %v1801_v58, -inf  ;;  %v1874_v59 = vsel %vm1852_vm3, %v1801_v58, -inf }
 0x38a   : > { %1825 = vmax.xlane.f32.xlu1 %v1824_v57  ;;  %v2174_v50 = vpop.f32.mrf.mxu0  ;;  %v1899_v28 = vsel %vm1877_vm4, %v1801_v58, -inf }
 0x38b   : > { %v1821_v8 = vsel %vm1802_vm15, %v1800_v53, -inf  ;;  %v1846_v36 = vsel %vm1827_vm2, %v1800_v53, -inf  ;;  %v1871_v17 = vsel %vm1852_vm3, %v1800_v53, -inf  ;;  %v1896_v14 = vsel %vm1877_vm4, %v1800_v53, -inf }
 0x38c   : > { %1822 = vmax.xlane.f32.xlu0 %v1821_v8  ;;  %v7014_v20 = vpop.f32.mrf.mxu1 }
 0x38e   : > { %1844 = vmax.xlane.f32.xlu1 %v1843_v2  ;;  %v2255_v5 = vpop.f32.mrf.mxu1 }
 0x390   : > { %1841 = vmax.xlane.f32.xlu0 %v1840_v39  ;;  %v9575_v7 = vpop.f32.mrf.mxu0 }
 0x392   : > { %1850 = vmax.xlane.f32.xlu1 %v1849_v12  ;;  %v9579_v25 = vpop.f32.mrf.mxu0 }
 0x394   : > { %1847 = vmax.xlane.f32.xlu0 %v1846_v36  ;;  %v9581_v42 = vpop.f32.mrf.mxu1 }
 0x396   : > { %1869 = vmax.xlane.f32.xlu1 %v1868_v27  ;;  %v9585_v24 = vpop.f32.mrf.mxu1 }
 0x398   : > { %1866 = vmax.xlane.f32.xlu0 %v1865_v43  ;;  %v7035_v35 = vpop.f32.mrf.mxu0 }
 0x399   : > { %v2951_v44 = vmax.f32 %v7007_v3, %v7035_v35 }
 0x39a   : > { %1875 = vmax.xlane.f32.xlu1 %v1874_v59  ;;  %v2698_v23 = vpop.f32.mrf.mxu0 }
 0x39b   : > { %v2950_v46 = vmax.f32 %v2174_v50, %v2698_v23  ;;  %v2959_v47 = vadd.f32 %v2951_v44, %v9507_v60 }
 0x39c   : > { %1872 = vmax.xlane.f32.xlu0 %v1871_v17  ;;  %v7042_v51 = vpop.f32.mrf.mxu1 }
 0x39d   : > { %v2953_v63 = vmax.f32 %v7014_v20, %v7042_v51  ;;  %v2958_v29 = vadd.f32 %v2950_v46, %v9514_v55  ;;  %v2969_v37 = vsel %vm1802_vm15, %v2959_v47, -inf  ;;  %v2993_v38 = vsel %vm1827_vm2, %v2959_v47, -inf }
 0x39e   : > { %1894 = vmax.xlane.f32.xlu1 %v1893_v26  ;;  %v2779_v48 = vpop.f32.mrf.mxu1  ;;  %v3017_v52 = vsel %vm1852_vm3, %v2959_v47, -inf  ;;  %v3041_v45 = vsel %vm1877_vm4, %v2959_v47, -inf }
 0x39f   : > { %v2952_v62 = vmax.f32 %v2255_v5, %v2779_v48  ;;  %v2961_v9 = vadd.f32 %v2953_v63, %v9523_v34  ;;  %v2966_v18 = vsel %vm1802_vm15, %v2958_v29, -inf  ;;  %v2990_v11 = vsel %vm1827_vm2, %v2958_v29, -inf }
 0x3a0   : > { %1891 = vmax.xlane.f32.xlu0 %v1890_v0  ;;  %v3014_v30 = vsel %vm1852_vm3, %v2958_v29, -inf  ;;  %v7049_v6 = vpop.f32.mrf.mxu0  ;;  %v3038_v58 = vsel %vm1877_vm4, %v2958_v29, -inf }
 0x3a1   : > { %v2960_v13 = vadd.f32 %v2952_v62, %v9528_v10  ;;  %v2975_v4 = vsel %vm1802_vm15, %v2961_v9, -inf  ;;  %v2999_v19 = vsel %vm1827_vm2, %v2961_v9, -inf  ;;  %v3023_v1 = vsel %vm1852_vm3, %v2961_v9, -inf }
 0x3a2   : > { %1900 = vmax.xlane.f32.xlu1 %v1899_v28  ;;  %v2860_v22 = vpop.f32.mrf.mxu0  ;;  %v2955_v33 = vmax.f32 %v9575_v7, %v7049_v6  ;;  %v3047_v8 = vsel %vm1877_vm4, %v2961_v9, -inf }
 0x3a3   : > { %v2972_v15 = vsel %vm1802_vm15, %v2960_v13, -inf  ;;  %v2996_v16 = vsel %vm1827_vm2, %v2960_v13, -inf  ;;  %v3020_v61 = vsel %vm1852_vm3, %v2960_v13, -inf  ;;  %v2954_v41 = vmax.f32 %v9579_v25, %v2860_v22 }
 0x3a4   : > { %1897 = vmax.xlane.f32.xlu0 %v1896_v14  ;;  %v7056_v54 = vpop.f32.mrf.mxu1  ;;  %v2963_v53 = vadd.f32 %v2955_v33, %v9544_v32  ;;  %v3044_v39 = vsel %vm1877_vm4, %v2960_v13, -inf }
 0x3a5   : > { %v2957_v57 = vmax.f32 %v9581_v42, %v7056_v54  ;;  %v2962_v3 = vadd.f32 %v2954_v41, %v9551_v31 }
 0x3a6   : > { %2970 = vmax.xlane.f32.xlu1 %v2969_v37  ;;  %v2941_v49 = vpop.f32.mrf.mxu1  ;;  %v2981_v20 = vsel %vm1802_vm15, %v2963_v53, -inf  ;;  %v3005_v25 = vsel %vm1827_vm2, %v2963_v53, -inf  ;;  %v3029_v51 = vsel %vm1852_vm3, %v2963_v53, -inf  ;;  %v3053_v14 = vsel %vm1877_vm4, %v2963_v53, -inf }
 0x3a7   : > { %v2956_v2 = vmax.f32 %v9585_v24, %v2941_v49  ;;  %v2965_v50 = vadd.f32 %v2957_v57, %v9560_v56  ;;  %v2978_v7 = vsel %vm1802_vm15, %v2962_v3, -inf  ;;  %v3002_v42 = vsel %vm1827_vm2, %v2962_v3, -inf }
 0x3a8   : > { %2967 = vmax.xlane.f32.xlu0 %v2966_v18  ;;  %v7063_v27 = vpop.f32.mrf.mxu0  ;;  %v3026_v46 = vsel %vm1852_vm3, %v2962_v3, -inf  ;;  %v3050_v37 = vsel %vm1877_vm4, %v2962_v3, -inf }
 0x3a9   : > { %v2964_v12 = vadd.f32 %v2956_v2, %v9566_v21  ;;  %v2987_v36 = vsel %vm1802_vm15, %v2965_v50, -inf  ;;  %v3011_v59 = vsel %vm1827_vm2, %v2965_v50, -inf  ;;  %v3035_v48 = vsel %vm1852_vm3, %v2965_v50, -inf }
 0x3aa   : > { %2976 = vmax.xlane.f32.xlu1 %v2975_v4  ;;  %v3334_v43 = vpop.f32.mrf.mxu0 }
 0x3ab   : > { %v2984_v5 = vsel %vm1802_vm15, %v2964_v12, -inf  ;;  %v3008_v17 = vsel %vm1827_vm2, %v2964_v12, -inf  ;;  %v3032_v63 = vsel %vm1852_vm3, %v2964_v12, -inf }
 0x3ac   : > { %2973 = vmax.xlane.f32.xlu0 %v2972_v15  ;;  %v7070_v35 = vpop.f32.mrf.mxu1  ;;  %v3059_v15 = vsel %vm1877_vm4, %v2965_v50, -inf }
 0x3ae   : > { %2994 = vmax.xlane.f32.xlu1 %v2993_v38  ;;  %v3415_v23 = vpop.f32.mrf.mxu1 }
 0x3b0   : > { %2991 = vmax.xlane.f32.xlu0 %v2990_v11  ;;  %v9627_v24 = vpop.f32.mrf.mxu0 }
 0x3b2   : > { %3000 = vmax.xlane.f32.xlu1 %v2999_v19  ;;  %v9631_v44 = vpop.f32.mrf.mxu0  ;;  %v3056_v19 = vsel %vm1877_vm4, %v2964_v12, -inf }
 0x3b4   : > { %2997 = vmax.xlane.f32.xlu0 %v2996_v16  ;;  %v9633_v26 = vpop.f32.mrf.mxu1 }
 0x3b6   : > { %3018 = vmax.xlane.f32.xlu1 %v3017_v52  ;;  %v9637_v47 = vpop.f32.mrf.mxu1 }
 0x3b8   : > { %3015 = vmax.xlane.f32.xlu0 %v3014_v30  ;;  %v7091_v0 = vpop.f32.mrf.mxu0 }
 0x3b9   : > { %v4111_v62 = vmax.f32 %v7063_v27, %v7091_v0 }
 0x3ba   : > { %3024 = vmax.xlane.f32.xlu1 %v3023_v1  ;;  %v3858_v28 = vpop.f32.mrf.mxu0 }
 0x3bb   : > { %v4110_v9 = vmax.f32 %v3334_v43, %v3858_v28  ;;  %v4119_v18 = vadd.f32 %v4111_v62, %v9507_v60 }
 0x3bc   : > { %3021 = vmax.xlane.f32.xlu0 %v3020_v61  ;;  %v7098_v29 = vpop.f32.mrf.mxu1 }
 0x3bd   : > { %v4113_v4 = vmax.f32 %v7070_v35, %v7098_v29  ;;  %v4118_v38 = vadd.f32 %v4110_v9, %v9514_v55  ;;  %v4129_v30 = vsel %vm1802_vm15, %v4119_v18, -inf  ;;  %v4201_v35 = vsel %vm1877_vm4, %v4119_v18, -inf }
 0x3be   : > { %3042 = vmax.xlane.f32.xlu1 %v3041_v45  ;;  %v3939_v13 = vpop.f32.mrf.mxu1 }
 0x3bf   : > { %v4112_v11 = vmax.f32 %v3415_v23, %v3939_v13  ;;  %v4121_v16 = vadd.f32 %v4113_v4, %v9523_v34  ;;  %v4126_v61 = vsel %vm1802_vm15, %v4118_v38, -inf  ;;  %v4150_v53 = vsel %vm1827_vm2, %v4118_v38, -inf }
 0x3c0   : > { %3039 = vmax.xlane.f32.xlu0 %v3038_v58  ;;  %v4153_v58 = vsel %vm1827_vm2, %v4119_v18, -inf  ;;  %v7105_v12 = vpop.f32.mrf.mxu0  ;;  %v4198_v23 = vsel %vm1877_vm4, %v4118_v38, -inf }
 0x3c1   : > { %v4120_v6 = vadd.f32 %v4112_v11, %v9528_v10  ;;  %v4135_v54 = vsel %vm1802_vm15, %v4121_v16, -inf }
 0x3c2   : > { %3048 = vmax.xlane.f32.xlu1 %v3047_v8  ;;  %v4159_v8 = vsel %vm1827_vm2, %v4121_v16, -inf  ;;  %v4020_v27 = vpop.f32.mrf.mxu0 }
 0x3c3   : > { %v4132_v45 = vsel %vm1802_vm15, %v4120_v6, -inf  ;;  %v4156_v2 = vsel %vm1827_vm2, %v4120_v6, -inf }
 0x3c4   : > { %3045 = vmax.xlane.f32.xlu0 %v3044_v39  ;;  %v4177_v39 = vsel %vm1852_vm3, %v4119_v18, -inf }
 0x3c6   : > { %2982 = vmax.xlane.f32.xlu1 %v2981_v20  ;;  %v4174_v20 = vsel %vm1852_vm3, %v4118_v38, -inf }
 0x3c8   : > { %2979 = vmax.xlane.f32.xlu0 %v2978_v7  ;;  %v7119_v4 = vpop.f32.mrf.mxu0 }
 0x3ca   : > { %2988 = vmax.xlane.f32.xlu1 %v2987_v36  ;;  %v4183_v36 = vsel %vm1852_vm3, %v4121_v16, -inf }
 0x3cc   : > { %2985 = vmax.xlane.f32.xlu0 %v2984_v5  ;;  %v4180_v5 = vsel %vm1852_vm3, %v4120_v6, -inf }
 0x3ce   : > { %3006 = vmax.xlane.f32.xlu1 %v3005_v25  ;;  %v7112_v25 = vpop.f32.mrf.mxu1 }
 0x3cf   : > { %v4117_v0 = vmax.f32 %v9633_v26, %v7112_v25 }
 0x3d0   : > { %3003 = vmax.xlane.f32.xlu0 %v3002_v42  ;;  %v4115_v42 = vmax.f32 %v9627_v24, %v7105_v12 }
 0x3d1   : > { %v9697_v29 = vadd.f32 %v4117_v0, %v9560_v56 }
 0x3d2   : > { %3012 = vmax.xlane.f32.xlu1 %v3011_v59  ;;  %v4114_v59 = vmax.f32 %v9631_v44, %v4020_v27  ;;  %v4204_v44 = vsel %vm1877_vm4, %v4120_v6, -inf }
 0x3d3   : > { %v4171_v6 = vsel %vm1827_vm2, %v9697_v29, -inf }
 0x3d4   : > { %3009 = vmax.xlane.f32.xlu0 %v3008_v17  ;;  %v4122_v24 = vadd.f32 %v4114_v59, %v9551_v31 }
 0x3d6   : > { %3030 = vmax.xlane.f32.xlu1 %v3029_v51  ;;  %v4101_v51 = vpop.f32.mrf.mxu1  ;;  %v4138_v9 = vsel %vm1802_vm15, %v4122_v24, -inf  ;;  %v4162_v11 = vsel %vm1827_vm2, %v4122_v24, -inf  ;;  %v4186_v27 = vsel %vm1852_vm3, %v4122_v24, -inf  ;;  %v4210_v0 = vsel %vm1877_vm4, %v4122_v24, -inf }
 0x3d8   : > { %3027 = vmax.xlane.f32.xlu0 %v3026_v46  ;;  %v4123_v46 = vadd.f32 %v4115_v42, %v9544_v32 }
 0x3da   : > { %3036 = vmax.xlane.f32.xlu1 %v3035_v48  ;;  %v4207_v48 = vsel %vm1877_vm4, %v4121_v16, -inf  ;;  %v5514_v16 = vadd.s32 4294967288, %v7370_v40 }
 0x3dc   : > { %3033 = vmax.xlane.f32.xlu0 %v3032_v63  ;;  %v4116_v63 = vmax.f32 %v9637_v47, %v4101_v51 }
 0x3de   : > { %3054 = vmax.xlane.f32.xlu1 %v3053_v14  ;;  %v4141_v14 = vsel %vm1802_vm15, %v4123_v46, -inf  ;;  %v9703_v26 = vadd.f32 %v4116_v63, %v9566_v21 }
 0x3e0   : > { %3051 = vmax.xlane.f32.xlu0 %v3050_v37  ;;  %v4147_v37 = vsel %vm1802_vm15, %v9697_v29, -inf  ;;  %v4144_v18 = vsel %vm1802_vm15, %v9703_v26, -inf }
 0x3e1   : > { %v9647_v52 = vpop.xlane.xlu1 %1807 }
 0x3e2   : > { %3060 = vmax.xlane.f32.xlu1 %v3059_v15  ;;  %v4165_v15 = vsel %vm1827_vm2, %v4123_v46, -inf }
 0x3e3   : > { %v9651_v1 = vpop.xlane.xlu0 %1804 }
 0x3e4   : > { %3057 = vmax.xlane.f32.xlu0 %v3056_v19  ;;  %v4494_v19 = vpop.f32.mrf.mxu0 }
 0x3e6   : > { %4130 = vmax.xlane.f32.xlu1 %v4129_v30 }
 0x3e8   : > { %4127 = vmax.xlane.f32.xlu0 %v4126_v61 }
 0x3e9   : > { %v9654_v22 = vpop.xlane.xlu1 %1813 }
 0x3ea   : > { %4136 = vmax.xlane.f32.xlu1 %v4135_v54 }
 0x3eb   : > { %v9657_v33 = vpop.xlane.xlu0 %1810 }
 0x3ec   : > { %4133 = vmax.xlane.f32.xlu0 %v4132_v45  ;;  %v4168_v45 = vsel %vm1827_vm2, %v9703_v26, -inf }
 0x3ed   : > { %v9660_v41 = vpop.xlane.xlu1 %1832 }
 0x3ee   : > { %4154 = vmax.xlane.f32.xlu1 %v4153_v58  ;;  %v11071_v58 = vld [vmem:[#allocation2_spill] sm:$0xff] }
 0x3ef   : > { %v9663_v49 = vpop.xlane.xlu0 %1829 }
 0x3f0   : > { %4151 = vmax.xlane.f32.xlu0 %v4150_v53  ;;  %v9730_v53 = vsub.s32 %v5514_v16, %v11071_v58 }
 0x3f1   : > { %v9666_v57 = vpop.xlane.xlu1 %1838 }
 0x3f2   : > { %4160 = vmax.xlane.f32.xlu1 %v4159_v8  ;;  %v9734_v8 = vsub.s32 %v7370_v40, %v11071_v58 }
 0x3f3   : > { %v9669_v3 = vpop.xlane.xlu0 %1835 }
 0x3f4   : > { %4157 = vmax.xlane.f32.xlu0 %v4156_v2 }
 0x3f5   : > { %v9673_v50 = vpop.xlane.xlu1 %1857 }
 0x3f6   : > { %4178 = vmax.xlane.f32.xlu1 %v4177_v39  ;;  %v4189_v39 = vsel %vm1852_vm3, %v4123_v46, -inf  ;;  %v5614_v24 = vrot.slane %v9673_v50, %v9730_v53 }
 0x3f7   : > { %v9676_v7 = vpop.xlane.xlu0 %1854 }
 0x3f8   : > { %4175 = vmax.xlane.f32.xlu0 %v4174_v20  ;;  %v9723_v61 = vpop.f32.mrf.mxu0 }
 0x3f9   : > { %v9681_v43 = vpop.xlane.xlu1 %1863 }
 0x3fa   : > { %4184 = vmax.xlane.f32.xlu1 %v4183_v36  ;;  %v9739_v20 = vpop.f32.mrf.mxu0 }
 0x3fb   : > { %v9685_v17 = vpop.xlane.xlu0 %1860 }
 0x3fc   : > { %4181 = vmax.xlane.f32.xlu0 %v4180_v5 }
 0x3fd   : > { %v9693_v28 = vpop.xlane.xlu1 %1882 }
 0x3fe   : > { %4202 = vmax.xlane.f32.xlu1 %v4201_v35  ;;  %v4213_v35 = vsel %vm1877_vm4, %v4123_v46, -inf }
 0x3ff   : > { %v9699_v62 = vpop.xlane.xlu0 %1879 }
 0x400   : > { %4199 = vmax.xlane.f32.xlu0 %v4198_v23  ;;  %v7147_v40 = vpop.f32.mrf.mxu0 }
 0x401   : > { %v9706_v47 = vpop.xlane.xlu1 %1888  ;;  %v5271_v46 = vmax.f32 %v7119_v4, %v7147_v40 }
 0x402   : > { %4208 = vmax.xlane.f32.xlu1 %v4207_v48  ;;  %v9759_v48 = vpop.f32.mrf.mxu1  ;;  %v5018_v63 = vpop.f32.mrf.mxu0 }
 0x403   : > { %v9710_v13 = vpop.xlane.xlu0 %1885 }
 0x404   : > { %4205 = vmax.xlane.f32.xlu0 %v4204_v44 }
 0x405   : > { %v9715_v38 = vpop.xlane.xlu1 %1819 }
 0x406   : > { %4142 = vmax.xlane.f32.xlu1 %v4141_v14 }
 0x407   : > { %v9719_v30 = vpop.xlane.xlu0 %1816 }
 0x408   : > { %4139 = vmax.xlane.f32.xlu0 %v4138_v9  ;;  %v5532_v16 = vrot.slane %v9719_v30, %v9734_v8 }
 0x40a   : > { %4148 = vmax.xlane.f32.xlu1 %v4147_v37  ;;  %v4195_v37 = vsel %vm1852_vm3, %v9697_v29, -inf }
 0x40c   : > { %4145 = vmax.xlane.f32.xlu0 %v4144_v18 }
 0x40e   : > { %4166 = vmax.xlane.f32.xlu1 %v4165_v15 }
 0x410   : > { %4163 = vmax.xlane.f32.xlu0 %v4162_v11  ;;  %v5270_v11 = vmax.f32 %v4494_v19, %v5018_v63 }
 0x412   : > { %4172 = vmax.xlane.f32.xlu1 %v4171_v6  ;;  %v4192_v6 = vsel %vm1852_vm3, %v9703_v26, -inf }
 0x413   : > { %v9725_v54 = vpop.xlane.xlu1 %1825 }
 0x414   : > { %4169 = vmax.xlane.f32.xlu0 %v4168_v45  ;;  %v5545_v12 = vrot.slane %v9725_v54, %v9730_v53  ;;  %v4575_v45 = vpop.f32.mrf.mxu1 }
 0x415   : > { %v9736_v2 = vpop.xlane.xlu0 %1822 }
 0x416   : > { %v5541_v36 = vrot.slane %v9736_v2, %v9734_v8  ;;  %4190 = vmax.xlane.f32.xlu1 %v4189_v39  ;;  %v5279_v39 = vadd.f32 %v5271_v46, %v9507_v60  ;;  %v9789_v40 = vpop.f32.mrf.mxu1  ;;  %v5278_v60 = vadd.f32 %v5270_v11, %v9514_v55 }
 0x417   : > { %v9745_v5 = vpop.xlane.xlu1 %1844 }
 0x418   : > { %v5546_v25 = vsel %vm1827_vm2, %v5545_v12, %v5541_v36  ;;  %4187 = vmax.xlane.f32.xlu0 %v4186_v27  ;;  %v5584_v59 = vrot.slane %v9745_v5, %v9730_v53  ;;  %v5536_v12 = vrot.slane %v9715_v38, %v9730_v53  ;;  %v4219_v27 = vsel %vm1877_vm4, %v9697_v29, -inf }
 0x419   : > { %v9749_v42 = vpop.xlane.xlu0 %1841  ;;  %v5289_v55 = vsel %vm1802_vm15, %v5279_v39, -inf  ;;  %v5286_v11 = vsel %vm1802_vm15, %v5278_v60, -inf }
 0x41a   : > { %v5580_v23 = vrot.slane %v9749_v42, %v9734_v8  ;;  %4214 = vmax.xlane.f32.xlu1 %v4213_v35 }
 0x41b   : > { %v9756_v51 = vpop.xlane.xlu1 %1850 }
 0x41c   : > { %v5585_v44 = vsel %vm1827_vm2, %v5584_v59, %v5580_v23  ;;  %4211 = vmax.xlane.f32.xlu0 %v4210_v0  ;;  %v5593_v18 = vrot.slane %v9756_v51, %v9730_v53  ;;  %v5537_v23 = vsel %vm1827_vm2, %v5536_v12, %v5532_v16 }
 0x41d   : > { %v9764_v9 = vpop.xlane.xlu0 %1847  ;;  %v6274_v29 = vsel %vm6271_vm5, %v5537_v23, %v5585_v44 }
 0x41e   : > { %v5589_v15 = vrot.slane %v9764_v9, %v9734_v8  ;;  %4196 = vmax.xlane.f32.xlu1 %v4195_v37 }
 0x41f   : > { %v9776_v4 = vpop.xlane.xlu1 %1869 }
 0x420   : > { %11072 = vst [vmem:[#allocation52_spill] sm:$0xff] %v9776_v4  ;;  %v5594_v58 = vsel %vm1827_vm2, %v5593_v18, %v5589_v15  ;;  %4193 = vmax.xlane.f32.xlu0 %v4192_v6  ;;  %v5632_v35 = vrot.slane %v9776_v4, %v9730_v53  ;;  %v9809_v18 = vpop.f32.mrf.mxu1 }
 0x421   : > { %v6275_v19 = vsel %vm6271_vm5, %v5546_v25, %v5594_v58  ;;  %v9785_v36 = vpop.xlane.xlu0 %1866  ;;  %v4216_v25 = vsel %vm1877_vm4, %v9703_v26, -inf  ;;  %v5575_v58 = vrot.slane %v9666_v57, %v9730_v53 }
 0x422   : > { %11073 = vst [vmem:[#allocation53_spill] sm:$0xff] %v9785_v36  ;;  %v5628_v59 = vrot.slane %v9785_v36, %v9734_v8  ;;  %4220 = vmax.xlane.f32.xlu1 %v4219_v27  ;;  %v7154_v16 = vpop.f32.mrf.mxu1 }
 0x423   : > { %v9797_v0 = vpop.xlane.xlu1 %1875 }
 0x424   : > { %11074 = vst [vmem:[#allocation5_spill] sm:$0xff] %v9797_v0  ;;  %v5633_v63 = vsel %vm1827_vm2, %v5632_v35, %v5628_v59  ;;  %4217 = vmax.xlane.f32.xlu0 %v4216_v25  ;;  %v5641_v15 = vrot.slane %v9797_v0, %v9730_v53  ;;  %v5313_v35 = vsel %vm1827_vm2, %v5279_v39, -inf  ;;  %v5310_v25 = vsel %vm1827_vm2, %v5278_v60, -inf }
 0x425   : > { %v9804_v46 = vsel %vm6276_vm6, %v6274_v29, %v5633_v63  ;;  %v9806_v37 = vpop.xlane.xlu0 %1872  ;;  %v5099_v29 = vpop.f32.mrf.mxu1  ;;  %v5383_v0 = vmax.f32 %v9647_v52, %v9660_v41 }
 0x426   : > { %11075 = vst [vmem:[#allocation54_spill] sm:$0xff] %v9806_v37  ;;  %v5637_v26 = vrot.slane %v9806_v37, %v9734_v8  ;;  %5290 = vmax.xlane.f32.xlu1 %v5289_v55 }
 0x427   : > { %v9815_v44 = vpop.xlane.xlu1 %1894 }
 0x428   : > { %v5642_v6 = vsel %vm1827_vm2, %v5641_v15, %v5637_v26  ;;  %5287 = vmax.xlane.f32.xlu0 %v5286_v11  ;;  %v5337_v15 = vsel %vm1852_vm3, %v5279_v39, -inf  ;;  %v5272_v11 = vmax.f32 %v4575_v45, %v5099_v29  ;;  %v5523_v45 = vrot.slane %v9657_v33, %v9734_v8 }
 0x429   : > { %v9822_v12 = vsel %vm6276_vm6, %v6275_v19, %v5642_v6  ;;  %v9824_v27 = vpop.xlane.xlu0 %1891  ;;  %v5273_v19 = vmax.f32 %v9759_v48, %v7154_v16  ;;  %v5361_v48 = vsel %vm1877_vm4, %v5279_v39, -inf  ;;  %v5562_v16 = vrot.slane %v9663_v49, %v9734_v8 }
 0x42a   : > { %11076 = vst [vmem:[#allocation6_spill] sm:$0xff] %v9822_v12  ;;  %5314 = vmax.xlane.f32.xlu1 %v5313_v35  ;;  %v5334_v35 = vsel %vm1852_vm3, %v5278_v60, -inf  ;;  %v9856_v29 = vadd.f32 %v5272_v11, %v9528_v10  ;;  %v5566_v39 = vrot.slane %v9660_v41, %v9730_v53  ;;  %v5518_v26 = vrot.slane %v9647_v52, %v9730_v53 }
 0x42b   : > { %v9829_v23 = vpop.xlane.xlu1 %1900  ;;  %v9844_v59 = vadd.f32 %v5273_v19, %v9523_v34  ;;  %v5358_v34 = vsel %vm1877_vm4, %v5278_v60, -inf  ;;  %v5571_v19 = vrot.slane %v9669_v3, %v9734_v8  ;;  %v5527_v10 = vrot.slane %v9654_v22, %v9730_v53 }
 0x42c   : > { %5311 = vmax.xlane.f32.xlu0 %v5310_v25  ;;  %v5567_v63 = vsel %vm1827_vm2, %v5566_v39, %v5562_v16  ;;  %v5292_v16 = vsel %vm1802_vm15, %v9856_v29, -inf  ;;  %v5623_v12 = vrot.slane %v9681_v43, %v9730_v53  ;;  %v5382_v52 = vmax.f32 %v9651_v1, %v9663_v49 }
 0x42d   : > { %v9835_v55 = vpop.xlane.xlu0 %1897  ;;  %v5295_v60 = vsel %vm1802_vm15, %v9844_v59, -inf  ;;  %v5528_v37 = vsel %vm1827_vm2, %v5527_v10, %v5523_v45  ;;  %v5576_v39 = vsel %vm1827_vm2, %v5575_v58, %v5571_v19  ;;  %v5384_v45 = vmax.f32 %v9657_v33, %v9669_v3 }
 0x42e   : > { %5338 = vmax.xlane.f32.xlu1 %v5337_v15  ;;  %v5513_v15 = vrot.slane %v9651_v1, %v9734_v8  ;;  %v6273_v49 = vsel %vm6271_vm5, %v5528_v37, %v5576_v39  ;;  %v5316_v33 = vsel %vm1827_vm2, %v9856_v29, -inf  ;;  %v5662_v3 = vrot.slane %v9693_v28, %v9730_v53 }
 0x42f   : > { %v9840_v6 = vpop.xlane.xlu1 %2970  ;;  %v5667_v10 = vrot.slane %v9710_v13, %v9734_v8  ;;  %v5343_v39 = vsel %vm1852_vm3, %v9844_v59, -inf }
 0x430   : > { %5335 = vmax.xlane.f32.xlu0 %v5334_v35  ;;  %v5519_v14 = vsel %vm1827_vm2, %v5518_v26, %v5513_v15  ;;  %v5385_v15 = vmax.f32 %v9654_v22, %v9666_v57  ;;  %v5407_v57 = vmax.f32 %v9673_v50, %v9693_v28 }
 0x431   : > { %v9846_v25 = vpop.xlane.xlu0 %2967  ;;  %v6272_v41 = vsel %vm6271_vm5, %v5519_v14, %v5567_v63 }
 0x432   : > { %5362 = vmax.xlane.f32.xlu1 %v5361_v48  ;;  %v5610_v48 = vrot.slane %v9676_v7, %v9734_v8 }
 0x433   : > { %v9858_v35 = vpop.xlane.xlu1 %2976 }
 0x434   : > { %5359 = vmax.xlane.f32.xlu0 %v5358_v34  ;;  %v5619_v34 = vrot.slane %v9685_v17, %v9734_v8  ;;  %v5615_v4 = vsel %vm1827_vm2, %v5614_v24, %v5610_v48  ;;  %v5319_v24 = vsel %vm1827_vm2, %v9844_v59, -inf }
 0x435   : > { %v9871_v11 = vpop.xlane.xlu0 %2973  ;;  %v6277_v22 = vsel %vm6276_vm6, %v6272_v41, %v5615_v4 }
 0x436   : > { %5296 = vmax.xlane.f32.xlu1 %v5295_v60  ;;  %v7161_v60 = vpop.f32.mrf.mxu0  ;;  %v5624_v19 = vsel %vm1827_vm2, %v5623_v12, %v5619_v34 }
 0x437   : > { %v9886_v36 = vpop.xlane.xlu1 %2994  ;;  %v6278_v37 = vsel %vm6276_vm6, %v6273_v49, %v5624_v19  ;;  %v5275_v34 = vmax.f32 %v9723_v61, %v7161_v60  ;;  %v5706_v19 = vrot.slane %v9846_v25, %v9734_v8  ;;  %v5340_v49 = vsel %vm1852_vm3, %v9856_v29, -inf }
 0x438   : > { %v5391_v26 = vmax.f32 %v9840_v6, %v9886_v36  ;;  %5293 = vmax.xlane.f32.xlu0 %v5292_v16  ;;  %v5180_v12 = vpop.f32.mrf.mxu0 }
 0x439   : > { %v9901_v58 = vpop.xlane.xlu0 %2991  ;;  %v5274_v60 = vmax.f32 %v9739_v20, %v5180_v12  ;;  %v5409_v20 = vmax.f32 %v9681_v43, %v9706_v47  ;;  %v5710_v12 = vrot.slane %v9840_v6, %v9730_v53 }
 0x43a   : > { %v9908_v48 = vmax.f32 %v5383_v0, %v5391_v26  ;;  %v5390_v1 = vmax.f32 %v9846_v25, %v9901_v58  ;;  %5320 = vmax.xlane.f32.xlu1 %v5319_v24  ;;  %v5658_v0 = vrot.slane %v9699_v62, %v9734_v8  ;;  %v5283_v25 = vadd.f32 %v5275_v34, %v9544_v32 }
 0x43b   : > { %v9916_v14 = vpop.xlane.xlu1 %3000  ;;  %v9977_v34 = vadd.f32 %v5274_v60, %v9551_v31 }
 0x43c   : > { %v9924_v63 = vmax.f32 %v5382_v52, %v5390_v1  ;;  %v5393_v4 = vmax.f32 %v9858_v35, %v9916_v14  ;;  %5317 = vmax.xlane.f32.xlu0 %v5316_v33  ;;  %v6349_v26 = vrot.slane %v9908_v48, %v9730_v53  ;;  %v5663_v33 = vsel %vm1827_vm2, %v5662_v3, %v5658_v0 }
 0x43d   : > { %v9932_v16 = vpop.xlane.xlu0 %2997  ;;  %v5367_v3 = vsel %vm1877_vm4, %v9844_v59, -inf  ;;  %v6282_v6 = vsel %vm6281_vm1, %v6277_v22, %v5663_v33  ;;  %v5711_v59 = vsel %vm1827_vm2, %v5710_v12, %v5706_v19  ;;  %v5408_v22 = vmax.f32 %v9685_v17, %v9710_v13 }
 0x43e   : > { %v6345_v52 = vrot.slane %v9924_v63, %v9734_v8  ;;  %v9940_v41 = vmax.f32 %v5385_v15, %v5393_v4  ;;  %v5392_v24 = vmax.f32 %v9871_v11, %v9932_v16  ;;  %5344 = vmax.xlane.f32.xlu1 %v5343_v39  ;;  %v5671_v15 = vrot.slane %v9706_v47, %v9730_v53 }
 0x43f   : > { %v3019_v1 = vpop.xlane.xlu1 %3018  ;;  %v6287_v17 = vsel %vm6286_vm0, %v6282_v6, %v5711_v59  ;;  %v5763_v13 = vrot.slane %v9932_v16, %v9734_v8  ;;  %v5767_v6 = vrot.slane %v9916_v14, %v9730_v53  ;;  %v5322_v28 = vsel %vm1827_vm2, %v9977_v34, -inf }
 0x440   : > { %v9955_v4 = vsel %vm1827_vm2, %v6349_v26, %v6345_v52  ;;  %v9957_v39 = vmax.f32 %v5384_v45, %v5392_v24  ;;  %5341 = vmax.xlane.f32.xlu0 %v5340_v49  ;;  %v5672_v0 = vsel %vm1827_vm2, %v5671_v15, %v5667_v10  ;;  %v9967_v26 = vpop.f32.mrf.mxu1  ;;  %v5754_v45 = vrot.slane %v9901_v58, %v9734_v8 }
 0x441   : > { %v3016_v61 = vpop.xlane.xlu0 %3015  ;;  %v6358_v52 = vrot.slane %v9940_v41, %v9730_v53  ;;  %v5364_v58 = vsel %vm1877_vm4, %v9856_v29, -inf  ;;  %v5715_v24 = vrot.slane %v9871_v11, %v9734_v8  ;;  %v5758_v49 = vrot.slane %v9886_v36, %v9730_v53 }
 0x442   : > { %v6354_v32 = vrot.slane %v9957_v39, %v9734_v8  ;;  %5368 = vmax.xlane.f32.xlu1 %v5367_v3  ;;  %v5802_v31 = vrot.slane %v3016_v61, %v9734_v8  ;;  %v6283_v60 = vsel %vm6281_vm1, %v6278_v37, %v5672_v0  ;;  %v5277_v29 = vmax.f32 %v9789_v40, %v9967_v26 }
 0x443   : > { %v9980_v10 = vpop.xlane.xlu1 %3024  ;;  %v5301_v11 = vsel %vm1802_vm15, %v5283_v25, -inf  ;;  %v5719_v36 = vrot.slane %v9858_v35, %v9730_v53  ;;  %v5759_v33 = vsel %vm1827_vm2, %v5758_v49, %v5754_v45  ;;  %v5806_v12 = vrot.slane %v3019_v1, %v9730_v53 }
 0x444   : > { %v9989_v15 = vsel %vm1827_vm2, %v6358_v52, %v6354_v32  ;;  %5365 = vmax.xlane.f32.xlu0 %v5364_v58  ;;  %v5325_v3 = vsel %vm1827_vm2, %v5283_v25, -inf  ;;  %v5298_v37 = vsel %vm1802_vm15, %v9977_v34, -inf  ;;  %v5349_v0 = vsel %vm1852_vm3, %v5283_v25, -inf }
 0x445   : > { %v3022_v19 = vpop.xlane.xlu0 %3021  ;;  %v5720_v35 = vsel %vm1827_vm2, %v5719_v36, %v5715_v24  ;;  %v5807_v26 = vsel %vm1827_vm2, %v5806_v12, %v5802_v31  ;;  %v6292_v32 = vsel %vm6291_vm7, %v6287_v17, %v5759_v33  ;;  %v5815_v16 = vrot.slane %v9980_v10, %v9730_v53 }
 0x446   : > { %5302 = vmax.xlane.f32.xlu1 %v5301_v11  ;;  %v5811_v45 = vrot.slane %v3022_v19, %v9734_v8  ;;  %v5373_v58 = vsel %vm1877_vm4, %v5283_v25, -inf  ;;  %v6288_v14 = vsel %vm6286_vm0, %v6283_v60, %v5720_v35  ;;  %v5768_v25 = vsel %vm1827_vm2, %v5767_v6, %v5763_v13 }
 0x447   : > { %v3043_v40 = vpop.xlane.xlu1 %3042  ;;  %v6297_v11 = vsel %vm6296_vm8, %v6292_v32, %v5807_v26  ;;  %v11077_v33 = vmax.f32 %v9676_v7, %v9699_v62  ;;  %v5346_v6 = vsel %vm1852_vm3, %v9977_v34, -inf }
 0x448   : > { %v5415_v52 = vmax.f32 %v3019_v1, %v3043_v40  ;;  %5299 = vmax.xlane.f32.xlu0 %v5298_v37  ;;  %v5854_v49 = vrot.slane %v3043_v40, %v9730_v53 }
 0x449   : > { %v3040_v59 = vpop.xlane.xlu0 %3039 }
 0x44a   : > { %v10022_v24 = vmax.f32 %v5407_v57, %v5415_v52  ;;  %v5414_v1 = vmax.f32 %v3016_v61, %v3040_v59  ;;  %v5850_v31 = vrot.slane %v3040_v59, %v9734_v8  ;;  %5326 = vmax.xlane.f32.xlu1 %v5325_v3  ;;  %v5261_v57 = vpop.f32.mrf.mxu1  ;;  %v5816_v61 = vsel %vm1827_vm2, %v5815_v16, %v5811_v45 }
 0x44b   : > { %v3049_v50 = vpop.xlane.xlu1 %3048  ;;  %v5276_v45 = vmax.f32 %v9809_v18, %v5261_v57  ;;  %v6293_v52 = vsel %vm6291_vm7, %v6288_v14, %v5768_v25  ;;  %v5285_v59 = vadd.f32 %v5277_v29, %v9560_v56  ;;  %v5370_v29 = vsel %vm1877_vm4, %v9977_v34, -inf }
 0x44c   : > { %v10042_v12 = vmax.f32 %v11077_v33, %v5414_v1  ;;  %v5855_v60 = vsel %vm1827_vm2, %v5854_v49, %v5850_v31  ;;  %5323 = vmax.xlane.f32.xlu0 %v5322_v28  ;;  %v6397_v3 = vrot.slane %v10022_v24, %v9730_v53  ;;  %v5417_v13 = vmax.f32 %v9980_v10, %v3049_v50 }
 0x44d   : > { %v6302_v17 = vsel %vm6301_vm9, %v6297_v11, %v5855_v60  ;;  %v5863_v40 = vrot.slane %v3049_v50, %v9730_v53  ;;  %v3046_v37 = vpop.xlane.xlu0 %3045  ;;  %v5284_v56 = vadd.f32 %v5276_v45, %v9566_v21  ;;  %v5307_v50 = vsel %vm1802_vm15, %v5285_v59, -inf }
 0x44e   : > { %v6393_v7 = vrot.slane %v10042_v12, %v9734_v8  ;;  %6590 = vst.msk [vmem:[%s10029_s7] sm:$0xff] %vm753_vm14, %v6302_v17  ;;  %v5416_v62 = vmax.f32 %v3022_v19, %v3046_v37  ;;  %v5859_v26 = vrot.slane %v3046_v37, %v9734_v8  ;;  %5350 = vmax.xlane.f32.xlu1 %v5349_v0 }
 0x44f   : > { %v10062_v10 = vmax.f32 %v5409_v20, %v5417_v13  ;;  %v10064_v32 = vpop.xlane.xlu1 %2982  ;;  %v6298_v19 = vsel %vm6296_vm8, %v6293_v52, %v5816_v61  ;;  %v5304_v21 = vsel %vm1802_vm15, %v5284_v56, -inf  ;;  %v5387_v28 = vmax.f32 %v9715_v38, %v9745_v5 }
 0x450   : > { %v6398_v16 = vsel %vm1827_vm2, %v6397_v3, %v6393_v7  ;;  %v10070_v0 = vmax.f32 %v5408_v22, %v5416_v62  ;;  %v5864_v18 = vsel %vm1827_vm2, %v5863_v40, %v5859_v26  ;;  %5347 = vmax.xlane.f32.xlu0 %v5346_v6  ;;  %v5331_v61 = vsel %vm1827_vm2, %v5285_v59, -inf }
 0x451   : > { %v10076_v43 = vsel %vm6271_vm5, %v9955_v4, %v6398_v16  ;;  %v6303_v20 = vsel %vm6301_vm9, %v6298_v19, %v5864_v18  ;;  %v2980_v49 = vpop.xlane.xlu0 %2979  ;;  %v6406_v1 = vrot.slane %v10062_v10, %v9730_v53  ;;  %v5328_v17 = vsel %vm1827_vm2, %v5284_v56, -inf }
 0x452   : > { %v6402_v31 = vrot.slane %v10070_v0, %v9734_v8  ;;  %6594 = vst.msk [vmem:[%s10029_s7 + $0x18] sm:$0xff] %vm753_vm14, %v6303_v20  ;;  %5374 = vmax.xlane.f32.xlu1 %v5373_v58  ;;  %v5676_v5 = vrot.slane %v9824_v27, %v9734_v8  ;;  %v11079_v7 = vmax.f32 %v9725_v54, %v9756_v51  ;;  %v5352_v19 = vsel %vm1852_vm3, %v5284_v56, -inf }
 0x453   : > { %v10090_v4 = vpop.xlane.xlu1 %2988  ;;  %v5680_v45 = vrot.slane %v9815_v44, %v9730_v53  ;;  %v5724_v52 = vrot.slane %v2980_v49, %v9734_v8  ;;  %v11081_v18 = vmax.f32 %v9736_v2, %v9764_v9  ;;  %v5728_v20 = vrot.slane %v10064_v32, %v9730_v53 }
 0x454   : > { %v6407_v14 = vsel %vm1827_vm2, %v6406_v1, %v6402_v31  ;;  %5371 = vmax.xlane.f32.xlu0 %v5370_v29  ;;  %v5685_v31 = vrot.slane %v9835_v55, %v9734_v8  ;;  %v5689_v9 = vrot.slane %v9829_v23, %v9730_v53 }
 0x455   : > { %v10097_v25 = vsel %vm6271_vm5, %v9989_v15, %v6407_v14  ;;  %v10099_v11 = vpop.xlane.xlu0 %2985  ;;  %v5386_v15 = vmax.f32 %v9719_v30, %v9749_v42  ;;  %v5355_v30 = vsel %vm1852_vm3, %v5285_v59, -inf  ;;  %v5681_v51 = vsel %vm1827_vm2, %v5680_v45, %v5676_v5 }
 0x456   : > { %5308 = vmax.xlane.f32.xlu1 %v5307_v50 }
 0x457   : > { %v3007_v58 = vpop.xlane.xlu1 %3006 }
 0x458   : > { %v5395_v34 = vmax.f32 %v10064_v32, %v3007_v58  ;;  %5305 = vmax.xlane.f32.xlu0 %v5304_v21  ;;  %v5729_v32 = vsel %vm1827_vm2, %v5728_v20, %v5724_v52  ;;  %v5733_v21 = vrot.slane %v10099_v11, %v9734_v8 }
 0x459   : > { %v3004_v57 = vpop.xlane.xlu0 %3003 }
 0x45a   : > { %v10109_v33 = vmax.f32 %v5387_v28, %v5395_v34  ;;  %v5394_v60 = vmax.f32 %v2980_v49, %v3004_v57  ;;  %5332 = vmax.xlane.f32.xlu1 %v5331_v61  ;;  %v5379_v49 = vsel %vm1877_vm4, %v5285_v59, -inf  ;;  %v5772_v29 = vrot.slane %v3004_v57, %v9734_v8 }
 0x45b   : > { %v10111_v3 = vpop.xlane.xlu1 %3012  ;;  %v5376_v59 = vsel %vm1877_vm4, %v5284_v56, -inf  ;;  %v5776_v28 = vrot.slane %v3007_v58, %v9730_v53  ;;  %v6284_v61 = vsel %vm6281_vm1, %v9804_v46, %v5681_v51  ;;  %v5737_v56 = vrot.slane %v10090_v4, %v9730_v53 }
 0x45c   : > { %v10114_v13 = vmax.f32 %v5386_v15, %v5394_v60  ;;  %v5397_v38 = vmax.f32 %v10090_v4, %v10111_v3  ;;  %5329 = vmax.xlane.f32.xlu0 %v5328_v17  ;;  %v6367_v42 = vrot.slane %v10109_v33, %v9730_v53  ;;  %v5690_v60 = vsel %vm1827_vm2, %v5689_v9, %v5685_v31  ;;  %v11086_v9 = vld [vmem:[#allocation53_spill] sm:$0xff] }
 0x45d   : > { %v3010_v40 = vpop.xlane.xlu0 %3009  ;;  %v5777_v17 = vsel %vm1827_vm2, %v5776_v28, %v5772_v29  ;;  %v6289_v58 = vsel %vm6286_vm0, %v6284_v61, %v5729_v32  ;;  %v5785_v45 = vrot.slane %v10111_v3, %v9730_v53  ;;  %v11087_v32 = vmax.f32 %v11086_v9, %v9824_v27 }
 0x45e   : > { %11078 = vst [vmem:[#allocation55_spill] sm:$0xff] %v10114_v13  ;;  %v6363_v37 = vrot.slane %v10114_v13, %v9734_v8  ;;  %v10128_v62 = vmax.f32 %v11079_v7, %v5397_v38  ;;  %v5396_v26 = vmax.f32 %v10099_v11, %v3010_v40  ;;  %5356 = vmax.xlane.f32.xlu1 %v5355_v30  ;;  %v11083_v7 = vld [vmem:[#allocation6_spill] sm:$0xff] }
 0x45f   : > { %v3031_v6 = vpop.xlane.xlu1 %3030  ;;  %v5781_v38 = vrot.slane %v3010_v40, %v9734_v8  ;;  %v5738_v30 = vsel %vm1827_vm2, %v5737_v56, %v5733_v21  ;;  %v6294_v4 = vsel %vm6291_vm7, %v6289_v58, %v5777_v17  ;;  %v11084_v40 = vld [vmem:[#allocation52_spill] sm:$0xff] }
 0x460   : > { %11080 = vst [vmem:[#allocation8_spill] sm:$0xff] %v10128_v62  ;;  %v10136_v16 = vsel %vm1827_vm2, %v6367_v42, %v6363_v37  ;;  %v10141_v54 = vmax.f32 %v11081_v18, %v5396_v26  ;;  %5353 = vmax.xlane.f32.xlu0 %v5352_v19  ;;  %v6376_v14 = vrot.slane %v10128_v62, %v9730_v53 }
 0x461   : > { %v3028_v1 = vpop.xlane.xlu0 %3027  ;;  %v5824_v11 = vrot.slane %v3031_v6, %v9730_v53  ;;  %v6285_v26 = vsel %vm6281_vm1, %v11083_v7, %v5690_v60  ;;  %v11085_v18 = vmax.f32 %v11084_v40, %v9815_v44  ;;  %v5786_v29 = vsel %vm1827_vm2, %v5785_v45, %v5781_v38  ;;  %v11089_v38 = vld [vmem:[#allocation5_spill] sm:$0xff] }
 0x462   : > { %11082 = vst [vmem:[#allocation56_spill] sm:$0xff] %v10141_v54  ;;  %v6372_v2 = vrot.slane %v10141_v54, %v9734_v8  ;;  %5380 = vmax.xlane.f32.xlu1 %v5379_v49  ;;  %v5820_v57 = vrot.slane %v3028_v1, %v9734_v8  ;;  %v6290_v31 = vsel %vm6286_vm0, %v6285_v26, %v5738_v30 }
 0x463   : > { %v3037_v50 = vpop.xlane.xlu1 %3036  ;;  %v6295_v58 = vsel %vm6291_vm7, %v6290_v31, %v5786_v29 }
 0x464   : > { %v10162_v34 = vsel %vm1827_vm2, %v6376_v14, %v6372_v2  ;;  %5377 = vmax.xlane.f32.xlu0 %v5376_v59  ;;  %v5825_v42 = vsel %vm1827_vm2, %v5824_v11, %v5820_v57  ;;  %v5833_v52 = vrot.slane %v3037_v50, %v9730_v53 }
 0x465   : > { %v3034_v15 = vpop.xlane.xlu0 %3033  ;;  %v6299_v3 = vsel %vm6296_vm8, %v6294_v4, %v5825_v42 }
 0x466   : > { %v5829_v46 = vrot.slane %v3034_v15, %v9734_v8 }
 0x467   : > { %v3055_v5 = vpop.xlane.xlu1 %3054 }
 0x468   : > { %v5419_v37 = vmax.f32 %v3031_v6, %v3055_v5  ;;  %v5872_v20 = vrot.slane %v3055_v5, %v9730_v53  ;;  %v5834_v2 = vsel %vm1827_vm2, %v5833_v52, %v5829_v46 }
 0x469   : > { %v3052_v19 = vpop.xlane.xlu0 %3051  ;;  %v6300_v42 = vsel %vm6296_vm8, %v6295_v58, %v5834_v2 }
 0x46a   : > { %v10186_v51 = vmax.f32 %v11085_v18, %v5419_v37  ;;  %v5418_v49 = vmax.f32 %v3028_v1, %v3052_v19  ;;  %v5868_v6 = vrot.slane %v3052_v19, %v9734_v8  ;;  %v11092_v37 = vld [vmem:[#allocation54_spill] sm:$0xff] }
 0x46b   : > { %v3061_v14 = vpop.xlane.xlu1 %3060  ;;  %v11093_v7 = vmax.f32 %v11092_v37, %v9835_v55 }
 0x46c   : > { %v10199_v59 = vmax.f32 %v11087_v32, %v5418_v49  ;;  %v5873_v1 = vsel %vm1827_vm2, %v5872_v20, %v5868_v6  ;;  %v6415_v21 = vrot.slane %v10186_v51, %v9730_v53  ;;  %v5421_v57 = vmax.f32 %v3037_v50, %v3061_v14 }
 0x46d   : > { %v6304_v28 = vsel %vm6301_vm9, %v6299_v3, %v5873_v1  ;;  %v5881_v61 = vrot.slane %v3061_v14, %v9730_v53  ;;  %v3058_v60 = vpop.xlane.xlu0 %3057  ;;  %v11090_v50 = vmax.f32 %v11089_v38, %v9829_v23 }
 0x46e   : > { %11088 = vst [vmem:[#allocation10_spill] sm:$0xff] %v10199_v59  ;;  %v6411_v17 = vrot.slane %v10199_v59, %v9734_v8  ;;  %6597 = vst.msk [vmem:[%s10029_s7 + $0x30] sm:$0xff] %vm753_vm14, %v6304_v28  ;;  %v5420_v27 = vmax.f32 %v3034_v15, %v3058_v60  ;;  %v5877_v11 = vrot.slane %v3058_v60, %v9734_v8 }
 0x46f   : > { %v10217_v5 = vmax.f32 %v11090_v50, %v5421_v57  ;;  %v10219_v30 = vpop.xlane.xlu1 %4130 }
 0x470   : > { %v6416_v46 = vsel %vm1827_vm2, %v6415_v21, %v6411_v17  ;;  %v10226_v15 = vmax.f32 %v11093_v7, %v5420_v27  ;;  %v5882_v26 = vsel %vm1827_vm2, %v5881_v61, %v5877_v11  ;;  %v5902_v52 = vrot.slane %v10219_v30, %v9730_v53 }
 0x471   : > { %11091 = vst [vmem:[#allocation57_spill] sm:$0xff] %v10217_v5  ;;  %v10231_v4 = vsel %vm6271_vm5, %v10136_v16, %v6416_v46  ;;  %v6305_v45 = vsel %vm6301_vm9, %v6300_v42, %v5882_v26  ;;  %v10238_v19 = vpop.xlane.xlu0 %4127  ;;  %v6424_v55 = vrot.slane %v10217_v5, %v9730_v53 }
 0x472   : > { %11094 = vst [vmem:[#allocation13_spill] sm:$0xff] %v10226_v15  ;;  %v6420_v16 = vrot.slane %v10226_v15, %v9734_v8  ;;  %6600 = vst.msk [vmem:[%s10029_s7 + $0x48] sm:$0xff] %vm753_vm14, %v6305_v45  ;;  %v5898_v18 = vrot.slane %v10238_v19, %v9734_v8 }
 0x473   : > { %v10250_v20 = vpop.xlane.xlu1 %4136 }
 0x474   : > { %v6425_v49 = vsel %vm1827_vm2, %v6424_v55, %v6420_v16  ;;  %v10254_v6 = vsel %vm1827_vm2, %v5902_v52, %v5898_v18  ;;  %v5911_v3 = vrot.slane %v10250_v20, %v9730_v53 }
 0x475   : > { %v10258_v31 = vsel %vm6271_vm5, %v10162_v34, %v6425_v49  ;;  %v10260_v29 = vpop.xlane.xlu0 %4133 }
 0x476   : > { %11095 = vst [vmem:[#allocation58_spill] sm:$0xff] %v10258_v31  ;;  %v5907_v14 = vrot.slane %v10260_v29, %v9734_v8 }
 0x477   : > { %v10266_v2 = vpop.xlane.xlu1 %4154 }
 0x478   : > { %v5912_v9 = vsel %vm1827_vm2, %v5911_v3, %v5907_v14  ;;  %v5950_v15 = vrot.slane %v10266_v2, %v9730_v53 }
 0x479   : > { %v10271_v1 = vpop.xlane.xlu0 %4151 }
 0x47a   : > { %v11105_v13 = vmax.f32 %v10238_v19, %v10271_v1 }
 0x47b   : > { %v10275_v21 = vpop.xlane.xlu1 %4160 }
 0x47c   : > { %v5959_v61 = vrot.slane %v10275_v21, %v9730_v53 }
 0x47d   : > { %v10279_v57 = vpop.xlane.xlu0 %4157 }
 0x47e   : > { %v5955_v17 = vrot.slane %v10279_v57, %v9734_v8 }
 0x47f   : > { %v10287_v27 = vpop.xlane.xlu1 %4178 }
 0x480   : > { %v5960_v11 = vsel %vm1827_vm2, %v5959_v61, %v5955_v17 }
 0x481   : > { %v6307_v58 = vsel %vm6271_vm5, %v5912_v9, %v5960_v11  ;;  %v10291_v38 = vpop.xlane.xlu0 %4175 }
 0x482   : > { %v5994_v54 = vrot.slane %v10291_v38, %v9734_v8 }
 0x483   : > { %v10293_v50 = vpop.xlane.xlu1 %4184 }
 0x484   : > { %v6007_v46 = vrot.slane %v10293_v50, %v9730_v53 }
 0x485   : > { %v10295_v42 = vpop.xlane.xlu0 %4181 }
 0x486   : > { %v6003_v37 = vrot.slane %v10295_v42, %v9734_v8 }
 0x487   : > { %v10301_v7 = vpop.xlane.xlu1 %4202 }
 0x488   : > { %v6008_v26 = vsel %vm1827_vm2, %v6007_v46, %v6003_v37  ;;  %v5455_v19 = vmax.f32 %v10287_v27, %v10301_v7 }
 0x489   : > { %v10305_v45 = vsel %vm6276_vm6, %v6307_v58, %v6008_v26  ;;  %v10307_v52 = vpop.xlane.xlu0 %4199 }
 0x48a   : > { %v6042_v36 = vrot.slane %v10307_v52, %v9734_v8 }
 0x48b   : > { %v10309_v55 = vpop.xlane.xlu1 %4208 }
 0x48d   : > { %v10313_v18 = vpop.xlane.xlu0 %4205 }
 0x48f   : > { %v10317_v3 = vpop.xlane.xlu1 %4142 }
 0x490   : > { %v5920_v9 = vrot.slane %v10317_v3, %v9730_v53 }
 0x491   : > { %v10319_v14 = vpop.xlane.xlu0 %4139 }
 0x492   : > { %v5916_v61 = vrot.slane %v10319_v14, %v9734_v8 }
 0x493   : > { %v10325_v17 = vpop.xlane.xlu1 %4148 }
 0x494   : > { %11096 = vst [vmem:[#allocation17_spill] sm:$0xff] %v10325_v17  ;;  %v10328_v11 = vsel %vm1827_vm2, %v5920_v9, %v5916_v61  ;;  %v5929_v46 = vrot.slane %v10325_v17, %v9730_v53  ;;  %v6046_v17 = vrot.slane %v10301_v7, %v9730_v53 }
 0x495   : > { %v10330_v58 = vpop.xlane.xlu0 %4145 }
 0x496   : > { %11097 = vst [vmem:[#allocation59_spill] sm:$0xff] %v10330_v58  ;;  %v5925_v37 = vrot.slane %v10330_v58, %v9734_v8 }
 0x497   : > { %v10336_v26 = vpop.xlane.xlu1 %4166 }
 0x498   : > { %v5930_v40 = vsel %vm1827_vm2, %v5929_v46, %v5925_v37 }
 0x499   : > { %v10341_v56 = vpop.xlane.xlu0 %4163 }
 0x49b   : > { %v10345_v61 = vpop.xlane.xlu1 %4172 }
 0x49c   : > { %11098 = vst [vmem:[#allocation60_spill] sm:$0xff] %v10345_v61  ;;  %v5977_v47 = vrot.slane %v10345_v61, %v9730_v53 }
 0x49d   : > { %v10349_v22 = vpop.xlane.xlu0 %4169 }
 0x49e   : > { %11099 = vst [vmem:[#allocation61_spill] sm:$0xff] %v10349_v22  ;;  %v5973_v37 = vrot.slane %v10349_v22, %v9734_v8  ;;  %v11104_v22 = vmax.f32 %v10219_v30, %v10266_v2 }
 0x49f   : > { %v10357_v23 = vpop.xlane.xlu1 %4190 }
 0x4a0   : > { %v5978_v9 = vsel %vm1827_vm2, %v5977_v47, %v5973_v37  ;;  %v5946_v37 = vrot.slane %v10271_v1, %v9734_v8 }
 0x4a1   : > { %v10361_v49 = vsel %vm6271_vm5, %v5930_v40, %v5978_v9  ;;  %v10363_v16 = vpop.xlane.xlu0 %4187 }
 0x4a2   : > { %11100 = vst [vmem:[#allocation62_spill] sm:$0xff] %v10361_v49  ;;  %v5951_v47 = vsel %vm1827_vm2, %v5950_v15, %v5946_v37  ;;  %v5998_v49 = vrot.slane %v10287_v27, %v9730_v53 }
 0x4a3   : > { %v10365_v44 = vpop.xlane.xlu1 %4214 }
 0x4a4   : > { %v5999_v59 = vsel %vm1827_vm2, %v5998_v49, %v5994_v54 }
 0x4a5   : > { %v10367_v60 = vpop.xlane.xlu0 %4211 }
 0x4a7   : > { %v10369_v28 = vpop.xlane.xlu1 %4196 }
 0x4a8   : > { %11101 = vst [vmem:[#allocation63_spill] sm:$0xff] %v10369_v28  ;;  %v6306_v28 = vsel %vm6271_vm5, %v10254_v6, %v5951_v47 }
 0x4a9   : > { %v10371_v35 = vpop.xlane.xlu0 %4193 }
 0x4ab   : > { %v10373_v46 = vpop.xlane.xlu1 %4220 }
 0x4ac   : > { %11102 = vst [vmem:[#allocation64_spill] sm:$0xff] %v10373_v46 }
 0x4ad   : > { %v10377_v34 = vpop.xlane.xlu0 %4217 }
 0x4ae   : > { %11103 = vst [vmem:[#allocation65_spill] sm:$0xff] %v10377_v34 }
 0x4af   : > { %v5291_v40 = vpop.xlane.xlu1 %5290 }
 0x4b0   : > { %v6094_v46 = vrot.slane %v5291_v40, %v9730_v53 }
 0x4b1   : > { %v5288_v9 = vpop.xlane.xlu0 %5287 }
 0x4b2   : > { %v6090_v62 = vrot.slane %v5288_v9, %v9734_v8 }
 0x4b3   : > { %v5315_v32 = vpop.xlane.xlu1 %5314 }
 0x4b4   : > { %v5439_v5 = vmax.f32 %v5291_v40, %v5315_v32  ;;  %v6142_v2 = vrot.slane %v5315_v32, %v9730_v53 }
 0x4b5   : > { %v5312_v31 = vpop.xlane.xlu0 %5311 }
 0x4b6   : > { %v5447_v58 = vmax.f32 %v11104_v22, %v5439_v5  ;;  %v5438_v61 = vmax.f32 %v5288_v9, %v5312_v31  ;;  %v6138_v37 = vrot.slane %v5312_v31, %v9734_v8  ;;  %v6047_v22 = vsel %vm1827_vm2, %v6046_v17, %v6042_v36 }
 0x4b7   : > { %v5339_v34 = vpop.xlane.xlu1 %5338  ;;  %v6095_v5 = vsel %vm1827_vm2, %v6094_v46, %v6090_v62  ;;  %v5454_v17 = vmax.f32 %v10291_v38, %v10307_v52 }
 0x4b8   : > { %v5446_v15 = vmax.f32 %v11105_v13, %v5438_v61  ;;  %v6445_v40 = vrot.slane %v5447_v58, %v9730_v53  ;;  %v6310_v13 = vsel %vm6276_vm6, %v6306_v28, %v5999_v59  ;;  %v6190_v6 = vrot.slane %v5339_v34, %v9730_v53 }
 0x4b9   : > { %v5336_v30 = vpop.xlane.xlu0 %5335  ;;  %v6314_v36 = vsel %vm6281_vm1, %v6310_v13, %v6047_v22  ;;  %v6143_v62 = vsel %vm1827_vm2, %v6142_v2, %v6138_v37 }
 0x4ba   : > { %v6441_v54 = vrot.slane %v5446_v15, %v9734_v8  ;;  %v6186_v49 = vrot.slane %v5336_v30, %v9734_v8  ;;  %v6318_v61 = vsel %vm6286_vm0, %v6314_v36, %v6095_v5 }
 0x4bb   : > { %v5363_v31 = vpop.xlane.xlu1 %5362 }
 0x4bc   : > { %v6446_v32 = vsel %vm1827_vm2, %v6445_v40, %v6441_v54  ;;  %v5463_v1 = vmax.f32 %v5339_v34, %v5363_v31  ;;  %v6191_v28 = vsel %vm1827_vm2, %v6190_v6, %v6186_v49  ;;  %v6238_v46 = vrot.slane %v5363_v31, %v9730_v53 }
 0x4bd   : > { %v6578_v59 = vsel %vm6276_vm6, %v10076_v43, %v6446_v32  ;;  %v5360_v27 = vpop.xlane.xlu0 %5359  ;;  %v6322_v34 = vsel %vm6291_vm7, %v6318_v61, %v6143_v62  ;;  %v11106_v40 = vmax.f32 %v9908_v48, %v10022_v24  ;;  %v6051_v31 = vrot.slane %v10313_v18, %v9734_v8 }
 0x4be   : > { %v5471_v7 = vmax.f32 %v5455_v19, %v5463_v1  ;;  %v5462_v47 = vmax.f32 %v5336_v30, %v5360_v27  ;;  %v6234_v9 = vrot.slane %v5360_v27, %v9734_v8  ;;  %v6326_v38 = vsel %vm6296_vm8, %v6322_v34, %v6191_v28 }
 0x4bf   : > { %v5297_v37 = vpop.xlane.xlu1 %5296 }
 0x4c0   : > { %v5487_v52 = vmax.f32 %v5447_v58, %v5471_v7  ;;  %v5470_v22 = vmax.f32 %v5454_v17, %v5462_v47  ;;  %v6239_v5 = vsel %vm1827_vm2, %v6238_v46, %v6234_v9  ;;  %v6493_v13 = vrot.slane %v5471_v7, %v9730_v53 }
 0x4c1   : > { %v6330_v43 = vsel %vm6301_vm9, %v6326_v38, %v6239_v5  ;;  %v5294_v2 = vpop.xlane.xlu0 %5293  ;;  %v11107_v58 = vmax.f32 %v9924_v63, %v10042_v12  ;;  %v6055_v17 = vrot.slane %v10309_v55, %v9730_v53  ;;  %v6103_v63 = vrot.slane %v5297_v37, %v9730_v53 }
 0x4c2   : > { %v5495_v54 = vmax.f32 %v11106_v40, %v5487_v52  ;;  %v5486_v49 = vmax.f32 %v5446_v15, %v5470_v22  ;;  %v6489_v30 = vrot.slane %v5470_v22, %v9734_v8  ;;  %6591 = vst.msk [vmem:[%s10029_s7 + $0x8] sm:$0xff] %vm753_vm14, %v6330_v43  ;;  %v6099_v48 = vrot.slane %v5294_v2, %v9734_v8 }
 0x4c3   : > { %v5321_v19 = vpop.xlane.xlu1 %5320  ;;  %v11108_v12 = vmax.f32 %v10250_v20, %v10275_v21  ;;  %v11109_v46 = vmax.f32 %v10260_v29, %v10279_v57  ;;  %v6056_v34 = vsel %vm1827_vm2, %v6055_v17, %v6051_v31 }
 0x4c4   : > { %v5494_v6 = vmax.f32 %v11107_v58, %v5486_v49  ;;  %v6494_v36 = vsel %vm1827_vm2, %v6493_v13, %v6489_v30  ;;  %v5441_v24 = vmax.f32 %v5297_v37, %v5321_v19  ;;  %v6541_v62 = vrot.slane %v5495_v54, %v9730_v53 }
 0x4c5   : > { %v5318_v15 = vpop.xlane.xlu0 %5317  ;;  %v6582_v7 = vsel %vm6281_vm1, %v6578_v59, %v6494_v36  ;;  %v6104_v37 = vsel %vm1827_vm2, %v6103_v63, %v6099_v48  ;;  %v6151_v20 = vrot.slane %v5321_v19, %v9730_v53  ;;  %v6315_v5 = vsel %vm6281_vm1, %v10305_v45, %v6056_v34 }
 0x4c6   : > { %v6537_v32 = vrot.slane %v5494_v6, %v9734_v8  ;;  %v5440_v1 = vmax.f32 %v5294_v2, %v5318_v15  ;;  %v5449_v61 = vmax.f32 %v11108_v12, %v5441_v24  ;;  %v6147_v9 = vrot.slane %v5318_v15, %v9734_v8 }
 0x4c7   : > { %v5345_v28 = vpop.xlane.xlu1 %5344  ;;  %v6319_v54 = vsel %vm6286_vm0, %v6315_v5, %v6104_v37  ;;  %v11110_v19 = vmax.f32 %v10293_v50, %v10309_v55  ;;  %v5964_v36 = vrot.slane %v10341_v56, %v9734_v8  ;;  %v11112_v63 = vmax.f32 %v9940_v41, %v10062_v10 }
 0x4c8   : > { %v6542_v27 = vsel %vm1827_vm2, %v6541_v62, %v6537_v32  ;;  %v5448_v47 = vmax.f32 %v11109_v46, %v5440_v1  ;;  %v6454_v21 = vrot.slane %v5449_v61, %v9730_v53  ;;  %v6199_v57 = vrot.slane %v5345_v28, %v9730_v53 }
 0x4c9   : > { %v6586_v38 = vsel %vm6286_vm0, %v6582_v7, %v6542_v27  ;;  %v5342_v52 = vpop.xlane.xlu0 %5341  ;;  %v6152_v43 = vsel %vm1827_vm2, %v6151_v20, %v6147_v9  ;;  %v11111_v62 = vmax.f32 %v10295_v42, %v10313_v18  ;;  %v5968_v32 = vrot.slane %v10336_v26, %v9730_v53 }
 0x4ca   : > { %6593 = vst.msk [vmem:[%s10029_s7 + $0x10] sm:$0x1f] %vm6592_vm10, %v6586_v38  ;;  %v6450_v59 = vrot.slane %v5448_v47, %v9734_v8  ;;  %v6195_v29 = vrot.slane %v5342_v52, %v9734_v8  ;;  %v6323_v48 = vsel %vm6291_vm7, %v6319_v54, %v6152_v43  ;;  %v6012_v7 = vrot.slane %v10363_v16, %v9734_v8 }
 0x4cb   : > { %v5369_v22 = vpop.xlane.xlu1 %5368  ;;  %v5969_v18 = vsel %vm1827_vm2, %v5968_v32, %v5964_v36  ;;  %v11113_v46 = vmax.f32 %v9957_v39, %v10070_v0  ;;  %v6060_v10 = vrot.slane %v10367_v60, %v9734_v8 }
 0x4cc   : > { %v6455_v2 = vsel %vm1827_vm2, %v6454_v21, %v6450_v59  ;;  %v5465_v40 = vmax.f32 %v5345_v28, %v5369_v22  ;;  %v6200_v30 = vsel %vm1827_vm2, %v6199_v57, %v6195_v29  ;;  %v6247_v6 = vrot.slane %v5369_v22, %v9730_v53 }
 0x4cd   : > { %v6579_v49 = vsel %vm6276_vm6, %v10097_v25, %v6455_v2  ;;  %v5366_v13 = vpop.xlane.xlu0 %5365  ;;  %v6327_v25 = vsel %vm6296_vm8, %v6323_v48, %v6200_v30  ;;  %v6064_v21 = vrot.slane %v10365_v44, %v9730_v53  ;;  %v11114_v29 = vmax.f32 %v10317_v3, %v10336_v26 }
 0x4ce   : > { %v5473_v58 = vmax.f32 %v11110_v19, %v5465_v40  ;;  %v5464_v45 = vmax.f32 %v5342_v52, %v5366_v13  ;;  %v6243_v31 = vrot.slane %v5366_v13, %v9734_v8  ;;  %v6016_v52 = vrot.slane %v10357_v23, %v9730_v53 }
 0x4cf   : > { %v5303_v24 = vpop.xlane.xlu1 %5302  ;;  %v11115_v2 = vmax.f32 %v10319_v14, %v10341_v56  ;;  %v6065_v30 = vsel %vm1827_vm2, %v6064_v21, %v6060_v10 }
 0x4d0   : > { %v5489_v15 = vmax.f32 %v5449_v61, %v5473_v58  ;;  %v5472_v50 = vmax.f32 %v11111_v62, %v5464_v45  ;;  %v6248_v55 = vsel %vm1827_vm2, %v6247_v6, %v6243_v31  ;;  %v6502_v28 = vrot.slane %v5473_v58, %v9730_v53 }
 0x4d1   : > { %v6331_v1 = vsel %vm6301_vm9, %v6327_v25, %v6248_v55  ;;  %v5300_v17 = vpop.xlane.xlu0 %5299  ;;  %v6112_v59 = vrot.slane %v5303_v24, %v9730_v53  ;;  %v6017_v5 = vsel %vm1827_vm2, %v6016_v52, %v6012_v7 }
 0x4d2   : > { %v5497_v12 = vmax.f32 %v11112_v63, %v5489_v15  ;;  %v5488_v27 = vmax.f32 %v5448_v47, %v5472_v50  ;;  %v6498_v61 = vrot.slane %v5472_v50, %v9734_v8  ;;  %6595 = vst.msk [vmem:[%s10029_s7 + $0x20] sm:$0xff] %vm753_vm14, %v6331_v1  ;;  %v6108_v34 = vrot.slane %v5300_v17, %v9734_v8 }
 0x4d3   : > { %v5327_v42 = vpop.xlane.xlu1 %5326  ;;  %v5458_v15 = vmax.f32 %v10363_v16, %v10367_v60 }
 0x4d4   : > { %v5496_v9 = vmax.f32 %v11113_v46, %v5488_v27  ;;  %v6503_v41 = vsel %vm1827_vm2, %v6502_v28, %v6498_v61  ;;  %v5443_v38 = vmax.f32 %v5303_v24, %v5327_v42  ;;  %v6550_v20 = vrot.slane %v5497_v12, %v9730_v53 }
 0x4d5   : > { %v6583_v47 = vsel %vm6281_vm1, %v6579_v49, %v6503_v41  ;;  %v5324_v37 = vpop.xlane.xlu0 %5323  ;;  %v6308_v49 = vsel %vm6271_vm5, %v10328_v11, %v5969_v18  ;;  %v6113_v3 = vsel %vm1827_vm2, %v6112_v59, %v6108_v34  ;;  %v6160_v19 = vrot.slane %v5327_v42, %v9730_v53 }
 0x4d6   : > { %v6546_v39 = vrot.slane %v5496_v9, %v9734_v8  ;;  %v5442_v0 = vmax.f32 %v5300_v17, %v5324_v37  ;;  %v5451_v57 = vmax.f32 %v11114_v29, %v5443_v38  ;;  %v6156_v54 = vrot.slane %v5324_v37, %v9734_v8  ;;  %v11118_v38 = vld [vmem:[#allocation55_spill] sm:$0xff]  ;;  %v11119_v37 = vld [vmem:[#allocation10_spill] sm:$0xff] }
 0x4d7   : > { %v5351_v22 = vpop.xlane.xlu1 %5350  ;;  %v6312_v6 = vsel %vm6276_vm6, %v6308_v49, %v6017_v5  ;;  %v5459_v11 = vmax.f32 %v10357_v23, %v10365_v44  ;;  %v11116_v42 = vmax.f32 %v10109_v33, %v10186_v51  ;;  %v6021_v9 = vrot.slane %v10371_v35, %v9734_v8  ;;  %v11121_v33 = vld [vmem:[#allocation65_spill] sm:$0xff]  ;;  %v11124_v49 = vld [vmem:[#allocation60_spill] sm:$0xff] }
 0x4d8   : > { %v6551_v43 = vsel %vm1827_vm2, %v6550_v20, %v6546_v39  ;;  %v5450_v40 = vmax.f32 %v11115_v2, %v5442_v0  ;;  %v6463_v58 = vrot.slane %v5451_v57, %v9730_v53  ;;  %v6208_v45 = vrot.slane %v5351_v22, %v9730_v53 }
 0x4d9   : > { %v6587_v13 = vsel %vm6286_vm0, %v6583_v47, %v6551_v43  ;;  %v5348_v26 = vpop.xlane.xlu0 %5347  ;;  %v6316_v36 = vsel %vm6281_vm1, %v6312_v6, %v6065_v30  ;;  %v6161_v48 = vsel %vm1827_vm2, %v6160_v19, %v6156_v54  ;;  %v11117_v47 = vld [vmem:[#allocation63_spill] sm:$0xff]  ;;  %v11120_v52 = vmax.f32 %v11118_v38, %v11119_v37  ;;  %v11122_v43 = vld [vmem:[#allocation64_spill] sm:$0xff]  ;;  %v11123_v54 = vld [vmem:[#allocation17_spill] sm:$0xff] }
 0x4da   : > { %6596 = vst.msk [vmem:[%s10029_s7 + $0x28] sm:$0x1f] %vm6592_vm10, %v6587_v13  ;;  %v6459_v56 = vrot.slane %v5450_v40, %v9734_v8  ;;  %v6204_v14 = vrot.slane %v5348_v26, %v9734_v8  ;;  %v6320_v62 = vsel %vm6286_vm0, %v6316_v36, %v6113_v3  ;;  %v6025_v34 = vrot.slane %v11117_v47, %v9730_v53  ;;  %v11133_v37 = vld [vmem:[#allocation8_spill] sm:$0xff] }
 0x4db   : > { %v5375_v31 = vpop.xlane.xlu1 %5374  ;;  %v6324_v63 = vsel %vm6291_vm7, %v6320_v62, %v6161_v48  ;;  %v6069_v51 = vrot.slane %v11121_v33, %v9734_v8  ;;  %v6073_v2 = vrot.slane %v11122_v43, %v9730_v53  ;;  %v11125_v30 = vmax.f32 %v11123_v54, %v11124_v49 }
 0x4dc   : > { %v6464_v24 = vsel %vm1827_vm2, %v6463_v58, %v6459_v56  ;;  %v5467_v25 = vmax.f32 %v5351_v22, %v5375_v31  ;;  %v6209_v44 = vsel %vm1827_vm2, %v6208_v45, %v6204_v14  ;;  %v6256_v32 = vrot.slane %v5375_v31, %v9730_v53  ;;  %v11126_v58 = vld [vmem:[#allocation59_spill] sm:$0xff]  ;;  %v11127_v56 = vld [vmem:[#allocation61_spill] sm:$0xff] }
 0x4dd   : > { %v6580_v50 = vsel %vm6276_vm6, %v10231_v4, %v6464_v24  ;;  %v5372_v23 = vpop.xlane.xlu0 %5371  ;;  %v6328_v60 = vsel %vm6296_vm8, %v6324_v63, %v6209_v44  ;;  %v6026_v5 = vsel %vm1827_vm2, %v6025_v34, %v6021_v9  ;;  %v11128_v14 = vmax.f32 %v11126_v58, %v11127_v56 }
 0x4de   : > { %v5475_v55 = vmax.f32 %v5459_v11, %v5467_v25  ;;  %v5466_v1 = vmax.f32 %v5348_v26, %v5372_v23  ;;  %v6252_v17 = vrot.slane %v5372_v23, %v9734_v8  ;;  %v6074_v45 = vsel %vm1827_vm2, %v6073_v2, %v6069_v51 }
 0x4df   : > { %v5309_v12 = vpop.xlane.xlu1 %5308 }
 0x4e0   : > { %v5491_v16 = vmax.f32 %v5451_v57, %v5475_v55  ;;  %v5474_v28 = vmax.f32 %v5458_v15, %v5466_v1  ;;  %v6257_v27 = vsel %vm1827_vm2, %v6256_v32, %v6252_v17  ;;  %v6511_v41 = vrot.slane %v5475_v55, %v9730_v53 }
 0x4e1   : > { %v6332_v4 = vsel %vm6301_vm9, %v6328_v60, %v6257_v27  ;;  %v5306_v61 = vpop.xlane.xlu0 %5305  ;;  %v11130_v60 = vld [vmem:[#allocation58_spill] sm:$0xff] }
 0x4e2   : > { %v5499_v18 = vmax.f32 %v11116_v42, %v5491_v16  ;;  %v5490_v7 = vmax.f32 %v5450_v40, %v5474_v28  ;;  %v6507_v46 = vrot.slane %v5474_v28, %v9734_v8  ;;  %6598 = vst.msk [vmem:[%s10029_s7 + $0x38] sm:$0xff] %vm753_vm14, %v6332_v4  ;;  %v6117_v0 = vrot.slane %v5306_v61, %v9734_v8 }
 0x4e3   : > { %v5333_v10 = vpop.xlane.xlu1 %5332  ;;  %v6121_v40 = vrot.slane %v5309_v12, %v9730_v53  ;;  %v11131_v4 = vmax.f32 %v11117_v47, %v11122_v43 }
 0x4e4   : > { %v5498_v20 = vmax.f32 %v11120_v52, %v5490_v7  ;;  %v6512_v39 = vsel %vm1827_vm2, %v6511_v41, %v6507_v46  ;;  %v5445_v21 = vmax.f32 %v5309_v12, %v5333_v10  ;;  %v6559_v29 = vrot.slane %v5499_v18, %v9730_v53  ;;  %v11134_v52 = vld [vmem:[#allocation57_spill] sm:$0xff] }
 0x4e5   : > { %v5330_v59 = vpop.xlane.xlu0 %5329  ;;  %v6584_v19 = vsel %vm6281_vm1, %v6580_v50, %v6512_v39  ;;  %v6122_v36 = vsel %vm1827_vm2, %v6121_v40, %v6117_v0  ;;  %v6169_v24 = vrot.slane %v5333_v10, %v9730_v53  ;;  %v11129_v50 = vld [vmem:[#allocation62_spill] sm:$0xff]  ;;  %v11132_v10 = vmax.f32 %v10371_v35, %v11121_v33 }
 0x4e6   : > { %v6555_v57 = vrot.slane %v5498_v20, %v9734_v8  ;;  %v5444_v22 = vmax.f32 %v5306_v61, %v5330_v59  ;;  %v5453_v13 = vmax.f32 %v11125_v30, %v5445_v21  ;;  %v6165_v11 = vrot.slane %v5330_v59, %v9734_v8  ;;  %v11136_v59 = vld [vmem:[#allocation56_spill] sm:$0xff] }
 0x4e7   : > { %v5357_v3 = vpop.xlane.xlu1 %5356  ;;  %v6313_v44 = vsel %vm6276_vm6, %v11129_v50, %v6026_v5  ;;  %v11135_v20 = vmax.f32 %v11133_v37, %v11134_v52 }
 0x4e8   : > { %v6560_v26 = vsel %vm1827_vm2, %v6559_v29, %v6555_v57  ;;  %v5452_v6 = vmax.f32 %v11128_v14, %v5444_v22  ;;  %v6472_v25 = vrot.slane %v5453_v13, %v9730_v53  ;;  %v6217_v23 = vrot.slane %v5357_v3, %v9730_v53  ;;  %v11137_v29 = vld [vmem:[#allocation13_spill] sm:$0xff] }
 0x4e9   : > { %v6588_v31 = vsel %vm6286_vm0, %v6584_v19, %v6560_v26  ;;  %v5354_v48 = vpop.xlane.xlu0 %5353  ;;  %v6317_v32 = vsel %vm6281_vm1, %v6313_v44, %v6074_v45  ;;  %v6170_v1 = vsel %vm1827_vm2, %v6169_v24, %v6165_v11  ;;  %v11138_v35 = vmax.f32 %v11136_v59, %v11137_v29 }
 0x4ea   : > { %6599 = vst.msk [vmem:[%s10029_s7 + $0x40] sm:$0x1f] %vm6592_vm10, %v6588_v31  ;;  %v6468_v15 = vrot.slane %v5452_v6, %v9734_v8  ;;  %v6213_v62 = vrot.slane %v5354_v48, %v9734_v8  ;;  %v6321_v12 = vsel %vm6286_vm0, %v6317_v32, %v6122_v36 }
 0x4eb   : > { %v5381_v55 = vpop.xlane.xlu1 %5380  ;;  %v6325_v46 = vsel %vm6291_vm7, %v6321_v12, %v6170_v1 }
 0x4ec   : > { %v6473_v17 = vsel %vm1827_vm2, %v6472_v25, %v6468_v15  ;;  %v5469_v63 = vmax.f32 %v5357_v3, %v5381_v55  ;;  %v6218_v28 = vsel %vm1827_vm2, %v6217_v23, %v6213_v62  ;;  %v6265_v42 = vrot.slane %v5381_v55, %v9730_v53 }
 0x4ed   : > { %v6581_v16 = vsel %vm6276_vm6, %v11130_v60, %v6473_v17  ;;  %v5378_v27 = vpop.xlane.xlu0 %5377  ;;  %v6329_v9 = vsel %vm6296_vm8, %v6325_v46, %v6218_v28 }
 0x4ee   : > { %v5477_v61 = vmax.f32 %v11131_v4, %v5469_v63  ;;  %v5468_v18 = vmax.f32 %v5354_v48, %v5378_v27  ;;  %v6261_v7 = vrot.slane %v5378_v27, %v9734_v8 }
 0x4f0   : > { %v5493_v41 = vmax.f32 %v5453_v13, %v5477_v61  ;;  %v5476_v34 = vmax.f32 %v11132_v10, %v5468_v18  ;;  %v6266_v38 = vsel %vm1827_vm2, %v6265_v42, %v6261_v7  ;;  %v6520_v39 = vrot.slane %v5477_v61, %v9730_v53 }
 0x4f1   : > { %v6333_v47 = vsel %vm6301_vm9, %v6329_v9, %v6266_v38 }
 0x4f2   : > { %v5501_v51 = vmax.f32 %v11135_v20, %v5493_v41  ;;  %v5492_v0 = vmax.f32 %v5452_v6, %v5476_v34  ;;  %v6516_v21 = vrot.slane %v5476_v34, %v9734_v8  ;;  %6601 = vst.msk [vmem:[%s10029_s7 + $0x50] sm:$0xff] %vm753_vm14, %v6333_v47 }
 0x4f4   : > { %v5500_v33 = vmax.f32 %v11138_v35, %v5492_v0  ;;  %v6521_v57 = vsel %vm1827_vm2, %v6520_v39, %v6516_v21  ;;  %v6568_v5 = vrot.slane %v5501_v51, %v9730_v53 }
 0x4f5   : > { %v6585_v22 = vsel %vm6281_vm1, %v6581_v16, %v6521_v57 }
 0x4f6   : > { %v6564_v43 = vrot.slane %v5500_v33, %v9734_v8 }
 0x4f8   : > { %v6569_v2 = vsel %vm1827_vm2, %v6568_v5, %v6564_v43 }
 0x4f9   : > { %v6589_v40 = vsel %vm6286_vm0, %v6585_v22, %v6569_v2 }
 0x4fa   : > { %6602 = vst.msk [vmem:[%s10029_s7 + $0x58] sm:$0x1f] %vm6592_vm10, %v6589_v40 }
 0x4fb PF: > { %s14_s15 = sadd.s32 1, %s7243_s15  }
 0x4fc   : > { %p11_p4 = scmp.ge.s32.totalorder %s14_s15, 4  }
 0x4fe   :  { %13 = sbr.rel (!%p11_p4) target bundleno = 1 (0x1), region = 69 }

</bundles_post_ra>
